<compile_context>
chip_gen: v7x
topology: tpu7x:2x2x1
jax: 0.10.0
libtpu: 0.0.40
codegen_flags: <defaults>
</compile_context>

<pallas_src>
import functools

import jax
import jax.numpy as jnp
from jax import lax
from jax.experimental import pallas as pl
from jax.experimental.pallas import tpu as pltpu


def _round_up(x, m):
    return (x + m - 1) // m * m


# ----------------------------------------------------------------------------
# Fused kernel: fc + hoisted layer-0 input projection + 2-layer LSTM time loop
# + policy/baseline head, one batch tile per grid step.
# ----------------------------------------------------------------------------
def _net_fused_kernel(num_actions, unroll,
                      fcin_ref, nd_ref, h0i_ref, c0i_ref,
                      wfc_ref, bfc_ref,
                      wih0_ref, whh0_ref, b0_ref,
                      wih1_ref, whh1_ref, b1_ref,
                      wh_ref, bh_ref,
                      out_ref, hN_ref, cN_ref,
                      xp0_s, y_s):
    H = wih0_ref.shape[0]
    TB = h0i_ref.shape[1]                    # batch-tile rows (multiple of 8)
    NT = fcin_ref.shape[0]                   # T * TB (time-major within tile)
    T = NT // TB
    A = num_actions

    # ---- fc: ReLU(x @ Wfc^T + b) over all T*TB rows (bf16 MXU, f32 acc) ----
    x = jnp.maximum(
        jnp.dot(fcin_ref[...], wfc_ref[...],
                preferred_element_type=jnp.float32) + bfc_ref[...],
        0.0)

    # ---- layer-0 input projection hoisted out of the recurrent loop --------
    # xp0 = x @ W_ih0^T + (b_ih0 + b_hh0)  for all T*TB rows at once.
    xp0_s[...] = jnp.dot(x.astype(jnp.bfloat16), wih0_ref[...],
                         preferred_element_type=jnp.float32) + b0_ref[...]

    # ---- hoisted (loop-invariant) bias broadcast for layer 1 ---------------
    b1b = jnp.broadcast_to(b1_ref[...], (TB, 4 * H))

    def cell_tail(gates, c_prev):
        # gate layout [i | f | o | g]: one contiguous sigmoid slab + one tanh
        ifo = jax.nn.sigmoid(gates[:, :3 * H])
        g = jnp.tanh(gates[:, 3 * H:])
        i_g = ifo[:, 0 * H:1 * H]
        f_g = ifo[:, 1 * H:2 * H]
        o_g = ifo[:, 2 * H:3 * H]
        c_new = f_g * c_prev + i_g * g
        h_new = o_g * jnp.tanh(c_new)
        return h_new, c_new

    def step(t, carry):
        h0, c0, h1, c1 = carry
        row = pl.multiple_of(t * TB, TB)             # sublane-tile aligned
        # one not-done broadcast per step, reused for all four multiplies
        nd = jnp.broadcast_to(nd_ref[pl.ds(row, TB), :], (TB, H))
        h0m = nd * h0
        c0m = nd * c0
        h1m = nd * h1
        c1m = nd * c1

        # layer 0: input projection precomputed, only h-recurrence per step
        g0 = xp0_s[pl.ds(row, TB), :] + jnp.dot(
            h0m.astype(jnp.bfloat16), whh0_ref[...],
            preferred_element_type=jnp.float32)
        h0n, c0n = cell_tail(g0, c0m)

        # layer 1: two dots + add (no lane-axis concatenate)
        g1 = (jnp.dot(h0n.astype(jnp.bfloat16), wih1_ref[...],
                      preferred_element_type=jnp.float32)
              + jnp.dot(h1m.astype(jnp.bfloat16), whh1_ref[...],
                        preferred_element_type=jnp.float32)
              + b1b)
        h1n, c1n = cell_tail(g1, c1m)

        y_s[pl.ds(row, TB), :] = h1n                 # dense (TB, H) store
        return h0n, c0n, h1n, c1n

    init = (h0i_ref[0], c0i_ref[0], h0i_ref[1], c0i_ref[1])
    h0, c0, h1, c1 = lax.fori_loop(0, T, step, init, unroll=unroll)

    hN_ref[0] = h0
    hN_ref[1] = h1
    cN_ref[0] = c0
    cN_ref[1] = c1

    # ---- fused policy/baseline head: one matmul, lane-dense packed output --
    head = jnp.dot(y_s[...].astype(jnp.bfloat16), wh_ref[...],
                   preferred_element_type=jnp.float32) + bh_ref[...]   # (NT,P)
    P = head.shape[-1]
    col = lax.broadcasted_iota(jnp.int32, head.shape, 1)

    # argmax over the first A columns; argmax(softmax(logits)) == argmax(logits)
    masked = jnp.where(col < A, head, -jnp.inf)
    m = jnp.max(masked, axis=-1, keepdims=True)
    act = jnp.min(jnp.where(masked >= m, col, P), axis=-1, keepdims=True)

    # packed slab: cols [0:A) logits | A baseline | A+1 action (small int as f32)
    out_ref[...] = jnp.where(col == A + 1, act.astype(jnp.float32), head)


def _btile_spec(*shape):
    # block over the leading batch-tile axis, squeezed out of the kernel ref
    return pl.BlockSpec((None,) + shape, lambda j: (j,) + (0,) * len(shape))


def _full_spec(*shape):
    # whole-array block, constant index (weights; fetched once)
    return pl.BlockSpec(shape, lambda j: (0,) * len(shape))


def _net_fused_call(fc_g, nd_g, h_g, c_g, params, num_actions, *, T, TB, G,
                    unroll):
    NT = T * TB
    K_pad, H = params["fc_wT"].shape
    P = params["head_w"].shape[1]

    in_specs = [
        _btile_spec(NT, K_pad),                   # fc input (time-major in tile)
        _btile_spec(NT, 1),                       # not-done mask
        _btile_spec(2, TB, H),                    # h_init
        _btile_spec(2, TB, H),                    # c_init
        _full_spec(K_pad, H), _full_spec(1, H),               # fc
        _full_spec(H, 4 * H), _full_spec(H, 4 * H), _full_spec(1, 4 * H),  # L0
        _full_spec(H, 4 * H), _full_spec(H, 4 * H), _full_spec(1, 4 * H),  # L1
        _full_spec(H, P), _full_spec(1, P),                    # head
    ]
    out_specs = (
        _btile_spec(NT, P),
        _btile_spec(2, TB, H),
        _btile_spec(2, TB, H),
    )
    out_shape = (
        jax.ShapeDtypeStruct((G, NT, P), jnp.float32),      # packed slab
        jax.ShapeDtypeStruct((G, 2, TB, H), jnp.float32),   # final h
        jax.ShapeDtypeStruct((G, 2, TB, H), jnp.float32),   # final c
    )

    # Explicit VMEM budget: double-buffered per-tile blocks + weights + scratch.
    est = 2 * (
        NT * K_pad * 2 + NT * 4 + 4 * (2 * TB * H * 4)      # in/out tiles
        + NT * P * 4
        + K_pad * H * 2 + H * 4                             # fc weights
        + 4 * (H * 4 * H * 2) + 2 * (4 * H * 4)             # LSTM weights
        + H * P * 2 + P * 4                                 # head weights
    ) + NT * 4 * H * 4 + NT * H * 4                         # scratch
    vmem_budget = int(min(max(4 * est, 32 * 2**20), 48 * 2**20))

    kernel = functools.partial(_net_fused_kernel, num_actions,
                               max(1, min(unroll, T)))
    return pl.pallas_call(
        kernel,
        grid=(G,),
        in_specs=in_specs,
        out_specs=out_specs,
        out_shape=out_shape,
        scratch_shapes=[
            pltpu.VMEM((NT, 4 * H), jnp.float32),   # layer-0 input projection
            pltpu.VMEM((NT, H), jnp.float32),       # layer-1 outputs (head in)
        ],
        compiler_params=pltpu.CompilerParams(
            dimension_semantics=("parallel",),
            vmem_limit_bytes=vmem_budget),
    )(fc_g, nd_g, h_g, c_g,
      params["fc_wT"], params["fc_b"],
      params["lstm_wih0"], params["lstm_whh0"], params["lstm_b0"],
      params["lstm_wih1"], params["lstm_whh1"], params["lstm_b1"],
      params["head_w"], params["head_b"])


# ----------------------------------------------------------------------------
# Full forward pass (embedding gathers in plain JAX, one fused Pallas kernel).
# ----------------------------------------------------------------------------
def net_forward(params, num_actions, frame, done, goal, goal_pos1, goal_pos2,
                core_state=None, *, batch_tile=8, unroll=4):
    T, B, V, _, _ = frame.shape
    N = T * B
    x = frame.reshape(N, V, V, 3)

    # compositional state embedding: [obj_emb | colour_emb | attr_emb] per cell
    obj = jnp.take(params["embed_object"], x[..., 0], axis=0)
    col = jnp.take(params["embed_colour"], x[..., 1], axis=0)
    att = jnp.take(params["embed_attribute"], x[..., 2], axis=0)
    state_emb = jnp.concatenate([obj, col, att], axis=-1).reshape(N, -1)

    # goal embedding
    g = goal.reshape(N)
    p1 = goal_pos1.reshape(N)
    p2 = goal_pos2.reshape(N)
    goal_emb = jnp.concatenate(
        [jnp.take(params["embed_goal"], g, axis=0),
         jnp.take(params["embed_goal_pos1"], p1, axis=0),
         jnp.take(params["embed_goal_pos2"], p2, axis=0)], axis=-1)

    fc_input = jnp.concatenate([state_emb, goal_emb], axis=-1)       # (N, K) f32

    K_pad, H = params["fc_wT"].shape
    P = params["head_w"].shape[1]
    K = fc_input.shape[1]
    assert K <= K_pad

    TB = batch_tile
    assert TB % 8 == 0
    B_pad = _round_up(B, TB)
    G = B_pad // TB
    NT = T * TB

    # ---- layout plumbing: pad B to a sublane tile, K to a lane tile, and ----
    # ---- rearrange to (batch_tile, time-major-within-tile) slabs ------------
    fc3 = fc_input.reshape(T, B, K)
    fc3 = jnp.pad(fc3, ((0, 0), (0, B_pad - B), (0, K_pad - K)))
    fc_g = (fc3.reshape(T, G, TB, K_pad).transpose(1, 0, 2, 3)
            .reshape(G, NT, K_pad).astype(jnp.bfloat16))

    nd = (~done).astype(jnp.float32)                                  # (T, B)
    nd = jnp.pad(nd, ((0, 0), (0, B_pad - B)), constant_values=1.0)
    nd_g = nd.reshape(T, G, TB).transpose(1, 0, 2).reshape(G, NT, 1)

    if core_state is None:
        h_init = jnp.zeros((2, B, H), jnp.float32)
        c_init = jnp.zeros((2, B, H), jnp.float32)
    else:
        h_init, c_init = core_state

    def _state_g(s):
        s = jnp.pad(s, ((0, 0), (0, B_pad - B), (0, 0)))
        return s.reshape(2, G, TB, H).transpose(1, 0, 2, 3)

    slab_g, hN_g, cN_g = _net_fused_call(
        fc_g, nd_g, _state_g(h_init), _state_g(c_init), params, num_actions,
        T=T, TB=TB, G=G, unroll=unroll)

    slab = (slab_g.reshape(G, T, TB, P).transpose(1, 0, 2, 3)
            .reshape(T, B_pad, P)[:, :B])

    def _state_back(sg):
        return sg.transpose(1, 0, 2, 3).reshape(2, B_pad, H)[:, :B]

    h_n = _state_back(hN_g)
    c_n = _state_back(cN_g)

    A = num_actions
    out = dict(
        policy_logits=slab[..., :A],
        baseline=slab[..., A],
        action=slab[..., A + 1].astype(jnp.int32),
    )
    return out, (h_n, c_n)


# ----------------------------------------------------------------------------
# Deterministic parameter construction (packed / pre-transposed / padded).
# ----------------------------------------------------------------------------
def make_params(key, state_dim, output_dim, hidden_dim, vocab_size,
                embedding_dim, colour_size, att_size, vision):
    # H multiple of 128 keeps every gate slice and matmul lane-tile aligned.
    assert hidden_dim % 128 == 0
    H = hidden_dim
    obj_dim = embedding_dim
    att_dim = 4                       # att_emb_dim
    goal_dim = embedding_dim * 2
    goal_loc_dim = embedding_dim
    fc_in = state_dim * (obj_dim + att_dim * 2) + goal_dim + goal_loc_dim * 2
    k_pad = _round_up(fc_in, 128)               # lane-padded fc input width
    head_pad = _round_up(output_dim + 2, 128)   # lane-dense packed head width

    ks = jax.random.split(key, 20)
    r = lambda k, shape: jax.random.normal(k, shape, jnp.float32) * 0.1

    # fc weight stored transposed and zero-padded along K
    fc_wT = jnp.zeros((k_pad, H), jnp.float32).at[:fc_in].set(r(ks[6], (fc_in, H)))

    # fused policy/baseline head: cols [0:A) policy, col A baseline, rest zero
    head_w = jnp.zeros((H, head_pad), jnp.float32)
    head_w = head_w.at[:, :output_dim].set(r(ks[14], (H, output_dim)))
    head_w = head_w.at[:, output_dim].set(r(ks[16], (H,)))
    head_b = jnp.zeros((1, head_pad), jnp.float32)
    head_b = head_b.at[:, :output_dim].set(r(ks[15], (1, output_dim)))
    head_b = head_b.at[:, output_dim].set(r(ks[17], (1,)))

    params = dict(
        embed_object=r(ks[0], (vocab_size, obj_dim)),
        embed_colour=r(ks[1], (colour_size, att_dim)),
        embed_attribute=r(ks[2], (att_size, att_dim)),
        embed_goal=r(ks[3], (vocab_size, goal_dim)),
        embed_goal_pos1=r(ks[4], (vision, goal_loc_dim)),
        embed_goal_pos2=r(ks[5], (vision, goal_loc_dim)),
        # matmul operands stored bf16 (f32 accumulation in-kernel), biases f32
        fc_wT=fc_wT.astype(jnp.bfloat16),
        fc_b=r(ks[7], (1, H)),
        # LSTM layer l: W_ih^T / W_hh^T (H, 4H), gate order [i|f|o|g],
        # combined bias b_ih + b_hh.
        lstm_wih0=r(ks[8], (H, 4 * H)).astype(jnp.bfloat16),
        lstm_whh0=r(ks[9], (H, 4 * H)).astype(jnp.bfloat16),
        lstm_b0=r(ks[10], (1, 4 * H)),
        lstm_wih1=r(ks[11], (H, 4 * H)).astype(jnp.bfloat16),
        lstm_whh1=r(ks[12], (H, 4 * H)).astype(jnp.bfloat16),
        lstm_b1=r(ks[13], (1, 4 * H)),
        head_w=head_w.astype(jnp.bfloat16),
        head_b=head_b,
    )
    return params, att_dim


if __name__ == "__main__":
    # small, forward-consistent shapes
    T, B = 4, 4
    vision = 5
    vocab_size, colour_size, att_size = 16, 6, 4
    embedding_dim = 8
    hidden_dim = 128                  # multiple of 128 for lane-dense LSTM math
    output_dim = 8
    state_dim = vision * vision       # h * w (frame has one [obj,col,att] triple/cell)

    key = jax.random.PRNGKey(0)
    kp, kf, kc, ka, kg, k1, k2 = jax.random.split(key, 7)

    params, _ = make_params(kp, state_dim, output_dim, hidden_dim, vocab_size,
                            embedding_dim, colour_size, att_size, vision)

    # frame: (T, B, V, V, 3) int32 — [object_idx, colour_idx, attribute_idx]
    obj_idx = jax.random.randint(kf, (T, B, vision, vision, 1), 0, vocab_size)
    col_idx = jax.random.randint(kc, (T, B, vision, vision, 1), 0, colour_size)
    att_idx = jax.random.randint(ka, (T, B, vision, vision, 1), 0, att_size)
    frame = jnp.concatenate([obj_idx, col_idx, att_idx], axis=-1).astype(jnp.int32)

    goal = jax.random.randint(kg, (T, B), 0, vocab_size).astype(jnp.int32)
    goal_pos1 = jax.random.randint(k1, (T, B), 0, vision).astype(jnp.int32)
    goal_pos2 = jax.random.randint(k2, (T, B), 0, vision).astype(jnp.int32)

    done = jnp.zeros((T, B), dtype=bool).at[1, 1].set(True)

    fwd = jax.jit(functools.partial(net_forward, params, output_dim))
    out, core_state = fwd(frame, done, goal, goal_pos1, goal_pos2)
    jax.block_until_ready((out, core_state))

    assert out["policy_logits"].shape == (T, B, output_dim)
    assert out["baseline"].shape == (T, B)
    assert out["action"].shape == (T, B)
    assert out["action"].dtype == jnp.int32
    assert core_state[0].shape == (2, B, hidden_dim)
    assert core_state[1].shape == (2, B, hidden_dim)
    assert bool(jnp.all(jnp.isfinite(out["policy_logits"])))
    assert bool(jnp.all(jnp.isfinite(out["baseline"])))
    assert bool(jnp.all((out["action"] >= 0) & (out["action"] < output_dim)))

    print("KERNEL_OK")
</pallas_src>

<mosaic_0001>
module attributes {stable_mosaic.version = 11 : i64} {
  func.func @_net_fused_kernel(%arg0: i32, %arg1: memref<1x32x512xbf16, #tpu.memory_space<vmem>>, %arg2: memref<1x32x1xf32, #tpu.memory_space<vmem>>, %arg3: memref<1x2x8x128xf32, #tpu.memory_space<vmem>>, %arg4: memref<1x2x8x128xf32, #tpu.memory_space<vmem>>, %arg5: memref<512x128xbf16, #tpu.memory_space<vmem>>, %arg6: memref<1x128xf32, #tpu.memory_space<vmem>>, %arg7: memref<128x512xbf16, #tpu.memory_space<vmem>>, %arg8: memref<128x512xbf16, #tpu.memory_space<vmem>>, %arg9: memref<1x512xf32, #tpu.memory_space<vmem>>, %arg10: memref<128x512xbf16, #tpu.memory_space<vmem>>, %arg11: memref<128x512xbf16, #tpu.memory_space<vmem>>, %arg12: memref<1x512xf32, #tpu.memory_space<vmem>>, %arg13: memref<128x128xbf16, #tpu.memory_space<vmem>>, %arg14: memref<1x128xf32, #tpu.memory_space<vmem>>, %arg15: memref<1x32x128xf32, #tpu.memory_space<vmem>>, %arg16: memref<1x2x8x128xf32, #tpu.memory_space<vmem>>, %arg17: memref<1x2x8x128xf32, #tpu.memory_space<vmem>>, %arg18: memref<32x512xf32, #tpu.memory_space<vmem>>, %arg19: memref<32x128xf32, #tpu.memory_space<vmem>>) attributes {dimension_semantics = [#tpu.dimension_semantics<parallel>], iteration_bounds = array<i64: 1>, scalar_prefetch = 0 : i64, scratch_operands = 2 : i64, tpu.core_type = #tpu.core_type<tc>, window_params = [{transform_indices = @transform_0, window_bounds = array<i64: 1, 32, 512>}, {transform_indices = @transform_1, window_bounds = array<i64: 1, 32, 1>}, {transform_indices = @transform_2, window_bounds = array<i64: 1, 2, 8, 128>}, {transform_indices = @transform_3, window_bounds = array<i64: 1, 2, 8, 128>}, {pipeline_mode = #tpu.pipeline_mode<synchronous>, transform_indices = @transform_4, window_bounds = array<i64: 512, 128>}, {pipeline_mode = #tpu.pipeline_mode<synchronous>, transform_indices = @transform_5, window_bounds = array<i64: 1, 128>}, {pipeline_mode = #tpu.pipeline_mode<synchronous>, transform_indices = @transform_6, window_bounds = array<i64: 128, 512>}, {pipeline_mode = #tpu.pipeline_mode<synchronous>, transform_indices = @transform_7, window_bounds = array<i64: 128, 512>}, {pipeline_mode = #tpu.pipeline_mode<synchronous>, transform_indices = @transform_8, window_bounds = array<i64: 1, 512>}, {pipeline_mode = #tpu.pipeline_mode<synchronous>, transform_indices = @transform_9, window_bounds = array<i64: 128, 512>}, {pipeline_mode = #tpu.pipeline_mode<synchronous>, transform_indices = @transform_10, window_bounds = array<i64: 128, 512>}, {pipeline_mode = #tpu.pipeline_mode<synchronous>, transform_indices = @transform_11, window_bounds = array<i64: 1, 512>}, {pipeline_mode = #tpu.pipeline_mode<synchronous>, transform_indices = @transform_12, window_bounds = array<i64: 128, 128>}, {pipeline_mode = #tpu.pipeline_mode<synchronous>, transform_indices = @transform_13, window_bounds = array<i64: 1, 128>}, {transform_indices = @transform_14, window_bounds = array<i64: 1, 32, 128>}, {transform_indices = @transform_15, window_bounds = array<i64: 1, 2, 8, 128>}, {transform_indices = @transform_16, window_bounds = array<i64: 1, 2, 8, 128>}]} {
    %c0 = arith.constant 0 : index
    %c0_0 = arith.constant 0 : index
    %c0_1 = arith.constant 0 : index
    %0 = vector.load %arg1[%c0, %c0_0, %c0_1] : memref<1x32x512xbf16, #tpu.memory_space<vmem>>, vector<1x32x512xbf16>
    %1 = vector.shape_cast %0 : vector<1x32x512xbf16> to vector<32x512xbf16>
    %c0_2 = arith.constant 0 : index
    %c0_3 = arith.constant 0 : index
    %2 = vector.load %arg5[%c0_2, %c0_3] : memref<512x128xbf16, #tpu.memory_space<vmem>>, vector<512x128xbf16>
    %cst = arith.constant dense<0.000000e+00> : vector<32x128xf32>
    %3 = tpu.matmul %1, %2, %cst {dimension_numbers = #tpu.dot_dimension_numbers<[1], [0], [0], [1], [0, 0, 1, 1], [], []>} : vector<32x512xbf16>, vector<512x128xbf16>, vector<32x128xf32> -> vector<32x128xf32>
    %c0_4 = arith.constant 0 : index
    %c0_5 = arith.constant 0 : index
    %4 = vector.load %arg6[%c0_4, %c0_5] : memref<1x128xf32, #tpu.memory_space<vmem>>, vector<1x128xf32>
    %5 = vector.broadcast %4 : vector<1x128xf32> to vector<32x128xf32>
    %6 = arith.addf %3, %5 : vector<32x128xf32>
    %cst_6 = arith.constant 0.000000e+00 : f32
    %7 = vector.broadcast %cst_6 : f32 to vector<32x128xf32>
    %8 = arith.maximumf %6, %7 : vector<32x128xf32>
    %9 = arith.truncf %8 : vector<32x128xf32> to vector<32x128xbf16>
    %c0_7 = arith.constant 0 : index
    %c0_8 = arith.constant 0 : index
    %10 = vector.load %arg7[%c0_7, %c0_8] : memref<128x512xbf16, #tpu.memory_space<vmem>>, vector<128x512xbf16>
    %cst_9 = arith.constant dense<0.000000e+00> : vector<32x512xf32>
    %11 = tpu.matmul %9, %10, %cst_9 {dimension_numbers = #tpu.dot_dimension_numbers<[1], [0], [0], [1], [0, 0, 1, 1], [], []>} : vector<32x128xbf16>, vector<128x512xbf16>, vector<32x512xf32> -> vector<32x512xf32>
    %c0_10 = arith.constant 0 : index
    %c0_11 = arith.constant 0 : index
    %12 = vector.load %arg9[%c0_10, %c0_11] : memref<1x512xf32, #tpu.memory_space<vmem>>, vector<1x512xf32>
    %13 = vector.broadcast %12 : vector<1x512xf32> to vector<32x512xf32>
    %14 = arith.addf %11, %13 : vector<32x512xf32>
    %c0_12 = arith.constant 0 : index
    %c0_13 = arith.constant 0 : index
    %15 = vector.load %arg18[%c0_12, %c0_13] : memref<32x512xf32, #tpu.memory_space<vmem>>, vector<32x512xf32>
    tpu.vector_store %arg18[%c0_12, %c0_13], %14 {strides = array<i32>} : memref<32x512xf32, #tpu.memory_space<vmem>>, vector<32x512xf32>,
    %c0_14 = arith.constant 0 : index
    %c0_15 = arith.constant 0 : index
    %16 = vector.load %arg12[%c0_14, %c0_15] : memref<1x512xf32, #tpu.memory_space<vmem>>, vector<1x512xf32>
    %17 = vector.shape_cast %16 : vector<1x512xf32> to vector<1x512xf32>
    %18 = vector.broadcast %17 : vector<1x512xf32> to vector<8x512xf32>
    %c0_16 = arith.constant 0 : index
    %c0_17 = arith.constant 0 : index
    %c0_18 = arith.constant 0 : index
    %c0_19 = arith.constant 0 : index
    %19 = vector.load %arg3[%c0_16, %c0_17, %c0_18, %c0_19] : memref<1x2x8x128xf32, #tpu.memory_space<vmem>>, vector<1x1x8x128xf32>
    %20 = vector.shape_cast %19 : vector<1x1x8x128xf32> to vector<8x128xf32>
    %c0_20 = arith.constant 0 : index
    %c0_21 = arith.constant 0 : index
    %c0_22 = arith.constant 0 : index
    %c0_23 = arith.constant 0 : index
    %21 = vector.load %arg4[%c0_20, %c0_21, %c0_22, %c0_23] : memref<1x2x8x128xf32, #tpu.memory_space<vmem>>, vector<1x1x8x128xf32>
    %22 = vector.shape_cast %21 : vector<1x1x8x128xf32> to vector<8x128xf32>
    %c0_24 = arith.constant 0 : index
    %c1 = arith.constant 1 : index
    %c0_25 = arith.constant 0 : index
    %c0_26 = arith.constant 0 : index
    %23 = vector.load %arg3[%c0_24, %c1, %c0_25, %c0_26] : memref<1x2x8x128xf32, #tpu.memory_space<vmem>>, vector<1x1x8x128xf32>
    %24 = vector.shape_cast %23 : vector<1x1x8x128xf32> to vector<8x128xf32>
    %c0_27 = arith.constant 0 : index
    %c1_28 = arith.constant 1 : index
    %c0_29 = arith.constant 0 : index
    %c0_30 = arith.constant 0 : index
    %25 = vector.load %arg4[%c0_27, %c1_28, %c0_29, %c0_30] : memref<1x2x8x128xf32, #tpu.memory_space<vmem>>, vector<1x1x8x128xf32>
    %26 = vector.shape_cast %25 : vector<1x1x8x128xf32> to vector<8x128xf32>
    %c0_i32 = arith.constant 0 : i32
    %c8_i32 = arith.constant 8 : i32
    %27 = arith.muli %c0_i32, %c8_i32 : i32
    %28 = tpu.assume_multiple %27, 8 : i32
    %c0_31 = arith.constant 0 : index
    %29 = arith.index_cast %28 : i32 to index
    %c0_32 = arith.constant 0 : index
    %30 = vector.load %arg2[%c0_31, %29, %c0_32] : memref<1x32x1xf32, #tpu.memory_space<vmem>>, vector<1x8x1xf32>
    %31 = vector.shape_cast %30 : vector<1x8x1xf32> to vector<8x1xf32>
    %32 = vector.shape_cast %31 : vector<8x1xf32> to vector<8x1xf32>
    %33 = vector.broadcast %32 : vector<8x1xf32> to vector<8x128xf32>
    %34 = arith.mulf %33, %20 : vector<8x128xf32>
    %35 = arith.mulf %33, %22 : vector<8x128xf32>
    %36 = arith.mulf %33, %24 : vector<8x128xf32>
    %37 = arith.mulf %33, %26 : vector<8x128xf32>
    %38 = arith.index_cast %28 : i32 to index
    %c0_33 = arith.constant 0 : index
    %39 = vector.load %arg18[%38, %c0_33] : memref<32x512xf32, #tpu.memory_space<vmem>>, vector<8x512xf32>
    %40 = arith.truncf %34 : vector<8x128xf32> to vector<8x128xbf16>
    %c0_34 = arith.constant 0 : index
    %c0_35 = arith.constant 0 : index
    %41 = vector.load %arg8[%c0_34, %c0_35] : memref<128x512xbf16, #tpu.memory_space<vmem>>, vector<128x512xbf16>
    %cst_36 = arith.constant dense<0.000000e+00> : vector<8x512xf32>
    %42 = tpu.matmul %40, %41, %cst_36 {dimension_numbers = #tpu.dot_dimension_numbers<[1], [0], [0], [1], [0, 0, 1, 1], [], []>} : vector<8x128xbf16>, vector<128x512xbf16>, vector<8x512xf32> -> vector<8x512xf32>
    %43 = arith.addf %39, %42 : vector<8x512xf32>
    %44 = vector.extract_strided_slice %43 {offsets = [0, 0], sizes = [8, 384], strides = [1, 1]} : vector<8x512xf32> to vector<8x384xf32>
    %45 = arith.negf %44 : vector<8x384xf32>
    %46 = math.exp %45 : vector<8x384xf32>
    %cst_37 = arith.constant 1.000000e+00 : f32
    %47 = vector.broadcast %cst_37 : f32 to vector<8x384xf32>
    %48 = arith.addf %47, %46 : vector<8x384xf32>
    %49 = arith.divf %47, %48 : vector<8x384xf32>
    %50 = vector.extract_strided_slice %43 {offsets = [0, 384], sizes = [8, 128], strides = [1, 1]} : vector<8x512xf32> to vector<8x128xf32>
    %51 = math.tanh %50 : vector<8x128xf32>
    %52 = vector.extract_strided_slice %49 {offsets = [0, 0], sizes = [8, 128], strides = [1, 1]} : vector<8x384xf32> to vector<8x128xf32>
    %53 = vector.extract_strided_slice %49 {offsets = [0, 128], sizes = [8, 128], strides = [1, 1]} : vector<8x384xf32> to vector<8x128xf32>
    %54 = vector.extract_strided_slice %49 {offsets = [0, 256], sizes = [8, 128], strides = [1, 1]} : vector<8x384xf32> to vector<8x128xf32>
    %55 = arith.mulf %53, %35 : vector<8x128xf32>
    %56 = arith.mulf %52, %51 : vector<8x128xf32>
    %57 = arith.addf %55, %56 : vector<8x128xf32>
    %58 = math.tanh %57 : vector<8x128xf32>
    %59 = arith.mulf %54, %58 : vector<8x128xf32>
    %60 = arith.truncf %59 : vector<8x128xf32> to vector<8x128xbf16>
    %c0_38 = arith.constant 0 : index
    %c0_39 = arith.constant 0 : index
    %61 = vector.load %arg10[%c0_38, %c0_39] : memref<128x512xbf16, #tpu.memory_space<vmem>>, vector<128x512xbf16>
    %cst_40 = arith.constant dense<0.000000e+00> : vector<8x512xf32>
    %62 = tpu.matmul %60, %61, %cst_40 {dimension_numbers = #tpu.dot_dimension_numbers<[1], [0], [0], [1], [0, 0, 1, 1], [], []>} : vector<8x128xbf16>, vector<128x512xbf16>, vector<8x512xf32> -> vector<8x512xf32>
    %63 = arith.truncf %36 : vector<8x128xf32> to vector<8x128xbf16>
    %c0_41 = arith.constant 0 : index
    %c0_42 = arith.constant 0 : index
    %64 = vector.load %arg11[%c0_41, %c0_42] : memref<128x512xbf16, #tpu.memory_space<vmem>>, vector<128x512xbf16>
    %cst_43 = arith.constant dense<0.000000e+00> : vector<8x512xf32>
    %65 = tpu.matmul %63, %64, %cst_43 {dimension_numbers = #tpu.dot_dimension_numbers<[1], [0], [0], [1], [0, 0, 1, 1], [], []>} : vector<8x128xbf16>, vector<128x512xbf16>, vector<8x512xf32> -> vector<8x512xf32>
    %66 = arith.addf %62, %65 : vector<8x512xf32>
    %67 = arith.addf %66, %18 : vector<8x512xf32>
    %68 = vector.extract_strided_slice %67 {offsets = [0, 0], sizes = [8, 384], strides = [1, 1]} : vector<8x512xf32> to vector<8x384xf32>
    %69 = arith.negf %68 : vector<8x384xf32>
    %70 = math.exp %69 : vector<8x384xf32>
    %cst_44 = arith.constant 1.000000e+00 : f32
    %71 = vector.broadcast %cst_44 : f32 to vector<8x384xf32>
    %72 = arith.addf %71, %70 : vector<8x384xf32>
    %73 = arith.divf %71, %72 : vector<8x384xf32>
    %74 = vector.extract_strided_slice %67 {offsets = [0, 384], sizes = [8, 128], strides = [1, 1]} : vector<8x512xf32> to vector<8x128xf32>
    %75 = math.tanh %74 : vector<8x128xf32>
    %76 = vector.extract_strided_slice %73 {offsets = [0, 0], sizes = [8, 128], strides = [1, 1]} : vector<8x384xf32> to vector<8x128xf32>
    %77 = vector.extract_strided_slice %73 {offsets = [0, 128], sizes = [8, 128], strides = [1, 1]} : vector<8x384xf32> to vector<8x128xf32>
    %78 = vector.extract_strided_slice %73 {offsets = [0, 256], sizes = [8, 128], strides = [1, 1]} : vector<8x384xf32> to vector<8x128xf32>
    %79 = arith.mulf %77, %37 : vector<8x128xf32>
    %80 = arith.mulf %76, %75 : vector<8x128xf32>
    %81 = arith.addf %79, %80 : vector<8x128xf32>
    %82 = math.tanh %81 : vector<8x128xf32>
    %83 = arith.mulf %78, %82 : vector<8x128xf32>
    %84 = arith.index_cast %28 : i32 to index
    %c0_45 = arith.constant 0 : index
    %85 = vector.load %arg19[%84, %c0_45] : memref<32x128xf32, #tpu.memory_space<vmem>>, vector<8x128xf32>
    tpu.vector_store %arg19[%84, %c0_45], %83 {strides = array<i32>} : memref<32x128xf32, #tpu.memory_space<vmem>>, vector<8x128xf32>,
    %c1_i32 = arith.constant 1 : i32
    %c8_i32_46 = arith.constant 8 : i32
    %86 = arith.muli %c1_i32, %c8_i32_46 : i32
    %87 = tpu.assume_multiple %86, 8 : i32
    %c0_47 = arith.constant 0 : index
    %88 = arith.index_cast %87 : i32 to index
    %c0_48 = arith.constant 0 : index
    %89 = vector.load %arg2[%c0_47, %88, %c0_48] : memref<1x32x1xf32, #tpu.memory_space<vmem>>, vector<1x8x1xf32>
    %90 = vector.shape_cast %89 : vector<1x8x1xf32> to vector<8x1xf32>
    %91 = vector.shape_cast %90 : vector<8x1xf32> to vector<8x1xf32>
    %92 = vector.broadcast %91 : vector<8x1xf32> to vector<8x128xf32>
    %93 = arith.mulf %92, %59 : vector<8x128xf32>
    %94 = arith.mulf %92, %57 : vector<8x128xf32>
    %95 = arith.mulf %92, %83 : vector<8x128xf32>
    %96 = arith.mulf %92, %81 : vector<8x128xf32>
    %97 = arith.index_cast %87 : i32 to index
    %c0_49 = arith.constant 0 : index
    %98 = vector.load %arg18[%97, %c0_49] : memref<32x512xf32, #tpu.memory_space<vmem>>, vector<8x512xf32>
    %99 = arith.truncf %93 : vector<8x128xf32> to vector<8x128xbf16>
    %c0_50 = arith.constant 0 : index
    %c0_51 = arith.constant 0 : index
    %100 = vector.load %arg8[%c0_50, %c0_51] : memref<128x512xbf16, #tpu.memory_space<vmem>>, vector<128x512xbf16>
    %cst_52 = arith.constant dense<0.000000e+00> : vector<8x512xf32>
    %101 = tpu.matmul %99, %100, %cst_52 {dimension_numbers = #tpu.dot_dimension_numbers<[1], [0], [0], [1], [0, 0, 1, 1], [], []>} : vector<8x128xbf16>, vector<128x512xbf16>, vector<8x512xf32> -> vector<8x512xf32>
    %102 = arith.addf %98, %101 : vector<8x512xf32>
    %103 = vector.extract_strided_slice %102 {offsets = [0, 0], sizes = [8, 384], strides = [1, 1]} : vector<8x512xf32> to vector<8x384xf32>
    %104 = arith.negf %103 : vector<8x384xf32>
    %105 = math.exp %104 : vector<8x384xf32>
    %cst_53 = arith.constant 1.000000e+00 : f32
    %106 = vector.broadcast %cst_53 : f32 to vector<8x384xf32>
    %107 = arith.addf %106, %105 : vector<8x384xf32>
    %108 = arith.divf %106, %107 : vector<8x384xf32>
    %109 = vector.extract_strided_slice %102 {offsets = [0, 384], sizes = [8, 128], strides = [1, 1]} : vector<8x512xf32> to vector<8x128xf32>
    %110 = math.tanh %109 : vector<8x128xf32>
    %111 = vector.extract_strided_slice %108 {offsets = [0, 0], sizes = [8, 128], strides = [1, 1]} : vector<8x384xf32> to vector<8x128xf32>
    %112 = vector.extract_strided_slice %108 {offsets = [0, 128], sizes = [8, 128], strides = [1, 1]} : vector<8x384xf32> to vector<8x128xf32>
    %113 = vector.extract_strided_slice %108 {offsets = [0, 256], sizes = [8, 128], strides = [1, 1]} : vector<8x384xf32> to vector<8x128xf32>
    %114 = arith.mulf %112, %94 : vector<8x128xf32>
    %115 = arith.mulf %111, %110 : vector<8x128xf32>
    %116 = arith.addf %114, %115 : vector<8x128xf32>
    %117 = math.tanh %116 : vector<8x128xf32>
    %118 = arith.mulf %113, %117 : vector<8x128xf32>
    %119 = arith.truncf %118 : vector<8x128xf32> to vector<8x128xbf16>
    %c0_54 = arith.constant 0 : index
    %c0_55 = arith.constant 0 : index
    %120 = vector.load %arg10[%c0_54, %c0_55] : memref<128x512xbf16, #tpu.memory_space<vmem>>, vector<128x512xbf16>
    %cst_56 = arith.constant dense<0.000000e+00> : vector<8x512xf32>
    %121 = tpu.matmul %119, %120, %cst_56 {dimension_numbers = #tpu.dot_dimension_numbers<[1], [0], [0], [1], [0, 0, 1, 1], [], []>} : vector<8x128xbf16>, vector<128x512xbf16>, vector<8x512xf32> -> vector<8x512xf32>
    %122 = arith.truncf %95 : vector<8x128xf32> to vector<8x128xbf16>
    %c0_57 = arith.constant 0 : index
    %c0_58 = arith.constant 0 : index
    %123 = vector.load %arg11[%c0_57, %c0_58] : memref<128x512xbf16, #tpu.memory_space<vmem>>, vector<128x512xbf16>
    %cst_59 = arith.constant dense<0.000000e+00> : vector<8x512xf32>
    %124 = tpu.matmul %122, %123, %cst_59 {dimension_numbers = #tpu.dot_dimension_numbers<[1], [0], [0], [1], [0, 0, 1, 1], [], []>} : vector<8x128xbf16>, vector<128x512xbf16>, vector<8x512xf32> -> vector<8x512xf32>
    %125 = arith.addf %121, %124 : vector<8x512xf32>
    %126 = arith.addf %125, %18 : vector<8x512xf32>
    %127 = vector.extract_strided_slice %126 {offsets = [0, 0], sizes = [8, 384], strides = [1, 1]} : vector<8x512xf32> to vector<8x384xf32>
    %128 = arith.negf %127 : vector<8x384xf32>
    %129 = math.exp %128 : vector<8x384xf32>
    %cst_60 = arith.constant 1.000000e+00 : f32
    %130 = vector.broadcast %cst_60 : f32 to vector<8x384xf32>
    %131 = arith.addf %130, %129 : vector<8x384xf32>
    %132 = arith.divf %130, %131 : vector<8x384xf32>
    %133 = vector.extract_strided_slice %126 {offsets = [0, 384], sizes = [8, 128], strides = [1, 1]} : vector<8x512xf32> to vector<8x128xf32>
    %134 = math.tanh %133 : vector<8x128xf32>
    %135 = vector.extract_strided_slice %132 {offsets = [0, 0], sizes = [8, 128], strides = [1, 1]} : vector<8x384xf32> to vector<8x128xf32>
    %136 = vector.extract_strided_slice %132 {offsets = [0, 128], sizes = [8, 128], strides = [1, 1]} : vector<8x384xf32> to vector<8x128xf32>
    %137 = vector.extract_strided_slice %132 {offsets = [0, 256], sizes = [8, 128], strides = [1, 1]} : vector<8x384xf32> to vector<8x128xf32>
    %138 = arith.mulf %136, %96 : vector<8x128xf32>
    %139 = arith.mulf %135, %134 : vector<8x128xf32>
    %140 = arith.addf %138, %139 : vector<8x128xf32>
    %141 = math.tanh %140 : vector<8x128xf32>
    %142 = arith.mulf %137, %141 : vector<8x128xf32>
    %143 = arith.index_cast %87 : i32 to index
    %c0_61 = arith.constant 0 : index
    %144 = vector.load %arg19[%143, %c0_61] : memref<32x128xf32, #tpu.memory_space<vmem>>, vector<8x128xf32>
    tpu.vector_store %arg19[%143, %c0_61], %142 {strides = array<i32>} : memref<32x128xf32, #tpu.memory_space<vmem>>, vector<8x128xf32>,
    %c2_i32 = arith.constant 2 : i32
    %c8_i32_62 = arith.constant 8 : i32
    %145 = arith.muli %c2_i32, %c8_i32_62 : i32
    %146 = tpu.assume_multiple %145, 8 : i32
    %c0_63 = arith.constant 0 : index
    %147 = arith.index_cast %146 : i32 to index
    %c0_64 = arith.constant 0 : index
    %148 = vector.load %arg2[%c0_63, %147, %c0_64] : memref<1x32x1xf32, #tpu.memory_space<vmem>>, vector<1x8x1xf32>
    %149 = vector.shape_cast %148 : vector<1x8x1xf32> to vector<8x1xf32>
    %150 = vector.shape_cast %149 : vector<8x1xf32> to vector<8x1xf32>
    %151 = vector.broadcast %150 : vector<8x1xf32> to vector<8x128xf32>
    %152 = arith.mulf %151, %118 : vector<8x128xf32>
    %153 = arith.mulf %151, %116 : vector<8x128xf32>
    %154 = arith.mulf %151, %142 : vector<8x128xf32>
    %155 = arith.mulf %151, %140 : vector<8x128xf32>
    %156 = arith.index_cast %146 : i32 to index
    %c0_65 = arith.constant 0 : index
    %157 = vector.load %arg18[%156, %c0_65] : memref<32x512xf32, #tpu.memory_space<vmem>>, vector<8x512xf32>
    %158 = arith.truncf %152 : vector<8x128xf32> to vector<8x128xbf16>
    %c0_66 = arith.constant 0 : index
    %c0_67 = arith.constant 0 : index
    %159 = vector.load %arg8[%c0_66, %c0_67] : memref<128x512xbf16, #tpu.memory_space<vmem>>, vector<128x512xbf16>
    %cst_68 = arith.constant dense<0.000000e+00> : vector<8x512xf32>
    %160 = tpu.matmul %158, %159, %cst_68 {dimension_numbers = #tpu.dot_dimension_numbers<[1], [0], [0], [1], [0, 0, 1, 1], [], []>} : vector<8x128xbf16>, vector<128x512xbf16>, vector<8x512xf32> -> vector<8x512xf32>
    %161 = arith.addf %157, %160 : vector<8x512xf32>
    %162 = vector.extract_strided_slice %161 {offsets = [0, 0], sizes = [8, 384], strides = [1, 1]} : vector<8x512xf32> to vector<8x384xf32>
    %163 = arith.negf %162 : vector<8x384xf32>
    %164 = math.exp %163 : vector<8x384xf32>
    %cst_69 = arith.constant 1.000000e+00 : f32
    %165 = vector.broadcast %cst_69 : f32 to vector<8x384xf32>
    %166 = arith.addf %165, %164 : vector<8x384xf32>
    %167 = arith.divf %165, %166 : vector<8x384xf32>
    %168 = vector.extract_strided_slice %161 {offsets = [0, 384], sizes = [8, 128], strides = [1, 1]} : vector<8x512xf32> to vector<8x128xf32>
    %169 = math.tanh %168 : vector<8x128xf32>
    %170 = vector.extract_strided_slice %167 {offsets = [0, 0], sizes = [8, 128], strides = [1, 1]} : vector<8x384xf32> to vector<8x128xf32>
    %171 = vector.extract_strided_slice %167 {offsets = [0, 128], sizes = [8, 128], strides = [1, 1]} : vector<8x384xf32> to vector<8x128xf32>
    %172 = vector.extract_strided_slice %167 {offsets = [0, 256], sizes = [8, 128], strides = [1, 1]} : vector<8x384xf32> to vector<8x128xf32>
    %173 = arith.mulf %171, %153 : vector<8x128xf32>
    %174 = arith.mulf %170, %169 : vector<8x128xf32>
    %175 = arith.addf %173, %174 : vector<8x128xf32>
    %176 = math.tanh %175 : vector<8x128xf32>
    %177 = arith.mulf %172, %176 : vector<8x128xf32>
    %178 = arith.truncf %177 : vector<8x128xf32> to vector<8x128xbf16>
    %c0_70 = arith.constant 0 : index
    %c0_71 = arith.constant 0 : index
    %179 = vector.load %arg10[%c0_70, %c0_71] : memref<128x512xbf16, #tpu.memory_space<vmem>>, vector<128x512xbf16>
    %cst_72 = arith.constant dense<0.000000e+00> : vector<8x512xf32>
    %180 = tpu.matmul %178, %179, %cst_72 {dimension_numbers = #tpu.dot_dimension_numbers<[1], [0], [0], [1], [0, 0, 1, 1], [], []>} : vector<8x128xbf16>, vector<128x512xbf16>, vector<8x512xf32> -> vector<8x512xf32>
    %181 = arith.truncf %154 : vector<8x128xf32> to vector<8x128xbf16>
    %c0_73 = arith.constant 0 : index
    %c0_74 = arith.constant 0 : index
    %182 = vector.load %arg11[%c0_73, %c0_74] : memref<128x512xbf16, #tpu.memory_space<vmem>>, vector<128x512xbf16>
    %cst_75 = arith.constant dense<0.000000e+00> : vector<8x512xf32>
    %183 = tpu.matmul %181, %182, %cst_75 {dimension_numbers = #tpu.dot_dimension_numbers<[1], [0], [0], [1], [0, 0, 1, 1], [], []>} : vector<8x128xbf16>, vector<128x512xbf16>, vector<8x512xf32> -> vector<8x512xf32>
    %184 = arith.addf %180, %183 : vector<8x512xf32>
    %185 = arith.addf %184, %18 : vector<8x512xf32>
    %186 = vector.extract_strided_slice %185 {offsets = [0, 0], sizes = [8, 384], strides = [1, 1]} : vector<8x512xf32> to vector<8x384xf32>
    %187 = arith.negf %186 : vector<8x384xf32>
    %188 = math.exp %187 : vector<8x384xf32>
    %cst_76 = arith.constant 1.000000e+00 : f32
    %189 = vector.broadcast %cst_76 : f32 to vector<8x384xf32>
    %190 = arith.addf %189, %188 : vector<8x384xf32>
    %191 = arith.divf %189, %190 : vector<8x384xf32>
    %192 = vector.extract_strided_slice %185 {offsets = [0, 384], sizes = [8, 128], strides = [1, 1]} : vector<8x512xf32> to vector<8x128xf32>
    %193 = math.tanh %192 : vector<8x128xf32>
    %194 = vector.extract_strided_slice %191 {offsets = [0, 0], sizes = [8, 128], strides = [1, 1]} : vector<8x384xf32> to vector<8x128xf32>
    %195 = vector.extract_strided_slice %191 {offsets = [0, 128], sizes = [8, 128], strides = [1, 1]} : vector<8x384xf32> to vector<8x128xf32>
    %196 = vector.extract_strided_slice %191 {offsets = [0, 256], sizes = [8, 128], strides = [1, 1]} : vector<8x384xf32> to vector<8x128xf32>
    %197 = arith.mulf %195, %155 : vector<8x128xf32>
    %198 = arith.mulf %194, %193 : vector<8x128xf32>
    %199 = arith.addf %197, %198 : vector<8x128xf32>
    %200 = math.tanh %199 : vector<8x128xf32>
    %201 = arith.mulf %196, %200 : vector<8x128xf32>
    %202 = arith.index_cast %146 : i32 to index
    %c0_77 = arith.constant 0 : index
    %203 = vector.load %arg19[%202, %c0_77] : memref<32x128xf32, #tpu.memory_space<vmem>>, vector<8x128xf32>
    tpu.vector_store %arg19[%202, %c0_77], %201 {strides = array<i32>} : memref<32x128xf32, #tpu.memory_space<vmem>>, vector<8x128xf32>,
    %c3_i32 = arith.constant 3 : i32
    %c8_i32_78 = arith.constant 8 : i32
    %204 = arith.muli %c3_i32, %c8_i32_78 : i32
    %205 = tpu.assume_multiple %204, 8 : i32
    %c0_79 = arith.constant 0 : index
    %206 = arith.index_cast %205 : i32 to index
    %c0_80 = arith.constant 0 : index
    %207 = vector.load %arg2[%c0_79, %206, %c0_80] : memref<1x32x1xf32, #tpu.memory_space<vmem>>, vector<1x8x1xf32>
    %208 = vector.shape_cast %207 : vector<1x8x1xf32> to vector<8x1xf32>
    %209 = vector.shape_cast %208 : vector<8x1xf32> to vector<8x1xf32>
    %210 = vector.broadcast %209 : vector<8x1xf32> to vector<8x128xf32>
    %211 = arith.mulf %210, %177 : vector<8x128xf32>
    %212 = arith.mulf %210, %175 : vector<8x128xf32>
    %213 = arith.mulf %210, %201 : vector<8x128xf32>
    %214 = arith.mulf %210, %199 : vector<8x128xf32>
    %215 = arith.index_cast %205 : i32 to index
    %c0_81 = arith.constant 0 : index
    %216 = vector.load %arg18[%215, %c0_81] : memref<32x512xf32, #tpu.memory_space<vmem>>, vector<8x512xf32>
    %217 = arith.truncf %211 : vector<8x128xf32> to vector<8x128xbf16>
    %c0_82 = arith.constant 0 : index
    %c0_83 = arith.constant 0 : index
    %218 = vector.load %arg8[%c0_82, %c0_83] : memref<128x512xbf16, #tpu.memory_space<vmem>>, vector<128x512xbf16>
    %cst_84 = arith.constant dense<0.000000e+00> : vector<8x512xf32>
    %219 = tpu.matmul %217, %218, %cst_84 {dimension_numbers = #tpu.dot_dimension_numbers<[1], [0], [0], [1], [0, 0, 1, 1], [], []>} : vector<8x128xbf16>, vector<128x512xbf16>, vector<8x512xf32> -> vector<8x512xf32>
    %220 = arith.addf %216, %219 : vector<8x512xf32>
    %221 = vector.extract_strided_slice %220 {offsets = [0, 0], sizes = [8, 384], strides = [1, 1]} : vector<8x512xf32> to vector<8x384xf32>
    %222 = arith.negf %221 : vector<8x384xf32>
    %223 = math.exp %222 : vector<8x384xf32>
    %cst_85 = arith.constant 1.000000e+00 : f32
    %224 = vector.broadcast %cst_85 : f32 to vector<8x384xf32>
    %225 = arith.addf %224, %223 : vector<8x384xf32>
    %226 = arith.divf %224, %225 : vector<8x384xf32>
    %227 = vector.extract_strided_slice %220 {offsets = [0, 384], sizes = [8, 128], strides = [1, 1]} : vector<8x512xf32> to vector<8x128xf32>
    %228 = math.tanh %227 : vector<8x128xf32>
    %229 = vector.extract_strided_slice %226 {offsets = [0, 0], sizes = [8, 128], strides = [1, 1]} : vector<8x384xf32> to vector<8x128xf32>
    %230 = vector.extract_strided_slice %226 {offsets = [0, 128], sizes = [8, 128], strides = [1, 1]} : vector<8x384xf32> to vector<8x128xf32>
    %231 = vector.extract_strided_slice %226 {offsets = [0, 256], sizes = [8, 128], strides = [1, 1]} : vector<8x384xf32> to vector<8x128xf32>
    %232 = arith.mulf %230, %212 : vector<8x128xf32>
    %233 = arith.mulf %229, %228 : vector<8x128xf32>
    %234 = arith.addf %232, %233 : vector<8x128xf32>
    %235 = math.tanh %234 : vector<8x128xf32>
    %236 = arith.mulf %231, %235 : vector<8x128xf32>
    %237 = arith.truncf %236 : vector<8x128xf32> to vector<8x128xbf16>
    %c0_86 = arith.constant 0 : index
    %c0_87 = arith.constant 0 : index
    %238 = vector.load %arg10[%c0_86, %c0_87] : memref<128x512xbf16, #tpu.memory_space<vmem>>, vector<128x512xbf16>
    %cst_88 = arith.constant dense<0.000000e+00> : vector<8x512xf32>
    %239 = tpu.matmul %237, %238, %cst_88 {dimension_numbers = #tpu.dot_dimension_numbers<[1], [0], [0], [1], [0, 0, 1, 1], [], []>} : vector<8x128xbf16>, vector<128x512xbf16>, vector<8x512xf32> -> vector<8x512xf32>
    %240 = arith.truncf %213 : vector<8x128xf32> to vector<8x128xbf16>
    %c0_89 = arith.constant 0 : index
    %c0_90 = arith.constant 0 : index
    %241 = vector.load %arg11[%c0_89, %c0_90] : memref<128x512xbf16, #tpu.memory_space<vmem>>, vector<128x512xbf16>
    %cst_91 = arith.constant dense<0.000000e+00> : vector<8x512xf32>
    %242 = tpu.matmul %240, %241, %cst_91 {dimension_numbers = #tpu.dot_dimension_numbers<[1], [0], [0], [1], [0, 0, 1, 1], [], []>} : vector<8x128xbf16>, vector<128x512xbf16>, vector<8x512xf32> -> vector<8x512xf32>
    %243 = arith.addf %239, %242 : vector<8x512xf32>
    %244 = arith.addf %243, %18 : vector<8x512xf32>
    %245 = vector.extract_strided_slice %244 {offsets = [0, 0], sizes = [8, 384], strides = [1, 1]} : vector<8x512xf32> to vector<8x384xf32>
    %246 = arith.negf %245 : vector<8x384xf32>
    %247 = math.exp %246 : vector<8x384xf32>
    %cst_92 = arith.constant 1.000000e+00 : f32
    %248 = vector.broadcast %cst_92 : f32 to vector<8x384xf32>
    %249 = arith.addf %248, %247 : vector<8x384xf32>
    %250 = arith.divf %248, %249 : vector<8x384xf32>
    %251 = vector.extract_strided_slice %244 {offsets = [0, 384], sizes = [8, 128], strides = [1, 1]} : vector<8x512xf32> to vector<8x128xf32>
    %252 = math.tanh %251 : vector<8x128xf32>
    %253 = vector.extract_strided_slice %250 {offsets = [0, 0], sizes = [8, 128], strides = [1, 1]} : vector<8x384xf32> to vector<8x128xf32>
    %254 = vector.extract_strided_slice %250 {offsets = [0, 128], sizes = [8, 128], strides = [1, 1]} : vector<8x384xf32> to vector<8x128xf32>
    %255 = vector.extract_strided_slice %250 {offsets = [0, 256], sizes = [8, 128], strides = [1, 1]} : vector<8x384xf32> to vector<8x128xf32>
    %256 = arith.mulf %254, %214 : vector<8x128xf32>
    %257 = arith.mulf %253, %252 : vector<8x128xf32>
    %258 = arith.addf %256, %257 : vector<8x128xf32>
    %259 = math.tanh %258 : vector<8x128xf32>
    %260 = arith.mulf %255, %259 : vector<8x128xf32>
    %261 = arith.index_cast %205 : i32 to index
    %c0_93 = arith.constant 0 : index
    %262 = vector.load %arg19[%261, %c0_93] : memref<32x128xf32, #tpu.memory_space<vmem>>, vector<8x128xf32>
    tpu.vector_store %arg19[%261, %c0_93], %260 {strides = array<i32>} : memref<32x128xf32, #tpu.memory_space<vmem>>, vector<8x128xf32>,
    %c4_i32 = arith.constant 4 : i32
    %c0_94 = arith.constant 0 : index
    %c0_95 = arith.constant 0 : index
    %c0_96 = arith.constant 0 : index
    %c0_97 = arith.constant 0 : index
    %263 = vector.load %arg16[%c0_94, %c0_95, %c0_96, %c0_97] : memref<1x2x8x128xf32, #tpu.memory_space<vmem>>, vector<1x1x8x128xf32>
    %264 = vector.shape_cast %263 : vector<1x1x8x128xf32> to vector<8x128xf32>
    %265 = vector.shape_cast %236 : vector<8x128xf32> to vector<1x1x8x128xf32>
    tpu.vector_store %arg16[%c0_94, %c0_95, %c0_96, %c0_97], %265 {strides = array<i32>} : memref<1x2x8x128xf32, #tpu.memory_space<vmem>>, vector<1x1x8x128xf32>,
    %c0_98 = arith.constant 0 : index
    %c1_99 = arith.constant 1 : index
    %c0_100 = arith.constant 0 : index
    %c0_101 = arith.constant 0 : index
    %266 = vector.load %arg16[%c0_98, %c1_99, %c0_100, %c0_101] : memref<1x2x8x128xf32, #tpu.memory_space<vmem>>, vector<1x1x8x128xf32>
    %267 = vector.shape_cast %266 : vector<1x1x8x128xf32> to vector<8x128xf32>
    %268 = vector.shape_cast %260 : vector<8x128xf32> to vector<1x1x8x128xf32>
    tpu.vector_store %arg16[%c0_98, %c1_99, %c0_100, %c0_101], %268 {strides = array<i32>} : memref<1x2x8x128xf32, #tpu.memory_space<vmem>>, vector<1x1x8x128xf32>,
    %c0_102 = arith.constant 0 : index
    %c0_103 = arith.constant 0 : index
    %c0_104 = arith.constant 0 : index
    %c0_105 = arith.constant 0 : index
    %269 = vector.load %arg17[%c0_102, %c0_103, %c0_104, %c0_105] : memref<1x2x8x128xf32, #tpu.memory_space<vmem>>, vector<1x1x8x128xf32>
    %270 = vector.shape_cast %269 : vector<1x1x8x128xf32> to vector<8x128xf32>
    %271 = vector.shape_cast %234 : vector<8x128xf32> to vector<1x1x8x128xf32>
    tpu.vector_store %arg17[%c0_102, %c0_103, %c0_104, %c0_105], %271 {strides = array<i32>} : memref<1x2x8x128xf32, #tpu.memory_space<vmem>>, vector<1x1x8x128xf32>,
    %c0_106 = arith.constant 0 : index
    %c1_107 = arith.constant 1 : index
    %c0_108 = arith.constant 0 : index
    %c0_109 = arith.constant 0 : index
    %272 = vector.load %arg17[%c0_106, %c1_107, %c0_108, %c0_109] : memref<1x2x8x128xf32, #tpu.memory_space<vmem>>, vector<1x1x8x128xf32>
    %273 = vector.shape_cast %272 : vector<1x1x8x128xf32> to vector<8x128xf32>
    %274 = vector.shape_cast %258 : vector<8x128xf32> to vector<1x1x8x128xf32>
    tpu.vector_store %arg17[%c0_106, %c1_107, %c0_108, %c0_109], %274 {strides = array<i32>} : memref<1x2x8x128xf32, #tpu.memory_space<vmem>>, vector<1x1x8x128xf32>,
    %c0_110 = arith.constant 0 : index
    %c0_111 = arith.constant 0 : index
    %275 = vector.load %arg19[%c0_110, %c0_111] : memref<32x128xf32, #tpu.memory_space<vmem>>, vector<32x128xf32>
    %276 = arith.truncf %275 : vector<32x128xf32> to vector<32x128xbf16>
    %c0_112 = arith.constant 0 : index
    %c0_113 = arith.constant 0 : index
    %277 = vector.load %arg13[%c0_112, %c0_113] : memref<128x128xbf16, #tpu.memory_space<vmem>>, vector<128x128xbf16>
    %cst_114 = arith.constant dense<0.000000e+00> : vector<32x128xf32>
    %278 = tpu.matmul %276, %277, %cst_114 {dimension_numbers = #tpu.dot_dimension_numbers<[1], [0], [0], [1], [0, 0, 1, 1], [], []>} : vector<32x128xbf16>, vector<128x128xbf16>, vector<32x128xf32> -> vector<32x128xf32>
    %c0_115 = arith.constant 0 : index
    %c0_116 = arith.constant 0 : index
    %279 = vector.load %arg14[%c0_115, %c0_116] : memref<1x128xf32, #tpu.memory_space<vmem>>, vector<1x128xf32>
    %280 = vector.broadcast %279 : vector<1x128xf32> to vector<32x128xf32>
    %281 = arith.addf %278, %280 : vector<32x128xf32>
    %282 = tpu.iota {dimensions = array<i32: 1>} : vector<32x128xi32>
    %c8_i32_117 = arith.constant 8 : i32
    %283 = vector.broadcast %c8_i32_117 : i32 to vector<32x128xi32>
    %284 = arith.cmpi slt, %282, %283 : vector<32x128xi32>
    %cst_118 = arith.constant 0xFF800000 : f32
    %285 = vector.broadcast %cst_118 : f32 to vector<32x128xf32>
    %286 = arith.select %284, %281, %285 : vector<32x128xi1>, vector<32x128xf32>
    %cst_119 = arith.constant dense<0xFF800000> : vector<32xf32>
    %287 = vector.multi_reduction <maximumf>, %286, %cst_119 [1] : vector<32x128xf32> to vector<32xf32>
    %288 = vector.shape_cast %287 : vector<32xf32> to vector<32x1xf32>
    %289 = vector.broadcast %288 : vector<32x1xf32> to vector<32x128xf32>
    %290 = arith.cmpf oge, %286, %289 : vector<32x128xf32>
    %c128_i32 = arith.constant 128 : i32
    %291 = vector.broadcast %c128_i32 : i32 to vector<32x128xi32>
    %292 = arith.select %290, %282, %291 : vector<32x128xi1>, vector<32x128xi32>
    %cst_120 = arith.constant dense<2147483647> : vector<32xi32>
    %293 = vector.multi_reduction <minsi>, %292, %cst_120 [1] : vector<32x128xi32> to vector<32xi32>
    %294 = vector.shape_cast %293 : vector<32xi32> to vector<32x1xi32>
    %c9_i32 = arith.constant 9 : i32
    %295 = vector.broadcast %c9_i32 : i32 to vector<32x128xi32>
    %296 = arith.cmpi eq, %282, %295 : vector<32x128xi32>
    %297 = arith.sitofp %294 : vector<32x1xi32> to vector<32x1xf32>
    %298 = vector.shape_cast %297 : vector<32x1xf32> to vector<32x1xf32>
    %299 = vector.broadcast %298 : vector<32x1xf32> to vector<32x128xf32>
    %300 = arith.select %296, %299, %281 : vector<32x128xi1>, vector<32x128xf32>
    %c0_121 = arith.constant 0 : index
    %c0_122 = arith.constant 0 : index
    %c0_123 = arith.constant 0 : index
    %301 = vector.load %arg15[%c0_121, %c0_122, %c0_123] : memref<1x32x128xf32, #tpu.memory_space<vmem>>, vector<1x32x128xf32>
    %302 = vector.shape_cast %301 : vector<1x32x128xf32> to vector<32x128xf32>
    %303 = vector.shape_cast %300 : vector<32x128xf32> to vector<1x32x128xf32>
    tpu.vector_store %arg15[%c0_121, %c0_122, %c0_123], %303 {strides = array<i32>} : memref<1x32x128xf32, #tpu.memory_space<vmem>>, vector<1x32x128xf32>,
    return
  }
  func.func @transform_0(%arg0: i32) -> (i32, i32, i32) {
    %c0_i32 = arith.constant 0 : i32
    %c0_i32_0 = arith.constant 0 : i32
    %c0_i32_1 = arith.constant 0 : i32
    return %arg0, %c0_i32, %c0_i32_0 : i32, i32, i32
  }
  func.func @transform_1(%arg0: i32) -> (i32, i32, i32) {
    %c0_i32 = arith.constant 0 : i32
    %c0_i32_0 = arith.constant 0 : i32
    %c0_i32_1 = arith.constant 0 : i32
    return %arg0, %c0_i32, %c0_i32_0 : i32, i32, i32
  }
  func.func @transform_2(%arg0: i32) -> (i32, i32, i32, i32) {
    %c0_i32 = arith.constant 0 : i32
    %c0_i32_0 = arith.constant 0 : i32
    %c0_i32_1 = arith.constant 0 : i32
    %c0_i32_2 = arith.constant 0 : i32
    return %arg0, %c0_i32, %c0_i32_0, %c0_i32_1 : i32, i32, i32, i32
  }
  func.func @transform_3(%arg0: i32) -> (i32, i32, i32, i32) {
    %c0_i32 = arith.constant 0 : i32
    %c0_i32_0 = arith.constant 0 : i32
    %c0_i32_1 = arith.constant 0 : i32
    %c0_i32_2 = arith.constant 0 : i32
    return %arg0, %c0_i32, %c0_i32_0, %c0_i32_1 : i32, i32, i32, i32
  }
  func.func @transform_4(%arg0: i32) -> (i32, i32) {
    %c0_i32 = arith.constant 0 : i32
    %c0_i32_0 = arith.constant 0 : i32
    %c0_i32_1 = arith.constant 0 : i32
    return %c0_i32, %c0_i32_0 : i32, i32
  }
  func.func @transform_5(%arg0: i32) -> (i32, i32) {
    %c0_i32 = arith.constant 0 : i32
    %c0_i32_0 = arith.constant 0 : i32
    %c0_i32_1 = arith.constant 0 : i32
    return %c0_i32, %c0_i32_0 : i32, i32
  }
  func.func @transform_6(%arg0: i32) -> (i32, i32) {
    %c0_i32 = arith.constant 0 : i32
    %c0_i32_0 = arith.constant 0 : i32
    %c0_i32_1 = arith.constant 0 : i32
    return %c0_i32, %c0_i32_0 : i32, i32
  }
  func.func @transform_7(%arg0: i32) -> (i32, i32) {
    %c0_i32 = arith.constant 0 : i32
    %c0_i32_0 = arith.constant 0 : i32
    %c0_i32_1 = arith.constant 0 : i32
    return %c0_i32, %c0_i32_0 : i32, i32
  }
  func.func @transform_8(%arg0: i32) -> (i32, i32) {
    %c0_i32 = arith.constant 0 : i32
    %c0_i32_0 = arith.constant 0 : i32
    %c0_i32_1 = arith.constant 0 : i32
    return %c0_i32, %c0_i32_0 : i32, i32
  }
  func.func @transform_9(%arg0: i32) -> (i32, i32) {
    %c0_i32 = arith.constant 0 : i32
    %c0_i32_0 = arith.constant 0 : i32
    %c0_i32_1 = arith.constant 0 : i32
    return %c0_i32, %c0_i32_0 : i32, i32
  }
  func.func @transform_10(%arg0: i32) -> (i32, i32) {
    %c0_i32 = arith.constant 0 : i32
    %c0_i32_0 = arith.constant 0 : i32
    %c0_i32_1 = arith.constant 0 : i32
    return %c0_i32, %c0_i32_0 : i32, i32
  }
  func.func @transform_11(%arg0: i32) -> (i32, i32) {
    %c0_i32 = arith.constant 0 : i32
    %c0_i32_0 = arith.constant 0 : i32
    %c0_i32_1 = arith.constant 0 : i32
    return %c0_i32, %c0_i32_0 : i32, i32
  }
  func.func @transform_12(%arg0: i32) -> (i32, i32) {
    %c0_i32 = arith.constant 0 : i32
    %c0_i32_0 = arith.constant 0 : i32
    %c0_i32_1 = arith.constant 0 : i32
    return %c0_i32, %c0_i32_0 : i32, i32
  }
  func.func @transform_13(%arg0: i32) -> (i32, i32) {
    %c0_i32 = arith.constant 0 : i32
    %c0_i32_0 = arith.constant 0 : i32
    %c0_i32_1 = arith.constant 0 : i32
    return %c0_i32, %c0_i32_0 : i32, i32
  }
  func.func @transform_14(%arg0: i32) -> (i32, i32, i32) {
    %c0_i32 = arith.constant 0 : i32
    %c0_i32_0 = arith.constant 0 : i32
    %c0_i32_1 = arith.constant 0 : i32
    return %arg0, %c0_i32, %c0_i32_0 : i32, i32, i32
  }
  func.func @transform_15(%arg0: i32) -> (i32, i32, i32, i32) {
    %c0_i32 = arith.constant 0 : i32
    %c0_i32_0 = arith.constant 0 : i32
    %c0_i32_1 = arith.constant 0 : i32
    %c0_i32_2 = arith.constant 0 : i32
    return %arg0, %c0_i32, %c0_i32_0, %c0_i32_1 : i32, i32, i32, i32
  }
  func.func @transform_16(%arg0: i32) -> (i32, i32, i32, i32) {
    %c0_i32 = arith.constant 0 : i32
    %c0_i32_0 = arith.constant 0 : i32
    %c0_i32_1 = arith.constant 0 : i32
    %c0_i32_2 = arith.constant 0 : i32
    return %arg0, %c0_i32, %c0_i32_0, %c0_i32_1 : i32, i32, i32, i32
  }
}

</mosaic_0001>

<bundles_post_ra>
// kernel: net_forward.1
= control target key start
LH: loop header
LB: loop body
LE: loop exit
PB: predicated region body
PF: predicated region fallthrough
CT: control target
= control target key end

     0   :  { %v7747_v1 = vmov 0   ;;  %s7729_s4 = inlined_call_operand.vmem [shape: bf16[512,128], index: 4, kind: input, shape index: {}]   ;;  %s7730_s0 = inlined_call_operand.vmem [shape: bf16[1,32,512], index: 0, kind: input, shape index: {}]   ;;  %s7731_s1 = inlined_call_operand.vmem [shape: f32[1,32,1], index: 1, kind: input, shape index: {}]   ;;  %s7732_s6 = inlined_call_operand.vmem [shape: bf16[128,512], index: 6, kind: input, shape index: {}]   ;;  %s7733_s7 = inlined_call_operand.vmem [shape: bf16[128,512], index: 7, kind: input, shape index: {}]   ;;  %s7734_s3 = inlined_call_operand.vmem [shape: f32[1,2,8,128], index: 3, kind: input, shape index: {}, may-alias: {2,3}]   ;;  %s7735_s10 = inlined_call_operand.vmem [shape: bf16[128,512], index: 10, kind: input, shape index: {}]   ;;  %s7736_s5 = inlined_call_operand.vmem [shape: f32[1,128], index: 5, kind: input, shape index: {}]   ;;  %s7737_s2 = inlined_call_operand.vmem [shape: f32[1,2,8,128], index: 2, kind: input, shape index: {}, may-alias: {2,3}]   ;;  %s7738_s9 = inlined_call_operand.vmem [shape: bf16[128,512], index: 9, kind: input, shape index: {}]   ;;  %s7739_s8 = inlined_call_operand.vmem [shape: f32[1,512], index: 8, kind: input, shape index: {}]   ;;  %s7740_s11 = inlined_call_operand.vmem [shape: f32[1,512], index: 11, kind: input, shape index: {}]   ;;  %s7741_s16 = inlined_call_operand.vmem [shape: f32[1,2,8,128], index: 16, kind: output, shape index: {2}]   ;;  %s7742_s15 = inlined_call_operand.vmem [shape: f32[1,2,8,128], index: 15, kind: output, shape index: {1}]   ;;  %s7743_s12 = inlined_call_operand.vmem [shape: bf16[128,128], index: 12, kind: input, shape index: {}]   ;;  %s7744_s13 = inlined_call_operand.vmem [shape: f32[1,128], index: 13, kind: input, shape index: {}]   ;;  %s7745_s14 = inlined_call_operand.vmem [shape: f32[1,32,128], index: 14, kind: output, shape index: {0}]  }
   0x1   :  { %7863 = sst [smem:[#allocation78_spill]] %s7729_s4  ;;  %5255 = vset.pattern.permute.xlu0 %v7747_v1  ;;  %5256 = vset.pattern.permute.xlu1 %v7747_v1  ;;  %v5289_v33 = vld [vmem:[%s7730_s0] ss:$16 sps:$4 sm:$0xff]   ;;  %v5291_v34 = vld [vmem:[%s7730_s0 + $0x4] ss:$16 sps:$4 sm:$0xff]   ;;  %v4848_v40 = vld [vmem:[%s7731_s1 + $0x8] sm:$0xff] }
   0x2   :  { %s7864_s23 = sld [smem:[#allocation78_spill]]  ;;  %v5292_v35 = vld [vmem:[%s7730_s0 + $0x8] ss:$16 sps:$4 sm:$0xff]   ;;  %v5294_v36 = vld [vmem:[%s7730_s0 + $0xc] ss:$16 sps:$4 sm:$0xff]   ;;  %394 = vmatprep.mubr.bf16.mxu0 %v5291_v34  ;;  %v830_v39 = vld [vmem:[%s7731_s1] sm:$0xff] }
   0x3   :  { %v5295_v37 = vld [vmem:[%s7730_s0 + $0x24] ss:$16 sps:$4 sm:$0xff]   ;;  %443 = vmatprep.mubr.bf16.mxu1 %v5294_v36  ;;  %v5298_v38 = vld [vmem:[%s7730_s0 + $0x2c] ss:$16 sps:$4 sm:$0xff]   ;;  %v5297_v41 = vld [vmem:[%s7730_s0 + $0x20] ss:$16 sps:$4 sm:$0xff]   ;;  %833 = vperm.xlu0 %5255, %v830_v39  }
   0x4   :  { %v5301_v42 = vld [vmem:[%s7732_s6] ss:$16 sps:$4 sm:$0xff]   ;;  %v5300_v43 = vld [vmem:[%s7730_s0 + $0x28] ss:$16 sps:$4 sm:$0xff]   ;;  %v5303_v44 = vld [vmem:[%s7732_s6 + $0x4] ss:$16 sps:$4 sm:$0xff]  }
   0x5   :  { %v5304_v45 = vld [vmem:[%s7732_s6 + $0x8] ss:$16 sps:$4 sm:$0xff]   ;;  %v5306_v46 = vld [vmem:[%s7732_s6 + $0xc] ss:$16 sps:$4 sm:$0xff]   ;;  %v5307_v47 = vld [vmem:[%s7732_s6 + $0x20] ss:$16 sps:$4 sm:$0xff]  }
   0x6   :  { %v5309_v48 = vld [vmem:[%s7732_s6 + $0x24] ss:$16 sps:$4 sm:$0xff]   ;;  %v5310_v49 = vld [vmem:[%s7732_s6 + $0x28] ss:$16 sps:$4 sm:$0xff]   ;;  %v5312_v50 = vld [vmem:[%s7732_s6 + $0x2c] ss:$16 sps:$4 sm:$0xff]  }
   0x7   :  { %1733 = vperm.xlu0 %5255, %v4848_v40   ;;  %v5315_v51 = vld [vmem:[%s7732_s6 + $0x44] ss:$16 sps:$4 sm:$0xff]   ;;  %v5318_v52 = vld [vmem:[%s7732_s6 + $0x4c] ss:$16 sps:$4 sm:$0xff]   ;;  %v5313_v53 = vld [vmem:[%s7732_s6 + $0x40] ss:$16 sps:$4 sm:$0xff]  }
   0x8   :  { %v5257_v0 = vld [vmem:[%s7864_s23 + $0x40] sm:$0xff]   ;;  %v5261_v5 = vld [vmem:[%s7864_s23 + $0x48] sm:$0xff]   ;;  %v5265_v9 = vld [vmem:[%s7864_s23 + $0x50] sm:$0xff]  }
   0x9   :  { %v5258_v2 = vld [vmem:[%s7864_s23 + $0xc0] sm:$0xff]   ;;  %5168 = vmatprep.subr.bf16.mxu0 %v5257_v0  ;;  %v5262_v6 = vld [vmem:[%s7864_s23 + $0xc8] sm:$0xff]   ;;  %v5266_v10 = vld [vmem:[%s7864_s23 + $0xd0] sm:$0xff]  }
   0xa   :  { %v5259_v3 = vld [vmem:[%s7864_s23] sm:$0xff]   ;;  %5196 = vmatprep.subr.bf16.mxu1 %v5258_v2  ;;  %v5263_v7 = vld [vmem:[%s7864_s23 + $0x8] sm:$0xff]   ;;  %v5267_v11 = vld [vmem:[%s7864_s23 + $0x10] sm:$0xff]  }
   0xb   :  { %v5260_v4 = vld [vmem:[%s7864_s23 + $0x80] sm:$0xff]   ;;  %5169 = vmatpush3.bf16.msra.mxu0 %v5259_v3  ;;  %v5264_v8 = vld [vmem:[%s7864_s23 + $0x88] sm:$0xff]   ;;  %v5268_v12 = vld [vmem:[%s7864_s23 + $0x90] sm:$0xff]  }
   0xc   :  { %5197 = vmatpush3.bf16.msra.mxu1 %v5260_v4  ;;  %5170 = vmatprep.subr.bf16.mxu0 %v5261_v5  ;;  %v5269_v13 = vld [vmem:[%s7864_s23 + $0x58] sm:$0xff]   ;;  %v5273_v17 = vld [vmem:[%s7864_s23 + $0x60] sm:$0xff]   ;;  %v5277_v21 = vld [vmem:[%s7864_s23 + $0x68] sm:$0xff]  }
   0xd   :  { %5198 = vmatprep.subr.bf16.mxu1 %v5262_v6  ;;  %v5270_v14 = vld [vmem:[%s7864_s23 + $0xd8] sm:$0xff]   ;;  %v5274_v18 = vld [vmem:[%s7864_s23 + $0xe0] sm:$0xff]   ;;  %v5278_v22 = vld [vmem:[%s7864_s23 + $0xe8] sm:$0xff]  }
   0xe   :  { %v5271_v15 = vld [vmem:[%s7864_s23 + $0x18] sm:$0xff]   ;;  %v5275_v19 = vld [vmem:[%s7864_s23 + $0x20] sm:$0xff]   ;;  %v5279_v23 = vld [vmem:[%s7864_s23 + $0x28] sm:$0xff]  }
   0xf   :  { %5171 = vmatpush3.bf16.msra.mxu0 %v5263_v7  ;;  %v5272_v16 = vld [vmem:[%s7864_s23 + $0x98] sm:$0xff]   ;;  %v5276_v20 = vld [vmem:[%s7864_s23 + $0xa0] sm:$0xff]   ;;  %v5280_v24 = vld [vmem:[%s7864_s23 + $0xa8] sm:$0xff]  }
  0x10   :  { %5199 = vmatpush3.bf16.msra.mxu1 %v5264_v8  ;;  %5172 = vmatprep.subr.bf16.mxu0 %v5265_v9  ;;  %v5281_v25 = vld [vmem:[%s7864_s23 + $0x70] sm:$0xff]   ;;  %v5285_v29 = vld [vmem:[%s7864_s23 + $0x78] sm:$0xff]  }
  0x11   :  { %5200 = vmatprep.subr.bf16.mxu1 %v5266_v10  ;;  %v5282_v26 = vld [vmem:[%s7864_s23 + $0xf0] sm:$0xff]   ;;  %v5286_v30 = vld [vmem:[%s7864_s23 + $0xf8] sm:$0xff]  }
  0x12   :  { %v5283_v27 = vld [vmem:[%s7864_s23 + $0x30] sm:$0xff]   ;;  %v5287_v31 = vld [vmem:[%s7864_s23 + $0x38] sm:$0xff]  }
  0x13   :  { %5173 = vmatpush3.bf16.msra.mxu0 %v5267_v11  ;;  %v5284_v28 = vld [vmem:[%s7864_s23 + $0xb0] sm:$0xff]   ;;  %v5288_v32 = vld [vmem:[%s7864_s23 + $0xb8] sm:$0xff]  }
  0x14   :  { %5201 = vmatpush3.bf16.msra.mxu1 %v5268_v12  ;;  %5174 = vmatprep.subr.bf16.mxu0 %v5269_v13  ;;  %v5316_v54 = vld [vmem:[%s7732_s6 + $0x48] ss:$16 sps:$4 sm:$0xff]   ;;  %v5321_v55 = vld [vmem:[%s7732_s6 + $0x64] ss:$16 sps:$4 sm:$0xff]   ;;  %v5324_v56 = vld [vmem:[%s7732_s6 + $0x6c] ss:$16 sps:$4 sm:$0xff]  }
  0x15   :  { %5202 = vmatprep.subr.bf16.mxu1 %v5270_v14  ;;  %v5319_v57 = vld [vmem:[%s7732_s6 + $0x60] ss:$16 sps:$4 sm:$0xff]   ;;  %v5322_v58 = vld [vmem:[%s7732_s6 + $0x68] ss:$16 sps:$4 sm:$0xff]   ;;  %v5327_v59 = vld [vmem:[%s7732_s6 + $0x84] ss:$16 sps:$4 sm:$0xff]  }
  0x16   :  { %v5330_v60 = vld [vmem:[%s7732_s6 + $0x8c] ss:$16 sps:$4 sm:$0xff]   ;;  %v5325_v61 = vld [vmem:[%s7732_s6 + $0x80] ss:$16 sps:$4 sm:$0xff]   ;;  %v5328_v62 = vld [vmem:[%s7732_s6 + $0x88] ss:$16 sps:$4 sm:$0xff]  }
  0x17   :  { %5175 = vmatpush3.bf16.msra.mxu0 %v5271_v15  ;;  %v5333_v63 = vld [vmem:[%s7732_s6 + $0xa4] ss:$16 sps:$4 sm:$0xff]   ;;  %v5336_v0 = vld [vmem:[%s7732_s6 + $0xac] ss:$16 sps:$4 sm:$0xff]   ;;  %v5331_v2 = vld [vmem:[%s7732_s6 + $0xa0] ss:$16 sps:$4 sm:$0xff]  }
  0x18   :  { %5203 = vmatpush3.bf16.msra.mxu1 %v5272_v16  ;;  %5176 = vmatprep.subr.bf16.mxu0 %v5273_v17  ;;  %v5334_v3 = vld [vmem:[%s7732_s6 + $0xa8] ss:$16 sps:$4 sm:$0xff]   ;;  %v5339_v4 = vld [vmem:[%s7732_s6 + $0xc4] ss:$16 sps:$4 sm:$0xff]   ;;  %v5342_v5 = vld [vmem:[%s7732_s6 + $0xcc] ss:$16 sps:$4 sm:$0xff]  }
  0x19   :  { %5204 = vmatprep.subr.bf16.mxu1 %v5274_v18  ;;  %v5337_v6 = vld [vmem:[%s7732_s6 + $0xc0] ss:$16 sps:$4 sm:$0xff]   ;;  %v5340_v7 = vld [vmem:[%s7732_s6 + $0xc8] ss:$16 sps:$4 sm:$0xff]   ;;  %v5345_v8 = vld [vmem:[%s7732_s6 + $0xe4] ss:$16 sps:$4 sm:$0xff]  }
  0x1a   :  { %v5348_v9 = vld [vmem:[%s7732_s6 + $0xec] ss:$16 sps:$4 sm:$0xff]   ;;  %v5343_v10 = vld [vmem:[%s7732_s6 + $0xe0] ss:$16 sps:$4 sm:$0xff]   ;;  %v5346_v11 = vld [vmem:[%s7732_s6 + $0xe8] ss:$16 sps:$4 sm:$0xff]  }
  0x1b   :  { %5177 = vmatpush3.bf16.msra.mxu0 %v5275_v19  ;;  %v6088_v12 = vld [vmem:[%s7733_s7 + $0x4] ss:$16 sps:$4 sm:$0xff]   ;;  %v6093_v13 = vld [vmem:[%s7733_s7 + $0xc] ss:$16 sps:$4 sm:$0xff]   ;;  %v4671_v19 = vld [vmem:[%s7736_s5] ss:$0 sm:$0xff] }
  0x1c   :  { %5205 = vmatpush3.bf16.msra.mxu1 %v5276_v20  ;;  %5178 = vmatprep.subr.bf16.mxu0 %v5277_v21  ;;  %v4745_v14 = vld [vmem:[%s7734_s3 + $0x8] sm:$0xff] }
  0x1d   :  { %5206 = vmatprep.subr.bf16.mxu1 %v5278_v22 }
  0x1f   :  { %5179 = vmatpush3.bf16.msra.mxu0 %v5279_v23 }
  0x20   :  { %5207 = vmatpush3.bf16.msra.mxu1 %v5280_v24  ;;  %5180 = vmatprep.subr.bf16.mxu0 %v5281_v25 }
  0x21   :  { %5208 = vmatprep.subr.bf16.mxu1 %v5282_v26 }
  0x23   :  { %5181 = vmatpush3.bf16.msra.mxu0 %v5283_v27 }
  0x24   :  { %5209 = vmatpush3.bf16.msra.mxu1 %v5284_v28  ;;  %5182 = vmatprep.subr.bf16.mxu0 %v5285_v29 }
  0x25   :  { %5210 = vmatprep.subr.bf16.mxu1 %v5286_v30 }
  0x27   :  { %5183 = vmatpush3.bf16.msra.mxu0 %v5287_v31 }
  0x28   :  { %5211 = vmatpush3.bf16.msra.mxu1 %v5288_v32  ;;  %680 = vmatprep.subr.bf16.mxu0 %v5303_v44 }
  0x29   :  { %733 = vmatprep.subr.bf16.mxu1 %v5306_v46 }
  0x2a   :  { %395 = vmatmul.mubr.bf16.vlgmr.msra.gmra.mrb[0].mxu0 %v5289_v33 }
  0x2b   :  { %444 = vmatmul.mubr.bf16.vlgmr.msra.gmra.mrb[0].mxu1 %v5292_v35  ;;  %402 = vmatprep.mubr.bf16.mxu0 %v5295_v37 }
  0x2c   :  { %451 = vmatprep.mubr.bf16.mxu1 %v5298_v38  ;;  %681 = vmatpush1.bf16.msra.mxu0 %v5301_v42  ;;  %v6111_v42 = vld [vmem:[%s7733_s7] ss:$16 sps:$4 sm:$0xff]  }
  0x2d   :  { %734 = vmatpush1.bf16.msra.mxu1 %v5304_v45  ;;  %682 = vmatprep.subr.bf16.mxu0 %v5309_v48  ;;  %v6121_v48 = vld [vmem:[%s7733_s7 + $0x24] ss:$16 sps:$4 sm:$0xff]  }
  0x2e   :  { %735 = vmatprep.subr.bf16.mxu1 %v5312_v50 }
  0x30   :  { %683 = vmatpush1.bf16.msra.mxu0 %v5307_v47 }
  0x31   :  { %736 = vmatpush1.bf16.msra.mxu1 %v5310_v49  ;;  %684 = vmatprep.subr.bf16.mxu0 %v5315_v51  ;;  %v6126_v49 = vld [vmem:[%s7733_s7 + $0x2c] ss:$16 sps:$4 sm:$0xff]  }
  0x32   :  { %403 = vmatmul.mubr.bf16.gmra.mrb[4].mxu0 %v5297_v41  ;;  %737 = vmatprep.subr.bf16.mxu1 %v5318_v52 }
  0x33   :  { %452 = vmatmul.mubr.bf16.gmra.mrb[4].mxu1 %v5300_v43  ;;  %712 = vmatprep.mubr.bf16.mxu0 %v7747_v1  ;;  %v6116_v43 = vld [vmem:[%s7733_s7 + $0x8] ss:$16 sps:$4 sm:$0xff]  }
  0x34   :  { %765 = vmatprep.mubr.bf16.mxu1 %v7747_v1  ;;  %685 = vmatpush1.bf16.msra.mxu0 %v5313_v53 }
  0x35   :  { %738 = vmatpush1.bf16.msra.mxu1 %v5316_v54  ;;  %686 = vmatprep.subr.bf16.mxu0 %v5321_v55 }
  0x36   :  { %739 = vmatprep.subr.bf16.mxu1 %v5324_v56  ;;  %v6133_v56 = vld [vmem:[%s7733_s7 + $0x20] ss:$16 sps:$4 sm:$0xff]  }
  0x38   :  { %687 = vmatpush1.bf16.msra.mxu0 %v5319_v57  ;;  %v6138_v57 = vld [vmem:[%s7733_s7 + $0x28] ss:$16 sps:$4 sm:$0xff]  }
  0x39   :  { %740 = vmatpush1.bf16.msra.mxu1 %v5322_v58  ;;  %688 = vmatprep.subr.bf16.mxu0 %v5327_v59  ;;  %v6145_v59 = vld [vmem:[%s7733_s7 + $0x44] ss:$16 sps:$4 sm:$0xff]  }
  0x3a   :  { %741 = vmatprep.subr.bf16.mxu1 %v5330_v60  ;;  %v6150_v60 = vld [vmem:[%s7733_s7 + $0x4c] ss:$16 sps:$4 sm:$0xff]  }
  0x3c   :  { %689 = vmatpush1.bf16.msra.mxu0 %v5325_v61 }
  0x3d   :  { %742 = vmatpush1.bf16.msra.mxu1 %v5328_v62  ;;  %690 = vmatprep.subr.bf16.mxu0 %v5333_v63  ;;  %v6159_v63 = vld [vmem:[%s7733_s7 + $0x40] ss:$16 sps:$4 sm:$0xff]  }
  0x3e   :  { %743 = vmatprep.subr.bf16.mxu1 %v5336_v0  ;;  %v6164_v0 = vld [vmem:[%s7733_s7 + $0x48] ss:$16 sps:$4 sm:$0xff]  }
  0x40   :  { %691 = vmatpush1.bf16.msra.mxu0 %v5331_v2  ;;  %v6171_v2 = vld [vmem:[%s7733_s7 + $0x64] ss:$16 sps:$4 sm:$0xff]  }
  0x41   :  { %744 = vmatpush1.bf16.msra.mxu1 %v5334_v3  ;;  %692 = vmatprep.subr.bf16.mxu0 %v5339_v4  ;;  %v6176_v3 = vld [vmem:[%s7733_s7 + $0x6c] ss:$16 sps:$4 sm:$0xff]  }
  0x42   :  { %745 = vmatprep.subr.bf16.mxu1 %v5342_v5  ;;  %v6183_v5 = vld [vmem:[%s7733_s7 + $0x60] ss:$16 sps:$4 sm:$0xff]  }
  0x44   :  { %693 = vmatpush1.bf16.msra.mxu0 %v5337_v6  ;;  %v6188_v6 = vld [vmem:[%s7733_s7 + $0x68] ss:$16 sps:$4 sm:$0xff]  }
  0x45   :  { %746 = vmatpush1.bf16.msra.mxu1 %v5340_v7  ;;  %694 = vmatprep.subr.bf16.mxu0 %v5345_v8  ;;  %v6195_v7 = vld [vmem:[%s7733_s7 + $0x84] ss:$16 sps:$4 sm:$0xff]   ;;  %v6200_v8 = vld [vmem:[%s7733_s7 + $0x8c] ss:$16 sps:$4 sm:$0xff]  }
  0x46   :  { %747 = vmatprep.subr.bf16.mxu1 %v5348_v9  ;;  %v6209_v9 = vld [vmem:[%s7733_s7 + $0x80] ss:$16 sps:$4 sm:$0xff]  }
  0x48   :  { %695 = vmatpush1.bf16.msra.mxu0 %v5343_v10  ;;  %v6214_v10 = vld [vmem:[%s7733_s7 + $0x88] ss:$16 sps:$4 sm:$0xff]  }
  0x49   :  { %748 = vmatpush1.bf16.msra.mxu1 %v5346_v11  ;;  %1040 = vmatprep.subr.bf16.mxu0 %v6088_v12  ;;  %v6221_v11 = vld [vmem:[%s7733_s7 + $0xa4] ss:$16 sps:$4 sm:$0xff]  }
  0x4a   :  { %1081 = vmatprep.subr.bf16.mxu1 %v6093_v13 }
  0x82   :  { %v6100_v15 = vpop.permute.xlu0 %833 }
  0x83   :  { %v6103_v16 = vmul.f32 %v4745_v14, %v6100_v15  ;;  %v6226_v14 = vld [vmem:[%s7733_s7 + $0xac] ss:$16 sps:$4 sm:$0xff]  }
  0x85   :  { %7865 = vst [vmem:[#allocation4_spill] sm:$0xff] %v6103_v16  ;;  %v4744_v16 = vld [vmem:[%s7737_s2 + $0x8] sm:$0xff] }
  0xfd   :  { %v5184_v17 = vpop.f32.mrb[0].mxu0 }
  0xfe   :  { %v5212_v18 = vpop.f32.mrb[0].mxu1  ;;  %v5185_v20 = vpop.f32.mrb[1].mxu0 }
  0xff   :  { %v5186_v21 = vadd.f32 %v5185_v20, %v5184_v17  ;;  %v5213_v22 = vpop.f32.mrb[1].mxu1  ;;  %v5187_v23 = vpop.f32.mrb[2].mxu0  ;;  %v6233_v17 = vld [vmem:[%s7733_s7 + $0xa0] ss:$16 sps:$4 sm:$0xff]   ;;  %v6250_v20 = vld [vmem:[%s7733_s7 + $0xcc] ss:$16 sps:$4 sm:$0xff]  }
 0x100   :  { %v5214_v24 = vadd.f32 %v5213_v22, %v5212_v18  ;;  %v5215_v25 = vpop.f32.mrb[2].mxu1  ;;  %v5188_v26 = vpop.f32.mrb[3].mxu0  ;;  %v6238_v18 = vld [vmem:[%s7733_s7 + $0xa8] ss:$16 sps:$4 sm:$0xff]   ;;  %v6260_v22 = vld [vmem:[%s7733_s7 + $0xc0] ss:$16 sps:$4 sm:$0xff]  }
 0x101   :  { %v397_v27 = vadd.f32 %v5186_v21, %v4671_v19  ;;  %v5189_v28 = vadd.f32 %v5188_v26, %v5187_v23  ;;  %v5216_v29 = vpop.f32.mrb[3].mxu1  ;;  %v824_v21 = vld [vmem:[%s7737_s2] sm:$0xff]  ;;  %v6265_v23 = vld [vmem:[%s7733_s7 + $0xc8] ss:$16 sps:$4 sm:$0xff]  }
 0x102   :  { %v5217_v30 = vadd.f32 %v5216_v29, %v5215_v25  ;;  %v6277_v25 = vld [vmem:[%s7733_s7 + $0xec] ss:$16 sps:$4 sm:$0xff]   ;;  %v836_v26 = vmul.f32 %v6100_v15, %v824_v21  ;;  %v6297_v29 = vld [vmem:[%s7735_s10 + $0x4] ss:$16 sps:$4 sm:$0xff]   ;;  %v6455_v21 = vld [vmem:[%s7735_s10 + $0xc0] ss:$16 sps:$4 sm:$0xff]  }
 0x103   :  { %v446_v31 = vadd.f32 %v5214_v24, %v397_v27  ;;  %v400_v32 = vadd.f32 %v5189_v28, %v4671_v19  ;;  %v6272_v24 = vld [vmem:[%s7733_s7 + $0xe4] ss:$16 sps:$4 sm:$0xff]   ;;  %v6285_v27 = vld [vmem:[%s7733_s7 + $0xe0] ss:$16 sps:$4 sm:$0xff]   ;;  %v6290_v28 = vld [vmem:[%s7733_s7 + $0xe8] ss:$16 sps:$4 sm:$0xff]  }
 0x104   :  { %7888 = vst [vmem:[#allocation27_spill] sm:$0xff] %v6455_v21 }
 0x105   :  { %v449_v33 = vadd.f32 %v5217_v30, %v400_v32  ;;  %v5190_v34 = vpop.f32.mrb[4].mxu0  ;;  %v460_v37 = vmax.f32 %v446_v31, 0.0  ;;  %v6302_v30 = vld [vmem:[%s7735_s10 + $0xc] ss:$16 sps:$4 sm:$0xff]   ;;  %v847_v31 = vpack.c.bf16 %v836_v26, %v836_v26  ;;  %v6309_v32 = vld [vmem:[%s7735_s10] ss:$16 sps:$4 sm:$0xff]  }
 0x106   :  { %v5191_v35 = vpop.f32.mrb[5].mxu0  ;;  %v5218_v36 = vpop.f32.mrb[4].mxu1  ;;  %v6460_v26 = vld [vmem:[%s7735_s10 + $0xc8] ss:$16 sps:$4 sm:$0xff]  }
 0x107   :  { %v461_v38 = vmax.f32 %v449_v33, 0.0  ;;  %v5192_v39 = vadd.f32 %v5191_v35, %v5190_v34  ;;  %v5193_v40 = vpop.f32.mrb[6].mxu0  ;;  %v5219_v41 = vpop.f32.mrb[5].mxu1  ;;  %v6314_v33 = vld [vmem:[%s7735_s10 + $0x8] ss:$16 sps:$4 sm:$0xff]   ;;  %7889 = vst [vmem:[#allocation28_spill] sm:$0xff] %v6460_v26 }
 0x108   :  { %v5194_v44 = vpop.f32.mrb[7].mxu0  ;;  %v5220_v45 = vadd.f32 %v5219_v41, %v5218_v36  ;;  %v5221_v46 = vpop.f32.mrb[6].mxu1  ;;  %v6321_v34 = vld [vmem:[%s7735_s10 + $0x24] ss:$16 sps:$4 sm:$0xff]   ;;  %v6326_v35 = vld [vmem:[%s7735_s10 + $0x2c] ss:$16 sps:$4 sm:$0xff]  }
 0x109   :  { %v464_v47 = vpack.c.bf16 %v461_v38, %v460_v37  ;;  %v405_v50 = vadd.f32 %v5192_v39, %v4671_v19  ;;  %v5195_v51 = vadd.f32 %v5194_v44, %v5193_v40  ;;  %v5222_v52 = vpop.f32.mrb[7].mxu1  ;;  %7866 = vst [vmem:[#allocation5_spill] sm:$0xff] %v6321_v34  ;;  %7867 = vst [vmem:[#allocation6_spill] sm:$0xff] %v6326_v35  ;;  %v6333_v36 = vld [vmem:[%s7735_s10 + $0x20] ss:$16 sps:$4 sm:$0xff]  }
 0x10a   :  { %v5223_v53 = vadd.f32 %v5222_v52, %v5221_v46  ;;  %7868 = vst [vmem:[#allocation7_spill] sm:$0xff] %v6333_v36  ;;  %v6338_v37 = vld [vmem:[%s7735_s10 + $0x28] ss:$16 sps:$4 sm:$0xff]   ;;  %v6345_v38 = vld [vmem:[%s7735_s10 + $0x44] ss:$16 sps:$4 sm:$0xff]  }
 0x10b   :  { %713 = vmatmul.mubr.bf16.vlgmr.msra.gmra.mrb[8].mxu0 %v464_v47  ;;  %766 = vmatmul.mubr.bf16.vlgmr.msra.gmra.mrb[8].mxu1 %v464_v47  ;;  %v408_v54 = vadd.f32 %v5195_v51, %v4671_v19  ;;  %v454_v55 = vadd.f32 %v5220_v45, %v405_v50  ;;  %v6245_v19 = vld [vmem:[%s7733_s7 + $0xc4] ss:$16 sps:$4 sm:$0xff]   ;;  %7869 = vst [vmem:[#allocation8_spill] sm:$0xff] %v6338_v37  ;;  %7870 = vst [vmem:[#allocation9_spill] sm:$0xff] %v6345_v38  ;;  %v6350_v39 = vld [vmem:[%s7735_s10 + $0x4c] ss:$16 sps:$4 sm:$0xff]  }
 0x10c   :  { %1041 = vmatpush1.bf16.msra.mxu0 %v6111_v42  ;;  %1082 = vmatpush1.bf16.msra.mxu1 %v6116_v43  ;;  %7871 = vst [vmem:[#allocation10_spill] sm:$0xff] %v6350_v39  ;;  %v6359_v40 = vld [vmem:[%s7735_s10 + $0x40] ss:$16 sps:$4 sm:$0xff]   ;;  %v6364_v41 = vld [vmem:[%s7735_s10 + $0x48] ss:$16 sps:$4 sm:$0xff]  }
 0x10d   :  { %1042 = vmatprep.subr.bf16.mxu0 %v6121_v48  ;;  %1083 = vmatprep.subr.bf16.mxu1 %v6126_v49  ;;  %v462_v58 = vmax.f32 %v454_v55, 0.0  ;;  %v457_v61 = vadd.f32 %v5223_v53, %v408_v54  ;;  %7872 = vst [vmem:[#allocation11_spill] sm:$0xff] %v6359_v40  ;;  %7873 = vst [vmem:[#allocation12_spill] sm:$0xff] %v6364_v41  ;;  %v6371_v44 = vld [vmem:[%s7735_s10 + $0x64] ss:$16 sps:$4 sm:$0xff]  }
 0x10e   :  { %722 = vmatprep.mubr.bf16.mxu0 %v7747_v1  ;;  %775 = vmatprep.mubr.bf16.mxu1 %v7747_v1  ;;  %7874 = vst [vmem:[#allocation13_spill] sm:$0xff] %v6371_v44  ;;  %v6376_v45 = vld [vmem:[%s7735_s10 + $0x6c] ss:$16 sps:$4 sm:$0xff]   ;;  %v6383_v46 = vld [vmem:[%s7735_s10 + $0x60] ss:$16 sps:$4 sm:$0xff]  }
 0x10f   :  { %v463_v62 = vmax.f32 %v457_v61, 0.0  ;;  %7875 = vst [vmem:[#allocation14_spill] sm:$0xff] %v6376_v45  ;;  %7876 = vst [vmem:[#allocation15_spill] sm:$0xff] %v6383_v46  ;;  %v6388_v47 = vld [vmem:[%s7735_s10 + $0x68] ss:$16 sps:$4 sm:$0xff]  }
 0x110   :  { %1043 = vmatpush1.bf16.msra.mxu0 %v6133_v56  ;;  %1084 = vmatpush1.bf16.msra.mxu1 %v6138_v57  ;;  %7877 = vst [vmem:[#allocation16_spill] sm:$0xff] %v6388_v47  ;;  %v6395_v50 = vld [vmem:[%s7735_s10 + $0x84] ss:$16 sps:$4 sm:$0xff]   ;;  %v6400_v51 = vld [vmem:[%s7735_s10 + $0x8c] ss:$16 sps:$4 sm:$0xff]  }
 0x111   :  { %1044 = vmatprep.subr.bf16.mxu0 %v6145_v59  ;;  %1085 = vmatprep.subr.bf16.mxu1 %v6150_v60  ;;  %v465_v4 = vpack.c.bf16 %v463_v62, %v462_v58  ;;  %7878 = vst [vmem:[#allocation17_spill] sm:$0xff] %v6395_v50  ;;  %7879 = vst [vmem:[#allocation18_spill] sm:$0xff] %v6400_v51  ;;  %v6407_v52 = vld [vmem:[%s7735_s10 + $0x80] ss:$16 sps:$4 sm:$0xff]   ;;  %v6412_v53 = vld [vmem:[%s7735_s10 + $0x88] ss:$16 sps:$4 sm:$0xff]  }
 0x112   :  { %7880 = vst [vmem:[#allocation19_spill] sm:$0xff] %v6407_v52  ;;  %7881 = vst [vmem:[#allocation20_spill] sm:$0xff] %v6412_v53  ;;  %v6419_v54 = vld [vmem:[%s7735_s10 + $0xa4] ss:$16 sps:$4 sm:$0xff]   ;;  %v6424_v55 = vld [vmem:[%s7735_s10 + $0xac] ss:$16 sps:$4 sm:$0xff]  }
 0x113   :  { %723 = vmatmul.mubr.bf16.gmra.mrb[12].mxu0 %v465_v4  ;;  %776 = vmatmul.mubr.bf16.gmra.mrb[12].mxu1 %v465_v4  ;;  %7882 = vst [vmem:[#allocation21_spill] sm:$0xff] %v6419_v54  ;;  %7883 = vst [vmem:[#allocation22_spill] sm:$0xff] %v6424_v55  ;;  %v6431_v58 = vld [vmem:[%s7735_s10 + $0xa0] ss:$16 sps:$4 sm:$0xff]   ;;  %v6436_v61 = vld [vmem:[%s7735_s10 + $0xa8] ss:$16 sps:$4 sm:$0xff]  }
 0x114   :  { %1045 = vmatpush1.bf16.msra.mxu0 %v6159_v63  ;;  %1086 = vmatpush1.bf16.msra.mxu1 %v6164_v0  ;;  %7884 = vst [vmem:[#allocation23_spill] sm:$0xff] %v6431_v58  ;;  %7885 = vst [vmem:[#allocation24_spill] sm:$0xff] %v6436_v61  ;;  %v6443_v62 = vld [vmem:[%s7735_s10 + $0xc4] ss:$16 sps:$4 sm:$0xff]   ;;  %v6448_v4 = vld [vmem:[%s7735_s10 + $0xcc] ss:$16 sps:$4 sm:$0xff]  }
 0x115   :  { %1046 = vmatprep.subr.bf16.mxu0 %v6171_v2  ;;  %1087 = vmatprep.subr.bf16.mxu1 %v6176_v3  ;;  %7886 = vst [vmem:[#allocation25_spill] sm:$0xff] %v6443_v62  ;;  %7887 = vst [vmem:[#allocation26_spill] sm:$0xff] %v6448_v4 }
 0x116   :  { %1072 = vmatprep.mubr.bf16.mxu0 %v7747_v1  ;;  %1113 = vmatprep.mubr.bf16.mxu1 %v7747_v1 }
 0x118   :  { %1047 = vmatpush1.bf16.msra.mxu0 %v6183_v5  ;;  %1088 = vmatpush1.bf16.msra.mxu1 %v6188_v6 }
 0x119   :  { %1048 = vmatprep.subr.bf16.mxu0 %v6195_v7  ;;  %1089 = vmatprep.subr.bf16.mxu1 %v6200_v8 }
 0x11c   :  { %1049 = vmatpush1.bf16.msra.mxu0 %v6209_v9  ;;  %1090 = vmatpush1.bf16.msra.mxu1 %v6214_v10 }
 0x11d   :  { %1050 = vmatprep.subr.bf16.mxu0 %v6221_v11  ;;  %1091 = vmatprep.subr.bf16.mxu1 %v6226_v14 }
 0x120   :  { %1051 = vmatpush1.bf16.msra.mxu0 %v6233_v17  ;;  %1092 = vmatpush1.bf16.msra.mxu1 %v6238_v18 }
 0x121   :  { %1052 = vmatprep.subr.bf16.mxu0 %v6245_v19  ;;  %1093 = vmatprep.subr.bf16.mxu1 %v6250_v20 }
 0x124   :  { %1053 = vmatpush1.bf16.msra.mxu0 %v6260_v22  ;;  %1094 = vmatpush1.bf16.msra.mxu1 %v6265_v23 }
 0x125   :  { %1054 = vmatprep.subr.bf16.mxu0 %v6272_v24  ;;  %1095 = vmatprep.subr.bf16.mxu1 %v6277_v25 }
 0x128   :  { %1055 = vmatpush1.bf16.msra.mxu0 %v6285_v27  ;;  %1096 = vmatpush1.bf16.msra.mxu1 %v6290_v28 }
 0x129   :  { %1376 = vmatprep.subr.bf16.mxu0 %v6297_v29  ;;  %1417 = vmatprep.subr.bf16.mxu1 %v6302_v30 }
 0x12b   :  { %1073 = vmatmul.mubr.bf16.vlgmr.msra.gmra.mrb[16].mxu0 %v847_v31  ;;  %1114 = vmatmul.mubr.bf16.vlgmr.msra.gmra.mrb[16].mxu1 %v847_v31  ;;  %v6467_v31 = vld [vmem:[%s7735_s10 + $0xe4] ss:$16 sps:$4 sm:$0xff]  }
 0x12c   :  { %1377 = vmatpush1.bf16.msra.mxu0 %v6309_v32  ;;  %1418 = vmatpush1.bf16.msra.mxu1 %v6314_v33  ;;  %7890 = vst [vmem:[#allocation29_spill] sm:$0xff] %v6467_v31 }
 0x12d   :  { %1378 = vmatprep.subr.bf16.mxu0 %v6321_v34  ;;  %1419 = vmatprep.subr.bf16.mxu1 %v6326_v35 }
 0x12e   :  { %1408 = vmatprep.mubr.bf16.mxu0 %v7747_v1  ;;  %1449 = vmatprep.mubr.bf16.mxu1 %v7747_v1  ;;  %v6472_v1 = vld [vmem:[%s7735_s10 + $0xec] ss:$16 sps:$4 sm:$0xff]  }
 0x12f   :  { %7891 = vst [vmem:[#allocation30_spill] sm:$0xff] %v6472_v1 }
 0x130   :  { %1379 = vmatpush1.bf16.msra.mxu0 %v6333_v36  ;;  %1420 = vmatpush1.bf16.msra.mxu1 %v6338_v37 }
 0x131   :  { %1380 = vmatprep.subr.bf16.mxu0 %v6345_v38  ;;  %1421 = vmatprep.subr.bf16.mxu1 %v6350_v39 }
 0x134   :  { %1381 = vmatpush1.bf16.msra.mxu0 %v6359_v40  ;;  %1422 = vmatpush1.bf16.msra.mxu1 %v6364_v41 }
 0x135   :  { %1382 = vmatprep.subr.bf16.mxu0 %v6371_v44  ;;  %1423 = vmatprep.subr.bf16.mxu1 %v6376_v45 }
 0x138   :  { %1383 = vmatpush1.bf16.msra.mxu0 %v6383_v46  ;;  %1424 = vmatpush1.bf16.msra.mxu1 %v6388_v47 }
 0x139   :  { %1384 = vmatprep.subr.bf16.mxu0 %v6395_v50  ;;  %1425 = vmatprep.subr.bf16.mxu1 %v6400_v51 }
 0x13c   :  { %1385 = vmatpush1.bf16.msra.mxu0 %v6407_v52  ;;  %1426 = vmatpush1.bf16.msra.mxu1 %v6412_v53 }
 0x13d   :  { %1386 = vmatprep.subr.bf16.mxu0 %v6419_v54  ;;  %1427 = vmatprep.subr.bf16.mxu1 %v6424_v55 }
 0x140   :  { %1387 = vmatpush1.bf16.msra.mxu0 %v6431_v58  ;;  %1428 = vmatpush1.bf16.msra.mxu1 %v6436_v61  ;;  %v838_v61 = vmul.f32 %v4744_v16, %v6100_v15  ;;  %v6499_v58 = vld [vmem:[%s7738_s9 + $0x4] ss:$16 sps:$4 sm:$0xff]   ;;  %v6504_v16 = vld [vmem:[%s7738_s9] ss:$16 sps:$4 sm:$0xff]  }
 0x141   :  { %1388 = vmatprep.subr.bf16.mxu0 %v6443_v62  ;;  %1429 = vmatprep.subr.bf16.mxu1 %v6448_v4  ;;  %v6482_v4 = vld [vmem:[%s7735_s10 + $0xe0] ss:$16 sps:$4 sm:$0xff]   ;;  %v6487_v62 = vld [vmem:[%s7735_s10 + $0xe8] ss:$16 sps:$4 sm:$0xff]   ;;  %7895 = vst [vmem:[#allocation33_spill] sm:$0xff] %v6499_v58  ;;  %7896 = vst [vmem:[#allocation34_spill] sm:$0xff] %v6504_v16 }
 0x142   :  { %7892 = vst [vmem:[#allocation31_spill] sm:$0xff] %v6482_v4  ;;  %7893 = vst [vmem:[#allocation32_spill] sm:$0xff] %v6487_v62 }
 0x144   :  { %1389 = vmatpush1.bf16.msra.mxu0 %v6455_v21  ;;  %1430 = vmatpush1.bf16.msra.mxu1 %v6460_v26  ;;  %v1183_v26 = vpack.c.bf16 %v838_v61, %v838_v61  ;;  %v7894_v21 = vmov 0   ;;  %v6510_v61 = vld [vmem:[%s7738_s9 + $0x8] ss:$16 sps:$4 sm:$0xff]  }
 0x145   :  { %1390 = vmatprep.subr.bf16.mxu0 %v6467_v31  ;;  %1431 = vmatprep.subr.bf16.mxu1 %v6472_v1  ;;  %7897 = vst [vmem:[#allocation35_spill] sm:$0xff] %v6510_v61  ;;  %v6652_v1 = vld [vmem:[%s7738_s9 + $0xc0] ss:$16 sps:$4 sm:$0xff]   ;;  %v6657_v31 = vld [vmem:[%s7738_s9 + $0xc8] ss:$16 sps:$4 sm:$0xff]  }
 0x146   :  { %7921 = vst [vmem:[#allocation59_spill] sm:$0xff] %v6652_v1  ;;  %7922 = vst [vmem:[#allocation60_spill] sm:$0xff] %v6657_v31 }
 0x148   :  { %1391 = vmatpush1.bf16.msra.mxu0 %v6482_v4  ;;  %1432 = vmatpush1.bf16.msra.mxu1 %v6487_v62  ;;  %v6522_v62 = vld [vmem:[%s7738_s9 + $0x24] ss:$16 sps:$4 sm:$0xff]   ;;  %v6533_v4 = vld [vmem:[%s7738_s9 + $0x20] ss:$16 sps:$4 sm:$0xff]  }
 0x149   :  { %1618 = vmatprep.subr.bf16.mxu0 %v6499_v58  ;;  %7899 = vst [vmem:[#allocation37_spill] sm:$0xff] %v6522_v62  ;;  %v6527_v58 = vld [vmem:[%s7738_s9 + $0x2c] ss:$16 sps:$4 sm:$0xff]   ;;  %7901 = vst [vmem:[#allocation39_spill] sm:$0xff] %v6533_v4 }
 0x14a   :  { %7900 = vst [vmem:[#allocation38_spill] sm:$0xff] %v6527_v58 }
 0x14b   :  { %1409 = vmatmul.mubr.bf16.vlgmr.msra.gmra.mrb[20].mxu0 %v1183_v26  ;;  %1450 = vmatmul.mubr.bf16.vlgmr.msra.gmra.mrb[20].mxu1 %v1183_v26  ;;  %v6515_v26 = vld [vmem:[%s7738_s9 + $0xc] ss:$16 sps:$4 sm:$0xff]  }
 0x14c   :  { %1650 = vmatprep.mubr.bf16.mxu0 %v7894_v21  ;;  %1691 = vmatprep.mubr.bf16.mxu1 %v7894_v21  ;;  %7898 = vst [vmem:[#allocation36_spill] sm:$0xff] %v6515_v26 }
 0x14d   :  { %1619 = vmatpush1.bf16.msra.mxu0 %v6504_v16  ;;  %1659 = vmatprep.subr.bf16.mxu1 %v6515_v26  ;;  %v6538_v16 = vld [vmem:[%s7738_s9 + $0x28] ss:$16 sps:$4 sm:$0xff]   ;;  %v6551_v26 = vld [vmem:[%s7738_s9 + $0x4c] ss:$16 sps:$4 sm:$0xff]  }
 0x14e   :  { %1660 = vmatpush1.bf16.msra.mxu1 %v6510_v61  ;;  %7902 = vst [vmem:[#allocation40_spill] sm:$0xff] %v6538_v16  ;;  %1620 = vmatprep.subr.bf16.mxu0 %v6522_v62  ;;  %v6546_v61 = vld [vmem:[%s7738_s9 + $0x44] ss:$16 sps:$4 sm:$0xff]   ;;  %7904 = vst [vmem:[#allocation42_spill] sm:$0xff] %v6551_v26  ;;  %v6557_v62 = vld [vmem:[%s7738_s9 + $0x40] ss:$16 sps:$4 sm:$0xff]  }
 0x14f   :  { %1661 = vmatprep.subr.bf16.mxu1 %v6527_v58  ;;  %7903 = vst [vmem:[#allocation41_spill] sm:$0xff] %v6546_v61  ;;  %7905 = vst [vmem:[#allocation43_spill] sm:$0xff] %v6557_v62  ;;  %v6575_v58 = vld [vmem:[%s7738_s9 + $0x6c] ss:$16 sps:$4 sm:$0xff]  }
 0x150   :  { %7908 = vst [vmem:[#allocation46_spill] sm:$0xff] %v6575_v58 }
 0x151   :  { %1621 = vmatpush1.bf16.msra.mxu0 %v6533_v4  ;;  %v6562_v4 = vld [vmem:[%s7738_s9 + $0x48] ss:$16 sps:$4 sm:$0xff]  }
 0x152   :  { %1662 = vmatpush1.bf16.msra.mxu1 %v6538_v16  ;;  %7906 = vst [vmem:[#allocation44_spill] sm:$0xff] %v6562_v4  ;;  %1622 = vmatprep.subr.bf16.mxu0 %v6546_v61  ;;  %v6570_v16 = vld [vmem:[%s7738_s9 + $0x64] ss:$16 sps:$4 sm:$0xff]   ;;  %v6581_v61 = vld [vmem:[%s7738_s9 + $0x60] ss:$16 sps:$4 sm:$0xff]  }
 0x153   :  { %1663 = vmatprep.subr.bf16.mxu1 %v6551_v26  ;;  %7907 = vst [vmem:[#allocation45_spill] sm:$0xff] %v6570_v16  ;;  %7909 = vst [vmem:[#allocation47_spill] sm:$0xff] %v6581_v61  ;;  %v6599_v26 = vld [vmem:[%s7738_s9 + $0x8c] ss:$16 sps:$4 sm:$0xff]  }
 0x154   :  { %7912 = vst [vmem:[#allocation50_spill] sm:$0xff] %v6599_v26 }
 0x155   :  { %1623 = vmatpush1.bf16.msra.mxu0 %v6557_v62  ;;  %v6586_v62 = vld [vmem:[%s7738_s9 + $0x68] ss:$16 sps:$4 sm:$0xff]  }
 0x156   :  { %1664 = vmatpush1.bf16.msra.mxu1 %v6562_v4  ;;  %7910 = vst [vmem:[#allocation48_spill] sm:$0xff] %v6586_v62  ;;  %1624 = vmatprep.subr.bf16.mxu0 %v6570_v16  ;;  %v6594_v4 = vld [vmem:[%s7738_s9 + $0x84] ss:$16 sps:$4 sm:$0xff]   ;;  %v6605_v16 = vld [vmem:[%s7738_s9 + $0x80] ss:$16 sps:$4 sm:$0xff]  }
 0x157   :  { %1665 = vmatprep.subr.bf16.mxu1 %v6575_v58  ;;  %7911 = vst [vmem:[#allocation49_spill] sm:$0xff] %v6594_v4  ;;  %7913 = vst [vmem:[#allocation51_spill] sm:$0xff] %v6605_v16  ;;  %v6623_v58 = vld [vmem:[%s7738_s9 + $0xa4] ss:$16 sps:$4 sm:$0xff]  }
 0x158   :  { %7916 = vst [vmem:[#allocation54_spill] sm:$0xff] %v6623_v58 }
 0x159   :  { %1625 = vmatpush1.bf16.msra.mxu0 %v6581_v61  ;;  %v6610_v61 = vld [vmem:[%s7738_s9 + $0x88] ss:$16 sps:$4 sm:$0xff]  }
 0x15a   :  { %1666 = vmatpush1.bf16.msra.mxu1 %v6586_v62  ;;  %7914 = vst [vmem:[#allocation52_spill] sm:$0xff] %v6610_v61  ;;  %1626 = vmatprep.subr.bf16.mxu0 %v6594_v4  ;;  %v6618_v62 = vld [vmem:[%s7738_s9 + $0xa0] ss:$16 sps:$4 sm:$0xff]   ;;  %v6629_v4 = vld [vmem:[%s7738_s9 + $0xa8] ss:$16 sps:$4 sm:$0xff]  }
 0x15b   :  { %1667 = vmatprep.subr.bf16.mxu1 %v6599_v26  ;;  %7915 = vst [vmem:[#allocation53_spill] sm:$0xff] %v6618_v62  ;;  %7917 = vst [vmem:[#allocation55_spill] sm:$0xff] %v6629_v4  ;;  %v6639_v26 = vld [vmem:[%s7738_s9 + $0xc4] ss:$16 sps:$4 sm:$0xff]  }
 0x15c   :  { %7919 = vst [vmem:[#allocation57_spill] sm:$0xff] %v6639_v26 }
 0x15d   :  { %1627 = vmatpush1.bf16.msra.mxu0 %v6605_v16  ;;  %v6634_v16 = vld [vmem:[%s7738_s9 + $0xac] ss:$16 sps:$4 sm:$0xff]  }
 0x15e   :  { %1668 = vmatpush1.bf16.msra.mxu1 %v6610_v61  ;;  %7918 = vst [vmem:[#allocation56_spill] sm:$0xff] %v6634_v16  ;;  %1628 = vmatprep.subr.bf16.mxu0 %v6623_v58  ;;  %v6645_v61 = vld [vmem:[%s7738_s9 + $0xcc] ss:$16 sps:$4 sm:$0xff]   ;;  %v6662_v58 = vld [vmem:[%s7738_s9 + $0xe4] ss:$16 sps:$4 sm:$0xff]  }
 0x15f   :  { %7920 = vst [vmem:[#allocation58_spill] sm:$0xff] %v6645_v61  ;;  %1669 = vmatprep.subr.bf16.mxu1 %v6634_v16  ;;  %7923 = vst [vmem:[#allocation61_spill] sm:$0xff] %v6662_v58  ;;  %v6674_v16 = vld [vmem:[%s7738_s9 + $0xe0] ss:$16 sps:$4 sm:$0xff]  }
 0x160   :  { %7925 = vst [vmem:[#allocation63_spill] sm:$0xff] %v6674_v16 }
 0x161   :  { %1629 = vmatpush1.bf16.msra.mxu0 %v6618_v62  ;;  %v6668_v62 = vld [vmem:[%s7738_s9 + $0xec] ss:$16 sps:$4 sm:$0xff]  }
 0x162   :  { %1630 = vmatprep.subr.bf16.mxu0 %v6639_v26  ;;  %7924 = vst [vmem:[#allocation62_spill] sm:$0xff] %v6668_v62  ;;  %1670 = vmatpush1.bf16.msra.mxu1 %v6629_v4  ;;  %v6681_v26 = vld [vmem:[%s7738_s9 + $0xe8] ss:$16 sps:$4 sm:$0xff]  }
 0x163   :  { %1671 = vmatprep.subr.bf16.mxu1 %v6645_v61  ;;  %7926 = vst [vmem:[#allocation64_spill] sm:$0xff] %v6681_v26 }
 0x165   :  { %1631 = vmatpush1.bf16.msra.mxu0 %v6652_v1  ;;  %v4951_v1 = vld [vmem:[%s7731_s1 + $0x10] sm:$0xff] }
 0x166   :  { %1632 = vmatprep.subr.bf16.mxu0 %v6662_v58  ;;  %1672 = vmatpush1.bf16.msra.mxu1 %v6657_v31  ;;  %v5054_v58 = vld [vmem:[%s7731_s1 + $0x18] sm:$0xff]  ;;  %v7791_v31 = vlaneseq }
 0x167   :  { %1673 = vmatprep.subr.bf16.mxu1 %v6668_v62  ;;  %2634 = vperm.xlu1 %5256, %v4951_v1  }
 0x168   :  { %v6697_v62 = vshrl.u32 %v7791_v31, 7 }
 0x169   :  { %1633 = vmatpush1.bf16.msra.mxu0 %v6674_v16 }
 0x16a   :  { %1940 = vmatprep.subr.bf16.mxu0 %v6088_v12  ;;  %1674 = vmatpush1.bf16.msra.mxu1 %v6681_v26  ;;  %7927 = vst [vmem:[#allocation65_spill] sm:$0xff] %v6697_v62  ;;  %v7802_v12 = vsub.s32 0, %v6697_v62  ;;  %v7804_v26 = vsub.s32 2, %v6697_v62  ;;  %v7807_v16 = vsub.s32 1, %v6697_v62  ;;  %v7810_v1 = vsub.s32 3, %v6697_v62 }
 0x16b   :  { %1981 = vmatprep.subr.bf16.mxu1 %v6093_v13  ;;  %3535 = vperm.xlu1 %5256, %v5054_v58   ;;  %v498_v13 = vld [vmem:[%s7739_s8] sm:$0xf] }
 0x16c   :  { %v503_v58 = vrot.slane %v498_v13, %v7802_v12  ;;  %v511_v31 = vrot.slane %v498_v13, %v7804_v26  ;;  %v507_v53 = vrot.slane %v498_v13, %v7807_v16  ;;  %v515_v52 = vrot.slane %v498_v13, %v7810_v1 }
 0x1de   :  { %v714_v61 = vpop.f32.mrb[8].mxu0  ;;  %v767_v4 = vpop.f32.mrb[8].mxu1 }
 0x1df   :  { %v716_v55 = vpop.f32.mrb[9].mxu0  ;;  %v769_v54 = vpop.f32.mrb[9].mxu1 }
 0x1e0   :  { %v718_v51 = vpop.f32.mrb[10].mxu0  ;;  %v771_v50 = vpop.f32.mrb[10].mxu1  ;;  %v770_v38 = vadd.f32 %v769_v54, %v515_v52 }
 0x1e1   :  { %v6714_v47 = vadd.f32 %v718_v51, %v503_v58  ;;  %v6716_v46 = vadd.f32 %v771_v50, %v511_v31  ;;  %v720_v45 = vpop.f32.mrb[11].mxu0  ;;  %v773_v44 = vpop.f32.mrb[11].mxu1 }
 0x1e2   :  { %v6718_v12 = vadd.f32 %v720_v45, %v507_v53  ;;  %v6720_v41 = vadd.f32 %v773_v44, %v515_v52 }
 0x1e3   :  { %7928 = vst [vmem:[#allocation66_spill] sm:$0xff] %v6714_v47  ;;  %7929 = vst [vmem:[#allocation67_spill] sm:$0xff] %v6716_v46 }
 0x1e4   :  { %7930 = vst [vmem:[#allocation68_spill] sm:$0xff] %v6718_v12  ;;  %7931 = vst [vmem:[#allocation69_spill] sm:$0xff] %v6720_v41 }
 0x1e6   :  { %v724_v26 = vpop.f32.mrb[12].mxu0  ;;  %v777_v40 = vpop.f32.mrb[12].mxu1 }
 0x1e7   :  { %v6722_v39 = vadd.f32 %v724_v26, %v503_v58  ;;  %v6724_v16 = vadd.f32 %v777_v40, %v511_v31  ;;  %v726_v62 = vpop.f32.mrb[13].mxu0  ;;  %v779_v13 = vpop.f32.mrb[13].mxu1  ;;  %v715_v40 = vadd.f32 %v714_v61, %v503_v58 }
 0x1e8   :  { %v6726_v1 = vadd.f32 %v726_v62, %v507_v53  ;;  %v6728_v51 = vadd.f32 %v779_v13, %v515_v52  ;;  %v728_v50 = vpop.f32.mrb[14].mxu0  ;;  %v781_v46 = vpop.f32.mrb[14].mxu1 }
 0x1e9   :  { %7932 = vst [vmem:[#allocation70_spill] sm:$0xff] %v6722_v39  ;;  %7933 = vst [vmem:[#allocation71_spill] sm:$0xff] %v6724_v16  ;;  %v6730_v47 = vadd.f32 %v728_v50, %v503_v58  ;;  %v6732_v45 = vadd.f32 %v781_v46, %v511_v31  ;;  %v730_v44 = vpop.f32.mrb[15].mxu0  ;;  %v783_v41 = vpop.f32.mrb[15].mxu1  ;;  %v768_v16 = vadd.f32 %v767_v4, %v511_v31 }
 0x1ea   :  { %7934 = vst [vmem:[#allocation72_spill] sm:$0xff] %v6726_v1  ;;  %7935 = vst [vmem:[#allocation73_spill] sm:$0xff] %v6728_v51  ;;  %v6734_v12 = vadd.f32 %v730_v44, %v507_v53  ;;  %v6736_v26 = vadd.f32 %v783_v41, %v515_v52  ;;  %v717_v39 = vadd.f32 %v716_v55, %v507_v53 }
 0x1eb   :  { %7936 = vst [vmem:[#allocation74_spill] sm:$0xff] %v6730_v47  ;;  %7937 = vst [vmem:[#allocation75_spill] sm:$0xff] %v6732_v45 }
 0x1ec   :  { %7938 = vst [vmem:[#allocation76_spill] sm:$0xff] %v6734_v12  ;;  %7939 = vst [vmem:[#allocation77_spill] sm:$0xff] %v6736_v26  ;;  %v7237_v26 = vld [vmem:[%s7735_s10 + $0xa0] ss:$16 sps:$4 sm:$0xff]  }
 0x1fe   :  { %v1074_v62 = vpop.f32.mrb[16].mxu0  ;;  %v1115_v1 = vpop.f32.mrb[16].mxu1 }
 0x1ff   :  { %v1122_v13 = vadd.f32 %v1074_v62, %v715_v40  ;;  %v1124_v51 = vadd.f32 %v1115_v1, %v768_v16  ;;  %v1076_v37 = vpop.f32.mrb[17].mxu0  ;;  %v1117_v36 = vpop.f32.mrb[17].mxu1 }
 0x200   :  { %v1123_v50 = vadd.f32 %v1076_v37, %v717_v39  ;;  %v1125_v47 = vadd.f32 %v1117_v36, %v770_v38  ;;  %v1078_v46 = vpop.f32.mrb[18].mxu0  ;;  %v1119_v45 = vpop.f32.mrb[18].mxu1  ;;  %v825_v36 = vld [vmem:[%s7734_s3] sm:$0xff] }
 0x201   :  { %v4778_v35 = vmul.f32 -1.442695, %v1122_v13  ;;  %v1079_v34 = vpop.f32.mrb[19].mxu0  ;;  %v1120_v44 = vpop.f32.mrb[19].mxu1  ;;  %v4780_v41 = vmul.f32 -1.442695, %v1124_v51  ;;  %v837_v38 = vmul.f32 %v6100_v15, %v825_v36 }
 0x202   :  { %v4779_v12 = vmul.f32 -1.442695, %v1123_v50  ;;  %v7970_v44 = vld [vmem:[#allocation65_spill] sm:$0xff] }
 0x203   :  { %5645 = vpow2.f32 %v4778_v35 }
 0x204   :  { %5647 = vpow2.f32 %v4779_v12 }
 0x205   :  { %5649 = vtanh.f32 %v1125_v47 }
 0x206   :  { %5651 = vpow2.f32 %v4780_v41  ;;  %v7971_v41 = vsub.s32 0, %v7970_v44 }
 0x20d   :  { %v5646_v4 = vpop.eup %5645 }
 0x20e   :  { %v1135_v53 = vadd.f32 1.0, %v5646_v4  ;;  %v5648_v52 = vpop.eup %5647 }
 0x20f   :  { %v1136_v54 = vadd.f32 1.0, %v5648_v52  ;;  %v5650_v55 = vpop.eup %5649 }
 0x210   :  { %5653 = vrcp.f32 %v1135_v53  ;;  %v5652_v37 = vpop.eup %5651 }
 0x211   :  { %5655 = vrcp.f32 %v1136_v54  ;;  %v1137_v31 = vadd.f32 1.0, %v5652_v37  ;;  %v7972_v54 = vsub.s32 1, %v7970_v44 }
 0x213   :  { %5657 = vrcp.f32 %v1137_v31 }
 0x21a   :  { %v5654_v34 = vpop.eup %5653 }
 0x21b   :  { %v1146_v35 = vmul.f32 %v5654_v34, %v5650_v55  ;;  %v5656_v39 = vpop.eup %5655 }
 0x21c   :  { %v1145_v16 = vmul.f32 %v5656_v39, %v837_v38 }
 0x21d   :  { %v5658_v62 = vpop.eup %5657 }
 0x21e   :  { %v6742_v61 = vpop.f32.mrb[20].mxu0  ;;  %v6744_v47 = vpop.f32.mrb[20].mxu1  ;;  %v6746_v12 = vadd.f32 %v1146_v35, %v1145_v16 }
 0x21f   :  { %v6748_v1 = vpop.f32.mrb[21].mxu0  ;;  %v6750_v58 = vpop.f32.mrb[21].mxu1 }
 0x220   :  { %v1414_v51 = vpop.f32.mrb[22].mxu0  ;;  %v1455_v45 = vpop.f32.mrb[22].mxu1  ;;  %5659 = vtanh.f32 %v6746_v12 }
 0x221   :  { %v1415_v15 = vpop.f32.mrb[23].mxu0  ;;  %v1456_v40 = vpop.f32.mrb[23].mxu1 }
 0x22a   :  { %v5660_v13 = vpop.eup %5659 }
 0x22b   :  { %v1149_v50 = vmul.f32 %v5660_v13, %v5658_v62 }
 0x22d   :  { %v1150_v46 = vpack.c.bf16 %v1149_v50, %v1149_v50 }
 0x22f   :  { %1651 = vmatmul.mubr.bf16.vlgmr.msra.gmra.mrb[24].mxu0 %v1150_v46  ;;  %1692 = vmatmul.mubr.bf16.vlgmr.msra.gmra.mrb[24].mxu1 %v1150_v46 }
 0x230   :  { %1941 = vmatpush1.bf16.msra.mxu0 %v6111_v42  ;;  %1982 = vmatpush1.bf16.msra.mxu1 %v6116_v43  ;;  %v6779_v42 = vpop.permute.xlu0 %1733 }
 0x231   :  { %1942 = vmatprep.subr.bf16.mxu0 %v6121_v48  ;;  %1983 = vmatprep.subr.bf16.mxu1 %v6126_v49  ;;  %v1736_v43 = vmul.f32 %v6779_v42, %v1149_v50  ;;  %v7940_v49 = vld [vmem:[#allocation5_spill] sm:$0xff] }
 0x232   :  { %1972 = vmatprep.mubr.bf16.mxu0 %v7894_v21  ;;  %2013 = vmatprep.mubr.bf16.mxu1 %v7894_v21 }
 0x233   :  { %v1747_v48 = vpack.c.bf16 %v1736_v43, %v1736_v43 }
 0x234   :  { %1943 = vmatpush1.bf16.msra.mxu0 %v6133_v56  ;;  %1984 = vmatpush1.bf16.msra.mxu1 %v6138_v57  ;;  %v7941_v56 = vld [vmem:[#allocation6_spill] sm:$0xff]  ;;  %v7942_v57 = vld [vmem:[#allocation7_spill] sm:$0xff] }
 0x235   :  { %1944 = vmatprep.subr.bf16.mxu0 %v6145_v59  ;;  %1985 = vmatprep.subr.bf16.mxu1 %v6150_v60  ;;  %v7943_v59 = vld [vmem:[#allocation8_spill] sm:$0xff]  ;;  %v7944_v60 = vld [vmem:[#allocation9_spill] sm:$0xff] }
 0x238   :  { %1945 = vmatpush1.bf16.msra.mxu0 %v6159_v63  ;;  %1986 = vmatpush1.bf16.msra.mxu1 %v6164_v0  ;;  %v7945_v63 = vld [vmem:[#allocation10_spill] sm:$0xff]  ;;  %v7946_v0 = vld [vmem:[#allocation11_spill] sm:$0xff] }
 0x239   :  { %1946 = vmatprep.subr.bf16.mxu0 %v6171_v2  ;;  %1987 = vmatprep.subr.bf16.mxu1 %v6176_v3  ;;  %v7947_v2 = vld [vmem:[#allocation12_spill] sm:$0xff]  ;;  %v7948_v3 = vld [vmem:[#allocation13_spill] sm:$0xff] }
 0x23c   :  { %1947 = vmatpush1.bf16.msra.mxu0 %v6183_v5  ;;  %1988 = vmatpush1.bf16.msra.mxu1 %v6188_v6  ;;  %v7949_v5 = vld [vmem:[#allocation14_spill] sm:$0xff]  ;;  %v7950_v6 = vld [vmem:[#allocation15_spill] sm:$0xff] }
 0x23d   :  { %1948 = vmatprep.subr.bf16.mxu0 %v6195_v7  ;;  %1989 = vmatprep.subr.bf16.mxu1 %v6200_v8  ;;  %v7951_v7 = vld [vmem:[#allocation16_spill] sm:$0xff]  ;;  %v7952_v8 = vld [vmem:[#allocation17_spill] sm:$0xff] }
 0x240   :  { %1949 = vmatpush1.bf16.msra.mxu0 %v6209_v9  ;;  %1990 = vmatpush1.bf16.msra.mxu1 %v6214_v10  ;;  %v7953_v9 = vld [vmem:[#allocation18_spill] sm:$0xff]  ;;  %v7954_v10 = vld [vmem:[#allocation19_spill] sm:$0xff] }
 0x241   :  { %1950 = vmatprep.subr.bf16.mxu0 %v6221_v11  ;;  %1991 = vmatprep.subr.bf16.mxu1 %v6226_v14  ;;  %v7955_v11 = vld [vmem:[#allocation20_spill] sm:$0xff]  ;;  %v7956_v14 = vld [vmem:[#allocation21_spill] sm:$0xff] }
 0x244   :  { %1951 = vmatpush1.bf16.msra.mxu0 %v6233_v17  ;;  %1992 = vmatpush1.bf16.msra.mxu1 %v6238_v18  ;;  %v7957_v17 = vld [vmem:[#allocation22_spill] sm:$0xff]  ;;  %v7958_v18 = vld [vmem:[#allocation23_spill] sm:$0xff] }
 0x245   :  { %1952 = vmatprep.subr.bf16.mxu0 %v6245_v19  ;;  %1993 = vmatprep.subr.bf16.mxu1 %v6250_v20  ;;  %v7959_v19 = vld [vmem:[#allocation24_spill] sm:$0xff]  ;;  %v7960_v20 = vld [vmem:[#allocation25_spill] sm:$0xff] }
 0x248   :  { %1953 = vmatpush1.bf16.msra.mxu0 %v6260_v22  ;;  %1994 = vmatpush1.bf16.msra.mxu1 %v6265_v23  ;;  %v7961_v22 = vld [vmem:[#allocation26_spill] sm:$0xff]  ;;  %v7962_v23 = vld [vmem:[#allocation27_spill] sm:$0xff] }
 0x249   :  { %1954 = vmatprep.subr.bf16.mxu0 %v6272_v24  ;;  %1995 = vmatprep.subr.bf16.mxu1 %v6277_v25  ;;  %v7963_v24 = vld [vmem:[#allocation28_spill] sm:$0xff]  ;;  %v7964_v25 = vld [vmem:[#allocation29_spill] sm:$0xff] }
 0x24a   :  { %8033 = vst [vmem:[#allocation28_spill] sm:$0xff] %v7237_v26 }
 0x24c   :  { %1955 = vmatpush1.bf16.msra.mxu0 %v6285_v27  ;;  %1996 = vmatpush1.bf16.msra.mxu1 %v6290_v28  ;;  %v7965_v27 = vld [vmem:[#allocation30_spill] sm:$0xff]  ;;  %v7966_v28 = vld [vmem:[#allocation31_spill] sm:$0xff] }
 0x24d   :  { %2276 = vmatprep.subr.bf16.mxu0 %v6297_v29  ;;  %2317 = vmatprep.subr.bf16.mxu1 %v6302_v30  ;;  %v7967_v29 = vld [vmem:[#allocation32_spill] sm:$0xff]  ;;  %v7968_v30 = vld [vmem:[#allocation33_spill] sm:$0xff] }
 0x24f   :  { %1973 = vmatmul.mubr.bf16.vlgmr.msra.gmra.mrb[28].mxu0 %v1747_v48  ;;  %2014 = vmatmul.mubr.bf16.vlgmr.msra.gmra.mrb[28].mxu1 %v1747_v48 }
 0x250   :  { %2277 = vmatpush1.bf16.msra.mxu0 %v6309_v32  ;;  %2318 = vmatpush1.bf16.msra.mxu1 %v6314_v33  ;;  %v7969_v32 = vld [vmem:[#allocation36_spill] sm:$0xff] }
 0x251   :  { %2278 = vmatprep.subr.bf16.mxu0 %v7940_v49  ;;  %2319 = vmatprep.subr.bf16.mxu1 %v7941_v56  ;;  %v802_v33 = vld [vmem:[%s7740_s11] sm:$0xf] }
 0x252   :  { %2308 = vmatprep.mubr.bf16.mxu0 %v7894_v21  ;;  %2349 = vmatprep.mubr.bf16.mxu1 %v7894_v21  ;;  %v6829_v4 = vrot.slane %v802_v33, %v7971_v41  ;;  %v6833_v55 = vrot.slane %v802_v33, %v7972_v54 }
 0x254   :  { %2279 = vmatpush1.bf16.msra.mxu0 %v7942_v57  ;;  %2320 = vmatpush1.bf16.msra.mxu1 %v7943_v59 }
 0x255   :  { %2280 = vmatprep.subr.bf16.mxu0 %v7944_v60  ;;  %2321 = vmatprep.subr.bf16.mxu1 %v7945_v63 }
 0x258   :  { %2281 = vmatpush1.bf16.msra.mxu0 %v7946_v0  ;;  %2322 = vmatpush1.bf16.msra.mxu1 %v7947_v2 }
 0x259   :  { %2282 = vmatprep.subr.bf16.mxu0 %v7948_v3  ;;  %2323 = vmatprep.subr.bf16.mxu1 %v7949_v5 }
 0x25c   :  { %2283 = vmatpush1.bf16.msra.mxu0 %v7950_v6  ;;  %2324 = vmatpush1.bf16.msra.mxu1 %v7951_v7  ;;  %v7976_v7 = vld [vmem:[#allocation4_spill] sm:$0xff] }
 0x25d   :  { %2284 = vmatprep.subr.bf16.mxu0 %v7952_v8  ;;  %2325 = vmatprep.subr.bf16.mxu1 %v7953_v9  ;;  %v7977_v9 = vld [vmem:[#allocation66_spill] sm:$0xff] }
 0x260   :  { %2285 = vmatpush1.bf16.msra.mxu0 %v7954_v10  ;;  %2326 = vmatpush1.bf16.msra.mxu1 %v7955_v11  ;;  %v7978_v11 = vld [vmem:[#allocation67_spill] sm:$0xff] }
 0x261   :  { %2286 = vmatprep.subr.bf16.mxu0 %v7956_v14  ;;  %2327 = vmatprep.subr.bf16.mxu1 %v7957_v17 }
 0x264   :  { %2287 = vmatpush1.bf16.msra.mxu0 %v7958_v18  ;;  %2328 = vmatpush1.bf16.msra.mxu1 %v7959_v19  ;;  %v7979_v19 = vld [vmem:[#allocation68_spill] sm:$0xff] }
 0x265   :  { %2288 = vmatprep.subr.bf16.mxu0 %v7960_v20  ;;  %2329 = vmatprep.subr.bf16.mxu1 %v7961_v22  ;;  %v7980_v22 = vld [vmem:[#allocation69_spill] sm:$0xff] }
 0x268   :  { %2289 = vmatpush1.bf16.msra.mxu0 %v7962_v23  ;;  %2330 = vmatpush1.bf16.msra.mxu1 %v7963_v24 }
 0x269   :  { %2290 = vmatprep.subr.bf16.mxu0 %v7964_v25  ;;  %2331 = vmatprep.subr.bf16.mxu1 %v7965_v27 }
 0x26c   :  { %2291 = vmatpush1.bf16.msra.mxu0 %v7966_v28  ;;  %2332 = vmatpush1.bf16.msra.mxu1 %v7967_v29 }
 0x26d   :  { %2518 = vmatprep.subr.bf16.mxu0 %v7968_v30  ;;  %2559 = vmatprep.subr.bf16.mxu1 %v7969_v32 }
 0x302   :  { %v1652_v53 = vpop.f32.mrb[24].mxu0  ;;  %v1693_v52 = vpop.f32.mrb[24].mxu1 }
 0x303   :  { %v1653_v36 = vadd.f32 %v1652_v53, %v6742_v61  ;;  %v1694_v37 = vadd.f32 %v1693_v52, %v6744_v47  ;;  %v1654_v34 = vpop.f32.mrb[25].mxu0  ;;  %v1695_v38 = vpop.f32.mrb[25].mxu1  ;;  %v7973_v61 = vsub.s32 2, %v7970_v44 }
 0x304   :  { %v1655_v35 = vadd.f32 %v1654_v34, %v6748_v1  ;;  %v1696_v39 = vadd.f32 %v1695_v38, %v6750_v58  ;;  %v1656_v31 = vpop.f32.mrb[26].mxu0  ;;  %v1697_v16 = vpop.f32.mrb[26].mxu1  ;;  %v7974_v1 = vsub.s32 3, %v7970_v44 }
 0x305   :  { %v1700_v51 = vadd.f32 %v1653_v36, %v6829_v4  ;;  %v1657_v45 = vpop.f32.mrb[27].mxu0  ;;  %v1698_v15 = vpop.f32.mrb[27].mxu1  ;;  %v6843_v47 = vrot.slane %v802_v33, %v7973_v61  ;;  %v7984_v31 = vld [vmem:[#allocation37_spill] sm:$0xff]  ;;  %v7985_v16 = vld [vmem:[#allocation38_spill] sm:$0xff] }
 0x306   :  { %v1701_v40 = vadd.f32 %v1655_v35, %v6833_v55  ;;  %v6847_v50 = vrot.slane %v802_v33, %v7974_v1  ;;  %v7982_v35 = vld [vmem:[#allocation34_spill] sm:$0xff]  ;;  %v7986_v45 = vld [vmem:[#allocation39_spill] sm:$0xff]  ;;  %v7987_v15 = vld [vmem:[#allocation40_spill] sm:$0xff]  ;;  %v1737_v1 = vmul.f32 %v6779_v42, %v6746_v12 }
 0x307   :  { %v4845_v62 = vmul.f32 -1.442695, %v1700_v51  ;;  %v1702_v58 = vadd.f32 %v1694_v37, %v6843_v47  ;;  %v7996_v12 = vld [vmem:[#allocation49_spill] sm:$0xff] }
 0x308   :  { %v4846_v13 = vmul.f32 -1.442695, %v1701_v40  ;;  %7975 = vst [vmem:[#allocation5_spill] sm:$0xff] %v6847_v50  ;;  %v1703_v46 = vadd.f32 %v1696_v39, %v6847_v50  ;;  %v7983_v39 = vld [vmem:[#allocation35_spill] sm:$0xff] }
 0x309   :  { %5661 = vpow2.f32 %v4845_v62  ;;  %v4847_v43 = vmul.f32 -1.442695, %v1702_v58  ;;  %v7988_v62 = vld [vmem:[#allocation41_spill] sm:$0xff] }
 0x30a   :  { %5663 = vpow2.f32 %v4846_v13  ;;  %v7989_v13 = vld [vmem:[#allocation42_spill] sm:$0xff] }
 0x30b   :  { %5665 = vtanh.f32 %v1703_v46 }
 0x30c   :  { %5667 = vpow2.f32 %v4847_v43 }
 0x313   :  { %v5662_v48 = vpop.eup %5661 }
 0x314   :  { %v1713_v49 = vadd.f32 1.0, %v5662_v48  ;;  %v5664_v56 = vpop.eup %5663  ;;  %v7990_v48 = vld [vmem:[#allocation43_spill] sm:$0xff] }
 0x315   :  { %v1714_v57 = vadd.f32 1.0, %v5664_v56  ;;  %v5666_v59 = vpop.eup %5665 }
 0x316   :  { %5669 = vrcp.f32 %v1713_v49  ;;  %v5668_v60 = vpop.eup %5667  ;;  %v7991_v49 = vld [vmem:[#allocation44_spill] sm:$0xff] }
 0x317   :  { %5671 = vrcp.f32 %v1714_v57  ;;  %v1715_v3 = vadd.f32 1.0, %v5668_v60  ;;  %v7992_v57 = vld [vmem:[#allocation45_spill] sm:$0xff] }
 0x319   :  { %5673 = vrcp.f32 %v1715_v3  ;;  %v7998_v3 = vld [vmem:[#allocation51_spill] sm:$0xff] }
 0x320   :  { %v5670_v63 = vpop.eup %5669 }
 0x321   :  { %v1724_v0 = vmul.f32 %v5670_v63, %v5666_v59  ;;  %v5672_v2 = vpop.eup %5671  ;;  %v7993_v59 = vld [vmem:[#allocation46_spill] sm:$0xff]  ;;  %v7994_v63 = vld [vmem:[#allocation47_spill] sm:$0xff] }
 0x322   :  { %v1974_v5 = vpop.f32.mrb[28].mxu0  ;;  %v2015_v6 = vpop.f32.mrb[28].mxu1  ;;  %v1723_v8 = vmul.f32 %v5672_v2, %v7976_v7  ;;  %v7997_v2 = vld [vmem:[#allocation50_spill] sm:$0xff]  ;;  %v8001_v7 = vld [vmem:[#allocation56_spill] sm:$0xff] }
 0x323   :  { %v2022_v10 = vadd.f32 %v1974_v5, %v7977_v9  ;;  %v2024_v14 = vadd.f32 %v2015_v6, %v7978_v11  ;;  %v1976_v17 = vpop.f32.mrb[29].mxu0  ;;  %v2017_v18 = vpop.f32.mrb[29].mxu1  ;;  %v7999_v5 = vld [vmem:[#allocation52_spill] sm:$0xff]  ;;  %v8000_v6 = vld [vmem:[#allocation54_spill] sm:$0xff]  ;;  %v8003_v9 = vld [vmem:[#allocation55_spill] sm:$0xff] }
 0x324   :  { %v2023_v20 = vadd.f32 %v1976_v17, %v7979_v19  ;;  %v2025_v23 = vadd.f32 %v2017_v18, %v7980_v22  ;;  %v1978_v24 = vpop.f32.mrb[30].mxu0  ;;  %v2019_v25 = vpop.f32.mrb[30].mxu1  ;;  %v6856_v27 = vadd.f32 %v1724_v0, %v1723_v8  ;;  %v7995_v0 = vld [vmem:[#allocation48_spill] sm:$0xff]  ;;  %v8002_v8 = vld [vmem:[#allocation53_spill] sm:$0xff]  ;;  %v8005_v11 = vld [vmem:[#allocation58_spill] sm:$0xff] }
 0x325   :  { %v4881_v28 = vmul.f32 -1.442695, %v2022_v10  ;;  %v1979_v29 = vpop.f32.mrb[31].mxu0  ;;  %v2020_v30 = vpop.f32.mrb[31].mxu1  ;;  %v4883_v44 = vmul.f32 -1.442695, %v2024_v14 }
 0x326   :  { %v4882_v32 = vmul.f32 -1.442695, %v2023_v20  ;;  %5675 = vtanh.f32 %v6856_v27  ;;  %v5674_v33 = vpop.eup %5673  ;;  %v8004_v10 = vld [vmem:[#allocation57_spill] sm:$0xff]  ;;  %v8006_v19 = vld [vmem:[#allocation59_spill] sm:$0xff]  ;;  %v8007_v20 = vld [vmem:[#allocation60_spill] sm:$0xff] }
 0x327   :  { %5677 = vpow2.f32 %v4881_v28  ;;  %v8008_v22 = vld [vmem:[#allocation61_spill] sm:$0xff]  ;;  %v6903_v24 = vld [vmem:[%s7733_s7 + $0x4] ss:$16 sps:$4 sm:$0xff]   ;;  %v8010_v28 = vld [vmem:[#allocation63_spill] sm:$0xff] }
 0x328   :  { %5679 = vpow2.f32 %v4882_v32  ;;  %v6908_v25 = vld [vmem:[%s7733_s7 + $0xc] ss:$16 sps:$4 sm:$0xff]   ;;  %v8011_v29 = vld [vmem:[#allocation64_spill] sm:$0xff]  ;;  %v6920_v32 = vld [vmem:[%s7733_s7 + $0x8] ss:$16 sps:$4 sm:$0xff]  }
 0x329   :  { %5681 = vtanh.f32 %v2025_v23  ;;  %v8009_v23 = vld [vmem:[#allocation62_spill] sm:$0xff] }
 0x32a   :  { %5683 = vpow2.f32 %v4883_v44  ;;  %v6915_v30 = vld [vmem:[%s7733_s7] ss:$16 sps:$4 sm:$0xff]   ;;  %v6929_v44 = vld [vmem:[%s7733_s7 + $0x24] ss:$16 sps:$4 sm:$0xff]  }
 0x330   :  { %v5676_v41 = vpop.eup %5675 }
 0x331   :  { %v5678_v53 = vpop.eup %5677  ;;  %v6859_v52 = vmul.f32 %v5676_v41, %v5674_v33  ;;  %v6934_v41 = vld [vmem:[%s7733_s7 + $0x2c] ss:$16 sps:$4 sm:$0xff]  }
 0x332   :  { %v2035_v54 = vadd.f32 1.0, %v5678_v53  ;;  %v5680_v36 = vpop.eup %5679  ;;  %v6941_v53 = vld [vmem:[%s7733_s7 + $0x20] ss:$16 sps:$4 sm:$0xff]  }
 0x333   :  { %7981 = vst [vmem:[#allocation6_spill] sm:$0xff] %v6859_v52  ;;  %v1738_v37 = vmul.f32 %v6779_v42, %v6859_v52  ;;  %v2036_v34 = vadd.f32 1.0, %v5680_v36  ;;  %v5682_v51 = vpop.eup %5681  ;;  %v6953_v36 = vld [vmem:[%s7733_s7 + $0x44] ss:$16 sps:$4 sm:$0xff]   ;;  %v7232_v52 = vld [vmem:[%s7735_s10 + $0xac] ss:$16 sps:$4 sm:$0xff]  }
 0x334   :  { %5685 = vrcp.f32 %v2035_v54  ;;  %v5684_v40 = vpop.eup %5683  ;;  %v6946_v54 = vld [vmem:[%s7733_s7 + $0x28] ss:$16 sps:$4 sm:$0xff]   ;;  %8032 = vst [vmem:[#allocation27_spill] sm:$0xff] %v7232_v52 }
 0x335   :  { %v2083_v38 = vpack.c.bf16 %v1738_v37, %v1738_v37  ;;  %5687 = vrcp.f32 %v2036_v34  ;;  %v2037_v43 = vadd.f32 1.0, %v5684_v40  ;;  %v6958_v37 = vld [vmem:[%s7733_s7 + $0x4c] ss:$16 sps:$4 sm:$0xff]   ;;  %v6967_v34 = vld [vmem:[%s7733_s7 + $0x40] ss:$16 sps:$4 sm:$0xff]  }
 0x336   :  { %v7020_v40 = vld [vmem:[%s7733_s7 + $0x88] ss:$16 sps:$4 sm:$0xff]  }
 0x337   :  { %2309 = vmatmul.mubr.bf16.vlgmr.msra.gmra.mrb[32].mxu0 %v2083_v38  ;;  %2350 = vmatmul.mubr.bf16.vlgmr.msra.gmra.mrb[32].mxu1 %v2083_v38  ;;  %5689 = vrcp.f32 %v2037_v43  ;;  %v6972_v38 = vld [vmem:[%s7733_s7 + $0x48] ss:$16 sps:$4 sm:$0xff]   ;;  %v7063_v43 = vld [vmem:[%s7733_s7 + $0xc0] ss:$16 sps:$4 sm:$0xff]  }
 0x338   :  { %2519 = vmatpush1.bf16.msra.mxu0 %v7982_v35  ;;  %2560 = vmatpush1.bf16.msra.mxu1 %v7983_v39  ;;  %v6979_v35 = vld [vmem:[%s7733_s7 + $0x64] ss:$16 sps:$4 sm:$0xff]   ;;  %v6984_v39 = vld [vmem:[%s7733_s7 + $0x6c] ss:$16 sps:$4 sm:$0xff]  }
 0x339   :  { %2520 = vmatprep.subr.bf16.mxu0 %v7984_v31  ;;  %2561 = vmatprep.subr.bf16.mxu1 %v7985_v16  ;;  %v6991_v31 = vld [vmem:[%s7733_s7 + $0x60] ss:$16 sps:$4 sm:$0xff]   ;;  %v6996_v16 = vld [vmem:[%s7733_s7 + $0x68] ss:$16 sps:$4 sm:$0xff]  }
 0x33a   :  { %2550 = vmatprep.mubr.bf16.mxu0 %v7894_v21  ;;  %2591 = vmatprep.mubr.bf16.mxu1 %v7894_v21 }
 0x33c   :  { %2521 = vmatpush1.bf16.msra.mxu0 %v7986_v45  ;;  %2562 = vmatpush1.bf16.msra.mxu1 %v7987_v15  ;;  %v7008_v45 = vld [vmem:[%s7733_s7 + $0x8c] ss:$16 sps:$4 sm:$0xff]   ;;  %v7015_v15 = vld [vmem:[%s7733_s7 + $0x80] ss:$16 sps:$4 sm:$0xff]  }
 0x33d   :  { %2522 = vmatprep.subr.bf16.mxu0 %v7988_v62  ;;  %2563 = vmatprep.subr.bf16.mxu1 %v7989_v13  ;;  %v7027_v62 = vld [vmem:[%s7733_s7 + $0xa4] ss:$16 sps:$4 sm:$0xff]   ;;  %v7032_v13 = vld [vmem:[%s7733_s7 + $0xac] ss:$16 sps:$4 sm:$0xff]  }
 0x33e   :  { %v5686_v61 = vpop.eup %5685 }
 0x33f   :  { %v2046_v58 = vmul.f32 %v5686_v61, %v5682_v51  ;;  %v5688_v46 = vpop.eup %5687  ;;  %v7003_v51 = vld [vmem:[%s7733_s7 + $0x84] ss:$16 sps:$4 sm:$0xff]   ;;  %v7039_v61 = vld [vmem:[%s7733_s7 + $0xa0] ss:$16 sps:$4 sm:$0xff]  }
 0x340   :  { %2523 = vmatpush1.bf16.msra.mxu0 %v7990_v48  ;;  %2564 = vmatpush1.bf16.msra.mxu1 %v7991_v49  ;;  %v2045_v56 = vmul.f32 %v5688_v46, %v1737_v1  ;;  %v7044_v1 = vld [vmem:[%s7733_s7 + $0xa8] ss:$16 sps:$4 sm:$0xff]   ;;  %v7056_v46 = vld [vmem:[%s7733_s7 + $0xcc] ss:$16 sps:$4 sm:$0xff]   ;;  %v7075_v49 = vld [vmem:[%s7733_s7 + $0xe4] ss:$16 sps:$4 sm:$0xff]  }
 0x341   :  { %2524 = vmatprep.subr.bf16.mxu0 %v7992_v57  ;;  %2565 = vmatprep.subr.bf16.mxu1 %v7993_v59  ;;  %v5690_v14 = vpop.eup %5689  ;;  %v7068_v48 = vld [vmem:[%s7733_s7 + $0xc8] ss:$16 sps:$4 sm:$0xff]   ;;  %v7082_v57 = vpop.permute.xlu1 %2634  ;;  %v7089_v59 = vld [vmem:[%s7733_s7 + $0xe0] ss:$16 sps:$4 sm:$0xff]  }
 0x342   :  { %v6879_v60 = vadd.f32 %v2046_v58, %v2045_v56  ;;  %v7051_v58 = vld [vmem:[%s7733_s7 + $0xc4] ss:$16 sps:$4 sm:$0xff]   ;;  %v7080_v56 = vld [vmem:[%s7733_s7 + $0xec] ss:$16 sps:$4 sm:$0xff]  }
 0x344   :  { %2525 = vmatpush1.bf16.msra.mxu0 %v7994_v63  ;;  %2566 = vmatpush1.bf16.msra.mxu1 %v7995_v0  ;;  %5691 = vtanh.f32 %v6879_v60  ;;  %v7094_v63 = vld [vmem:[%s7733_s7 + $0xe8] ss:$16 sps:$4 sm:$0xff]  }
 0x345   :  { %2526 = vmatprep.subr.bf16.mxu0 %v7996_v12  ;;  %2567 = vmatprep.subr.bf16.mxu1 %v7997_v2  ;;  %v7107_v2 = vld [vmem:[%s7735_s10 + $0x4] ss:$16 sps:$4 sm:$0xff]  }
 0x348   :  { %2527 = vmatpush1.bf16.msra.mxu0 %v7998_v3  ;;  %2568 = vmatpush1.bf16.msra.mxu1 %v7999_v5  ;;  %v7112_v3 = vld [vmem:[%s7735_s10 + $0xc] ss:$16 sps:$4 sm:$0xff]   ;;  %v7117_v5 = vld [vmem:[%s7735_s10] ss:$16 sps:$4 sm:$0xff]  }
 0x349   :  { %2528 = vmatprep.subr.bf16.mxu0 %v8000_v6  ;;  %2569 = vmatprep.subr.bf16.mxu1 %v8001_v7  ;;  %8012 = vst [vmem:[#allocation7_spill] sm:$0xff] %v7112_v3  ;;  %8013 = vst [vmem:[#allocation8_spill] sm:$0xff] %v7117_v5  ;;  %v7122_v6 = vld [vmem:[%s7735_s10 + $0x8] ss:$16 sps:$4 sm:$0xff]   ;;  %v7131_v7 = vld [vmem:[%s7735_s10 + $0x24] ss:$16 sps:$4 sm:$0xff]  }
 0x34a   :  { %8014 = vst [vmem:[#allocation9_spill] sm:$0xff] %v7122_v6  ;;  %8015 = vst [vmem:[#allocation10_spill] sm:$0xff] %v7131_v7 }
 0x34c   :  { %2529 = vmatpush1.bf16.msra.mxu0 %v8002_v8  ;;  %2570 = vmatpush1.bf16.msra.mxu1 %v8003_v9  ;;  %v7136_v8 = vld [vmem:[%s7735_s10 + $0x2c] ss:$16 sps:$4 sm:$0xff]   ;;  %v7141_v9 = vld [vmem:[%s7735_s10 + $0x20] ss:$16 sps:$4 sm:$0xff]  }
 0x34d   :  { %2530 = vmatprep.subr.bf16.mxu0 %v8004_v10  ;;  %2571 = vmatprep.subr.bf16.mxu1 %v8005_v11  ;;  %8016 = vst [vmem:[#allocation11_spill] sm:$0xff] %v7136_v8  ;;  %8017 = vst [vmem:[#allocation12_spill] sm:$0xff] %v7141_v9  ;;  %v7146_v10 = vld [vmem:[%s7735_s10 + $0x28] ss:$16 sps:$4 sm:$0xff]   ;;  %v7155_v11 = vld [vmem:[%s7735_s10 + $0x44] ss:$16 sps:$4 sm:$0xff]  }
 0x34e   :  { %v5692_v17 = vpop.eup %5691  ;;  %8018 = vst [vmem:[#allocation13_spill] sm:$0xff] %v7146_v10  ;;  %8019 = vst [vmem:[#allocation14_spill] sm:$0xff] %v7155_v11 }
 0x34f   :  { %v6894_v18 = vmul.f32 %v5692_v17, %v5690_v14  ;;  %v7160_v14 = vld [vmem:[%s7735_s10 + $0x4c] ss:$16 sps:$4 sm:$0xff]   ;;  %v7165_v17 = vld [vmem:[%s7735_s10 + $0x40] ss:$16 sps:$4 sm:$0xff]  }
 0x350   :  { %2531 = vmatpush1.bf16.msra.mxu0 %v8006_v19  ;;  %2572 = vmatpush1.bf16.msra.mxu1 %v8007_v20  ;;  %8020 = vst [vmem:[#allocation15_spill] sm:$0xff] %v7160_v14  ;;  %8021 = vst [vmem:[#allocation16_spill] sm:$0xff] %v7165_v17  ;;  %v7179_v19 = vld [vmem:[%s7735_s10 + $0x64] ss:$16 sps:$4 sm:$0xff]   ;;  %v7184_v20 = vld [vmem:[%s7735_s10 + $0x6c] ss:$16 sps:$4 sm:$0xff]  }
 0x351   :  { %2532 = vmatprep.subr.bf16.mxu0 %v8008_v22  ;;  %2573 = vmatprep.subr.bf16.mxu1 %v8009_v23  ;;  %v2050_v33 = vpack.c.bf16 %v6894_v18, %v6894_v18  ;;  %v2637_v0 = vmul.f32 %v7082_v57, %v6894_v18  ;;  %v7170_v18 = vld [vmem:[%s7735_s10 + $0x48] ss:$16 sps:$4 sm:$0xff]   ;;  %8023 = vst [vmem:[#allocation18_spill] sm:$0xff] %v7179_v19  ;;  %8024 = vst [vmem:[#allocation19_spill] sm:$0xff] %v7184_v20  ;;  %v7189_v22 = vld [vmem:[%s7735_s10 + $0x60] ss:$16 sps:$4 sm:$0xff]  }
 0x352   :  { %8022 = vst [vmem:[#allocation17_spill] sm:$0xff] %v7170_v18  ;;  %8025 = vst [vmem:[#allocation20_spill] sm:$0xff] %v7189_v22  ;;  %v7194_v23 = vld [vmem:[%s7735_s10 + $0x68] ss:$16 sps:$4 sm:$0xff]  }
 0x353   :  { %v2648_v12 = vpack.c.bf16 %v2637_v0, %v2637_v0  ;;  %8026 = vst [vmem:[#allocation21_spill] sm:$0xff] %v7194_v23  ;;  %v7218_v0 = vld [vmem:[%s7735_s10 + $0x88] ss:$16 sps:$4 sm:$0xff]  }
 0x354   :  { %2533 = vmatpush1.bf16.msra.mxu0 %v8010_v28  ;;  %2574 = vmatpush1.bf16.msra.mxu1 %v8011_v29  ;;  %v7203_v28 = vld [vmem:[%s7735_s10 + $0x84] ss:$16 sps:$4 sm:$0xff]   ;;  %v7208_v29 = vld [vmem:[%s7735_s10 + $0x8c] ss:$16 sps:$4 sm:$0xff]   ;;  %8030 = vst [vmem:[#allocation25_spill] sm:$0xff] %v7218_v0 }
 0x355   :  { %2841 = vmatprep.subr.bf16.mxu0 %v6903_v24  ;;  %2882 = vmatprep.subr.bf16.mxu1 %v6908_v25  ;;  %8027 = vst [vmem:[#allocation22_spill] sm:$0xff] %v7203_v28  ;;  %8028 = vst [vmem:[#allocation23_spill] sm:$0xff] %v7208_v29 }
 0x357   :  { %2551 = vmatmul.mubr.bf16.vlgmr.msra.gmra.mrb[36].mxu0 %v2050_v33  ;;  %2592 = vmatmul.mubr.bf16.vlgmr.msra.gmra.mrb[36].mxu1 %v2050_v33  ;;  %v7213_v33 = vld [vmem:[%s7735_s10 + $0x80] ss:$16 sps:$4 sm:$0xff]  }
 0x358   :  { %2842 = vmatpush1.bf16.msra.mxu0 %v6915_v30  ;;  %2883 = vmatpush1.bf16.msra.mxu1 %v6920_v32  ;;  %8029 = vst [vmem:[#allocation24_spill] sm:$0xff] %v7213_v33 }
 0x359   :  { %2843 = vmatprep.subr.bf16.mxu0 %v6929_v44  ;;  %2884 = vmatprep.subr.bf16.mxu1 %v6934_v41 }
 0x35a   :  { %2873 = vmatprep.mubr.bf16.mxu0 %v7894_v21  ;;  %2914 = vmatprep.mubr.bf16.mxu1 %v7894_v21 }
 0x35c   :  { %2844 = vmatpush1.bf16.msra.mxu0 %v6941_v53  ;;  %2885 = vmatpush1.bf16.msra.mxu1 %v6946_v54 }
 0x35d   :  { %2845 = vmatprep.subr.bf16.mxu0 %v6953_v36  ;;  %2886 = vmatprep.subr.bf16.mxu1 %v6958_v37 }
 0x360   :  { %2846 = vmatpush1.bf16.msra.mxu0 %v6967_v34  ;;  %2887 = vmatpush1.bf16.msra.mxu1 %v6972_v38 }
 0x361   :  { %2847 = vmatprep.subr.bf16.mxu0 %v6979_v35  ;;  %2888 = vmatprep.subr.bf16.mxu1 %v6984_v39 }
 0x364   :  { %2848 = vmatpush1.bf16.msra.mxu0 %v6991_v31  ;;  %2889 = vmatpush1.bf16.msra.mxu1 %v6996_v16 }
 0x365   :  { %2849 = vmatprep.subr.bf16.mxu0 %v7003_v51  ;;  %2890 = vmatprep.subr.bf16.mxu1 %v7008_v45 }
 0x368   :  { %2850 = vmatpush1.bf16.msra.mxu0 %v7015_v15  ;;  %2891 = vmatpush1.bf16.msra.mxu1 %v7020_v40 }
 0x369   :  { %2851 = vmatprep.subr.bf16.mxu0 %v7027_v62  ;;  %2892 = vmatprep.subr.bf16.mxu1 %v7032_v13 }
 0x36c   :  { %2852 = vmatpush1.bf16.msra.mxu0 %v7039_v61  ;;  %2893 = vmatpush1.bf16.msra.mxu1 %v7044_v1 }
 0x36d   :  { %2853 = vmatprep.subr.bf16.mxu0 %v7051_v58  ;;  %2894 = vmatprep.subr.bf16.mxu1 %v7056_v46 }
 0x370   :  { %2854 = vmatpush1.bf16.msra.mxu0 %v7063_v43  ;;  %2895 = vmatpush1.bf16.msra.mxu1 %v7068_v48 }
 0x371   :  { %2855 = vmatprep.subr.bf16.mxu0 %v7075_v49  ;;  %2896 = vmatprep.subr.bf16.mxu1 %v7080_v56 }
 0x374   :  { %2856 = vmatpush1.bf16.msra.mxu0 %v7089_v59  ;;  %2897 = vmatpush1.bf16.msra.mxu1 %v7094_v63 }
 0x375   :  { %3177 = vmatprep.subr.bf16.mxu0 %v7107_v2  ;;  %3218 = vmatprep.subr.bf16.mxu1 %v7112_v3 }
 0x377   :  { %2874 = vmatmul.mubr.bf16.vlgmr.msra.gmra.mrb[40].mxu0 %v2648_v12  ;;  %2915 = vmatmul.mubr.bf16.vlgmr.msra.gmra.mrb[40].mxu1 %v2648_v12  ;;  %v7227_v12 = vld [vmem:[%s7735_s10 + $0xa4] ss:$16 sps:$4 sm:$0xff]  }
 0x378   :  { %3209 = vmatprep.mubr.bf16.mxu0 %v7894_v21  ;;  %3250 = vmatprep.mubr.bf16.mxu1 %v7894_v21  ;;  %8031 = vst [vmem:[#allocation26_spill] sm:$0xff] %v7227_v12 }
 0x379   :  { %3178 = vmatpush1.bf16.msra.mxu0 %v7117_v5  ;;  %3219 = vmatpush1.bf16.msra.mxu1 %v7122_v6 }
 0x37a   :  { %3179 = vmatprep.subr.bf16.mxu0 %v7131_v7  ;;  %3220 = vmatprep.subr.bf16.mxu1 %v7136_v8 }
 0x37d   :  { %3180 = vmatpush1.bf16.msra.mxu0 %v7141_v9  ;;  %3221 = vmatpush1.bf16.msra.mxu1 %v7146_v10 }
 0x37e   :  { %3181 = vmatprep.subr.bf16.mxu0 %v7155_v11  ;;  %3222 = vmatprep.subr.bf16.mxu1 %v7160_v14 }
 0x381   :  { %3182 = vmatpush1.bf16.msra.mxu0 %v7165_v17  ;;  %3223 = vmatpush1.bf16.msra.mxu1 %v7170_v18 }
 0x382   :  { %3183 = vmatprep.subr.bf16.mxu0 %v7179_v19  ;;  %3224 = vmatprep.subr.bf16.mxu1 %v7184_v20 }
 0x385   :  { %3184 = vmatpush1.bf16.msra.mxu0 %v7189_v22  ;;  %3225 = vmatpush1.bf16.msra.mxu1 %v7194_v23 }
 0x386   :  { %3185 = vmatprep.subr.bf16.mxu0 %v7203_v28  ;;  %3226 = vmatprep.subr.bf16.mxu1 %v7208_v29  ;;  %v7256_v29 = vld [vmem:[%s7735_s10 + $0xcc] ss:$16 sps:$4 sm:$0xff]  }
 0x387   :  { %8036 = vst [vmem:[#allocation31_spill] sm:$0xff] %v7256_v29 }
 0x389   :  { %3186 = vmatpush1.bf16.msra.mxu0 %v7213_v33  ;;  %3227 = vmatpush1.bf16.msra.mxu1 %v7218_v0  ;;  %v7242_v33 = vld [vmem:[%s7735_s10 + $0xa8] ss:$16 sps:$4 sm:$0xff]   ;;  %v7251_v0 = vld [vmem:[%s7735_s10 + $0xc4] ss:$16 sps:$4 sm:$0xff]  }
 0x38a   :  { %8034 = vst [vmem:[#allocation29_spill] sm:$0xff] %v7242_v33  ;;  %3187 = vmatprep.subr.bf16.mxu0 %v7227_v12  ;;  %3228 = vmatprep.subr.bf16.mxu1 %v7232_v52  ;;  %8035 = vst [vmem:[#allocation30_spill] sm:$0xff] %v7251_v0  ;;  %v7261_v12 = vld [vmem:[%s7735_s10 + $0xc0] ss:$16 sps:$4 sm:$0xff]   ;;  %v7280_v52 = vld [vmem:[%s7735_s10 + $0xec] ss:$16 sps:$4 sm:$0xff]  }
 0x38b   :  { %8037 = vst [vmem:[#allocation32_spill] sm:$0xff] %v7261_v12  ;;  %8040 = vst [vmem:[#allocation65_spill] sm:$0xff] %v7280_v52 }
 0x38d   :  { %3188 = vmatpush1.bf16.msra.mxu0 %v7237_v26  ;;  %3229 = vmatpush1.bf16.msra.mxu1 %v7242_v33  ;;  %v7266_v26 = vld [vmem:[%s7735_s10 + $0xc8] ss:$16 sps:$4 sm:$0xff]   ;;  %v7275_v33 = vld [vmem:[%s7735_s10 + $0xe4] ss:$16 sps:$4 sm:$0xff]  }
 0x38e   :  { %8038 = vst [vmem:[#allocation33_spill] sm:$0xff] %v7266_v26  ;;  %3189 = vmatprep.subr.bf16.mxu0 %v7251_v0  ;;  %3230 = vmatprep.subr.bf16.mxu1 %v7256_v29  ;;  %8039 = vst [vmem:[#allocation36_spill] sm:$0xff] %v7275_v33  ;;  %v7285_v0 = vld [vmem:[%s7735_s10 + $0xe0] ss:$16 sps:$4 sm:$0xff]   ;;  %v7304_v29 = vld [vmem:[%s7738_s9 + $0xc] ss:$16 sps:$4 sm:$0xff]  }
 0x38f   :  { %8041 = vst [vmem:[#allocation4_spill] sm:$0xff] %v7285_v0  ;;  %8044 = vst [vmem:[#allocation68_spill] sm:$0xff] %v7304_v29 }
 0x391   :  { %3190 = vmatpush1.bf16.msra.mxu0 %v7261_v12  ;;  %3231 = vmatpush1.bf16.msra.mxu1 %v7266_v26  ;;  %v7290_v12 = vld [vmem:[%s7735_s10 + $0xe8] ss:$16 sps:$4 sm:$0xff]   ;;  %v7299_v26 = vld [vmem:[%s7738_s9 + $0x4] ss:$16 sps:$4 sm:$0xff]  }
 0x392   :  { %8042 = vst [vmem:[#allocation66_spill] sm:$0xff] %v7290_v12  ;;  %3191 = vmatprep.subr.bf16.mxu0 %v7275_v33  ;;  %3232 = vmatprep.subr.bf16.mxu1 %v7280_v52  ;;  %8043 = vst [vmem:[#allocation67_spill] sm:$0xff] %v7299_v26 }
 0x395   :  { %3192 = vmatpush1.bf16.msra.mxu0 %v7285_v0  ;;  %3233 = vmatpush1.bf16.msra.mxu1 %v7290_v12 }
 0x396   :  { %3419 = vmatprep.subr.bf16.mxu0 %v7299_v26  ;;  %3460 = vmatprep.subr.bf16.mxu1 %v7304_v29 }
 0x40a   :  { %v2310_v33 = vpop.f32.mrb[32].mxu0  ;;  %v2351_v52 = vpop.f32.mrb[32].mxu1 }
 0x40b   :  { %v2312_v28 = vpop.f32.mrb[33].mxu0  ;;  %v2353_v0 = vpop.f32.mrb[33].mxu1 }
 0x40c   :  { %v2314_v23 = vpop.f32.mrb[34].mxu0  ;;  %v2355_v12 = vpop.f32.mrb[34].mxu1 }
 0x40d   :  { %v2315_v22 = vpop.f32.mrb[35].mxu0  ;;  %v2356_v20 = vpop.f32.mrb[35].mxu1 }
 0x42a   :  { %v2552_v19 = vpop.f32.mrb[36].mxu0  ;;  %v2593_v18 = vpop.f32.mrb[36].mxu1 }
 0x42b   :  { %v2553_v17 = vadd.f32 %v2552_v19, %v2310_v33  ;;  %v2594_v14 = vadd.f32 %v2593_v18, %v2351_v52  ;;  %v2554_v11 = vpop.f32.mrb[37].mxu0  ;;  %v2595_v10 = vpop.f32.mrb[37].mxu1 }
 0x42c   :  { %v2555_v9 = vadd.f32 %v2554_v11, %v2312_v28  ;;  %v2596_v8 = vadd.f32 %v2595_v10, %v2353_v0  ;;  %v2556_v7 = vpop.f32.mrb[38].mxu0  ;;  %v2597_v26 = vpop.f32.mrb[38].mxu1  ;;  %v8046_v0 = vld [vmem:[#allocation71_spill] sm:$0xff] }
 0x42d   :  { %v2600_v29 = vadd.f32 %v2553_v17, %v6829_v4  ;;  %v2557_v6 = vpop.f32.mrb[39].mxu0  ;;  %v2598_v5 = vpop.f32.mrb[39].mxu1  ;;  %v2602_v20 = vadd.f32 %v2594_v14, %v6843_v47 }
 0x42e   :  { %v2601_v3 = vadd.f32 %v2555_v9, %v6833_v55  ;;  %v2603_v52 = vadd.f32 %v2596_v8, %v6847_v50 }
 0x42f   :  { %v4948_v23 = vmul.f32 -1.442695, %v2600_v29  ;;  %v4950_v18 = vmul.f32 -1.442695, %v2602_v20  ;;  %v8045_v29 = vld [vmem:[#allocation70_spill] sm:$0xff] }
 0x430   :  { %v4949_v12 = vmul.f32 -1.442695, %v2601_v3  ;;  %v1739_v3 = vmul.f32 %v6779_v42, %v6856_v27 }
 0x431   :  { %5693 = vpow2.f32 %v4948_v23 }
 0x432   :  { %5695 = vpow2.f32 %v4949_v12 }
 0x433   :  { %5697 = vtanh.f32 %v2603_v52  ;;  %v8047_v52 = vld [vmem:[#allocation72_spill] sm:$0xff] }
 0x434   :  { %5699 = vpow2.f32 %v4950_v18 }
 0x43b   :  { %v5694_v19 = vpop.eup %5693 }
 0x43c   :  { %v2613_v11 = vadd.f32 1.0, %v5694_v19  ;;  %v5696_v7 = vpop.eup %5695  ;;  %v8048_v19 = vld [vmem:[#allocation73_spill] sm:$0xff] }
 0x43d   :  { %v2614_v26 = vadd.f32 1.0, %v5696_v7  ;;  %v5698_v5 = vpop.eup %5697 }
 0x43e   :  { %5701 = vrcp.f32 %v2613_v11  ;;  %v5700_v6 = vpop.eup %5699 }
 0x43f   :  { %5703 = vrcp.f32 %v2614_v26  ;;  %v2615_v14 = vadd.f32 1.0, %v5700_v6 }
 0x441   :  { %5705 = vrcp.f32 %v2615_v14 }
 0x448   :  { %v5702_v9 = vpop.eup %5701 }
 0x449   :  { %v2624_v10 = vmul.f32 %v5702_v9, %v5698_v5  ;;  %v5704_v17 = vpop.eup %5703 }
 0x44a   :  { %v2875_v22 = vpop.f32.mrb[40].mxu0  ;;  %v2916_v8 = vpop.f32.mrb[40].mxu1  ;;  %v2623_v28 = vmul.f32 %v5704_v17, %v1739_v3 }
 0x44b   :  { %v2923_v33 = vadd.f32 %v2875_v22, %v8045_v29  ;;  %v2925_v23 = vadd.f32 %v2916_v8, %v8046_v0  ;;  %v2877_v12 = vpop.f32.mrb[41].mxu0  ;;  %v2918_v20 = vpop.f32.mrb[41].mxu1 }
 0x44c   :  { %v2924_v18 = vadd.f32 %v2877_v12, %v8047_v52  ;;  %v2926_v11 = vadd.f32 %v2918_v20, %v8048_v19  ;;  %v2879_v7 = vpop.f32.mrb[42].mxu0  ;;  %v2920_v26 = vpop.f32.mrb[42].mxu1  ;;  %v7318_v50 = vadd.f32 %v2624_v10, %v2623_v28  ;;  %v7328_v28 = vld [vmem:[%s7738_s9] ss:$16 sps:$4 sm:$0xff]   ;;  %v7338_v12 = vld [vmem:[%s7738_s9 + $0x24] ss:$16 sps:$4 sm:$0xff]  }
 0x44d   :  { %v4984_v42 = vmul.f32 -1.442695, %v2923_v33  ;;  %v2880_v27 = vpop.f32.mrb[43].mxu0  ;;  %v2921_v5 = vpop.f32.mrb[43].mxu1  ;;  %v4986_v3 = vmul.f32 -1.442695, %v2925_v23 }
 0x44e   :  { %v4985_v6 = vmul.f32 -1.442695, %v2924_v18  ;;  %5707 = vtanh.f32 %v7318_v50  ;;  %v5706_v9 = vpop.eup %5705  ;;  %v7333_v33 = vld [vmem:[%s7738_s9 + $0x8] ss:$16 sps:$4 sm:$0xff]   ;;  %v7343_v20 = vld [vmem:[%s7738_s9 + $0x2c] ss:$16 sps:$4 sm:$0xff]  }
 0x44f   :  { %5709 = vpow2.f32 %v4984_v42  ;;  %v7350_v52 = vld [vmem:[%s7738_s9 + $0x20] ss:$16 sps:$4 sm:$0xff]   ;;  %v7355_v18 = vld [vmem:[%s7738_s9 + $0x28] ss:$16 sps:$4 sm:$0xff]   ;;  %v7362_v19 = vld [vmem:[%s7738_s9 + $0x44] ss:$16 sps:$4 sm:$0xff]  }
 0x450   :  { %5711 = vpow2.f32 %v4985_v6  ;;  %v7376_v26 = vld [vmem:[%s7738_s9 + $0x40] ss:$16 sps:$4 sm:$0xff]   ;;  %v7381_v42 = vld [vmem:[%s7738_s9 + $0x48] ss:$16 sps:$4 sm:$0xff]   ;;  %v7388_v5 = vld [vmem:[%s7738_s9 + $0x64] ss:$16 sps:$4 sm:$0xff]  }
 0x451   :  { %5713 = vtanh.f32 %v2926_v11  ;;  %v7367_v11 = vld [vmem:[%s7738_s9 + $0x4c] ss:$16 sps:$4 sm:$0xff]  }
 0x452   :  { %5715 = vpow2.f32 %v4986_v3  ;;  %v7393_v6 = vld [vmem:[%s7738_s9 + $0x6c] ss:$16 sps:$4 sm:$0xff]   ;;  %v2638_v3 = vmul.f32 %v7082_v57, %v6879_v60  ;;  %v7414_v60 = vld [vmem:[%s7738_s9 + $0x84] ss:$16 sps:$4 sm:$0xff]  }
 0x458   :  { %v5708_v17 = vpop.eup %5707 }
 0x459   :  { %v5710_v22 = vpop.eup %5709  ;;  %v7321_v8 = vmul.f32 %v5708_v17, %v5706_v9 }
 0x45a   :  { %v2936_v29 = vadd.f32 1.0, %v5710_v22  ;;  %v5712_v0 = vpop.eup %5711 }
 0x45b   :  { %8049 = vst [vmem:[#allocation69_spill] sm:$0xff] %v7321_v8  ;;  %v2639_v10 = vmul.f32 %v7082_v57, %v7321_v8  ;;  %v2937_v14 = vadd.f32 1.0, %v5712_v0  ;;  %v5714_v7 = vpop.eup %5713  ;;  %v7402_v0 = vld [vmem:[%s7738_s9 + $0x60] ss:$16 sps:$4 sm:$0xff]   ;;  %v7470_v8 = vld [vmem:[%s7738_s9 + $0xcc] ss:$16 sps:$4 sm:$0xff]  }
 0x45c   :  { %5717 = vrcp.f32 %v2936_v29  ;;  %v5716_v27 = vpop.eup %5715  ;;  %8058 = vst [vmem:[#allocation43_spill] sm:$0xff] %v7470_v8 }
 0x45d   :  { %v2984_v23 = vpack.c.bf16 %v2639_v10, %v2639_v10  ;;  %5719 = vrcp.f32 %v2937_v14  ;;  %v2938_v29 = vadd.f32 1.0, %v5716_v27  ;;  %v7407_v10 = vld [vmem:[%s7738_s9 + $0x68] ss:$16 sps:$4 sm:$0xff]   ;;  %v7428_v27 = vld [vmem:[%s7738_s9 + $0x80] ss:$16 sps:$4 sm:$0xff]  }
 0x45e   :  { %8051 = vst [vmem:[#allocation35_spill] sm:$0xff] %v7428_v27 }
 0x45f   :  { %3210 = vmatmul.mubr.bf16.vlgmr.msra.gmra.mrb[44].mxu0 %v2984_v23  ;;  %3251 = vmatmul.mubr.bf16.vlgmr.msra.gmra.mrb[44].mxu1 %v2984_v23  ;;  %v7419_v23 = vld [vmem:[%s7738_s9 + $0x8c] ss:$16 sps:$4 sm:$0xff]   ;;  %5721 = vrcp.f32 %v2938_v29  ;;  %v7458_v29 = vld [vmem:[%s7738_s9 + $0xa8] ss:$16 sps:$4 sm:$0xff]  }
 0x460   :  { %3420 = vmatpush1.bf16.msra.mxu0 %v7328_v28  ;;  %3461 = vmatpush1.bf16.msra.mxu1 %v7333_v33  ;;  %8050 = vst [vmem:[#allocation34_spill] sm:$0xff] %v7419_v23  ;;  %8056 = vst [vmem:[#allocation41_spill] sm:$0xff] %v7458_v29 }
 0x461   :  { %3421 = vmatprep.subr.bf16.mxu0 %v7338_v12  ;;  %3462 = vmatprep.subr.bf16.mxu1 %v7343_v20 }
 0x462   :  { %3451 = vmatprep.mubr.bf16.mxu0 %v7894_v21  ;;  %3492 = vmatprep.mubr.bf16.mxu1 %v7894_v21 }
 0x464   :  { %3422 = vmatpush1.bf16.msra.mxu0 %v7350_v52  ;;  %3463 = vmatpush1.bf16.msra.mxu1 %v7355_v18 }
 0x465   :  { %3423 = vmatprep.subr.bf16.mxu0 %v7362_v19  ;;  %3464 = vmatprep.subr.bf16.mxu1 %v7367_v11 }
 0x466   :  { %v5718_v9 = vpop.eup %5717 }
 0x467   :  { %v2947_v17 = vmul.f32 %v5718_v9, %v5714_v7  ;;  %v5720_v22 = vpop.eup %5719  ;;  %v7433_v9 = vld [vmem:[%s7738_s9 + $0x88] ss:$16 sps:$4 sm:$0xff]  }
 0x468   :  { %3424 = vmatpush1.bf16.msra.mxu0 %v7376_v26  ;;  %3465 = vmatpush1.bf16.msra.mxu1 %v7381_v42  ;;  %v2946_v14 = vmul.f32 %v5720_v22, %v2638_v3  ;;  %8052 = vst [vmem:[#allocation37_spill] sm:$0xff] %v7433_v9  ;;  %v7441_v3 = vld [vmem:[%s7738_s9 + $0xa4] ss:$16 sps:$4 sm:$0xff]   ;;  %v7453_v22 = vld [vmem:[%s7738_s9 + $0xa0] ss:$16 sps:$4 sm:$0xff]  }
 0x469   :  { %3425 = vmatprep.subr.bf16.mxu0 %v7388_v5  ;;  %3466 = vmatprep.subr.bf16.mxu1 %v7393_v6  ;;  %8053 = vst [vmem:[#allocation38_spill] sm:$0xff] %v7441_v3  ;;  %8055 = vst [vmem:[#allocation40_spill] sm:$0xff] %v7453_v22 }
 0x46a   :  { %v7421_v7 = vadd.f32 %v2947_v17, %v2946_v14  ;;  %v7446_v17 = vld [vmem:[%s7738_s9 + $0xac] ss:$16 sps:$4 sm:$0xff]   ;;  %v7465_v14 = vld [vmem:[%s7738_s9 + $0xc4] ss:$16 sps:$4 sm:$0xff]  }
 0x46b   :  { %8054 = vst [vmem:[#allocation39_spill] sm:$0xff] %v7446_v17  ;;  %8057 = vst [vmem:[#allocation42_spill] sm:$0xff] %v7465_v14 }
 0x46c   :  { %3426 = vmatpush1.bf16.msra.mxu0 %v7402_v0  ;;  %3467 = vmatpush1.bf16.msra.mxu1 %v7407_v10  ;;  %5723 = vtanh.f32 %v7421_v7 }
 0x46d   :  { %3427 = vmatprep.subr.bf16.mxu0 %v7414_v60  ;;  %3468 = vmatprep.subr.bf16.mxu1 %v7419_v23 }
 0x470   :  { %3428 = vmatpush1.bf16.msra.mxu0 %v7428_v27  ;;  %3469 = vmatpush1.bf16.msra.mxu1 %v7433_v9  ;;  %v5722_v9 = vpop.eup %5721 }
 0x471   :  { %3429 = vmatprep.subr.bf16.mxu0 %v7441_v3  ;;  %3470 = vmatprep.subr.bf16.mxu1 %v7446_v17  ;;  %v7477_v3 = vld [vmem:[%s7738_s9 + $0xc0] ss:$16 sps:$4 sm:$0xff]   ;;  %v7482_v17 = vld [vmem:[%s7738_s9 + $0xc8] ss:$16 sps:$4 sm:$0xff]  }
 0x472   :  { %8059 = vst [vmem:[#allocation44_spill] sm:$0xff] %v7482_v17 }
 0x474   :  { %3430 = vmatpush1.bf16.msra.mxu0 %v7453_v22  ;;  %3471 = vmatpush1.bf16.msra.mxu1 %v7458_v29  ;;  %v7489_v22 = vld [vmem:[%s7738_s9 + $0xe4] ss:$16 sps:$4 sm:$0xff]   ;;  %v7494_v29 = vld [vmem:[%s7738_s9 + $0xec] ss:$16 sps:$4 sm:$0xff]  }
 0x475   :  { %3431 = vmatprep.subr.bf16.mxu0 %v7465_v14  ;;  %3472 = vmatprep.subr.bf16.mxu1 %v7470_v8  ;;  %v7501_v8 = vld [vmem:[%s7738_s9 + $0xe0] ss:$16 sps:$4 sm:$0xff]   ;;  %v7506_v14 = vld [vmem:[%s7738_s9 + $0xe8] ss:$16 sps:$4 sm:$0xff]  }
 0x476   :  { %v5724_v27 = vpop.eup %5723 }
 0x477   :  { %v2950_v23 = vmul.f32 %v5724_v27, %v5722_v9  ;;  %v8091_v27 = vld [vmem:[#allocation67_spill] sm:$0xff]  ;;  %v8092_v9 = vld [vmem:[#allocation68_spill] sm:$0xff] }
 0x478   :  { %3432 = vmatpush1.bf16.msra.mxu0 %v7477_v3  ;;  %3473 = vmatpush1.bf16.msra.mxu1 %v7482_v17 }
 0x479   :  { %3433 = vmatprep.subr.bf16.mxu0 %v7489_v22  ;;  %3474 = vmatprep.subr.bf16.mxu1 %v7494_v29  ;;  %v2951_v17 = vpack.c.bf16 %v2950_v23, %v2950_v23 }
 0x47c   :  { %3434 = vmatpush1.bf16.msra.mxu0 %v7501_v8  ;;  %3475 = vmatpush1.bf16.msra.mxu1 %v7506_v14 }
 0x47d   :  { %3742 = vmatprep.subr.bf16.mxu0 %v6903_v24  ;;  %3783 = vmatprep.subr.bf16.mxu1 %v6908_v25  ;;  %v7540_v24 = vpop.permute.xlu1 %3535 }
 0x47e   :  { %v3538_v25 = vmul.f32 %v7540_v24, %v2950_v23  ;;  %v8090_v23 = vld [vmem:[#allocation66_spill] sm:$0xff] }
 0x47f   :  { %3452 = vmatmul.mubr.bf16.vlgmr.msra.gmra.mrb[48].mxu0 %v2951_v17  ;;  %3493 = vmatmul.mubr.bf16.vlgmr.msra.gmra.mrb[48].mxu1 %v2951_v17 }
 0x480   :  { %3743 = vmatpush1.bf16.msra.mxu0 %v6915_v30  ;;  %3784 = vmatpush1.bf16.msra.mxu1 %v6920_v32  ;;  %v3549_v30 = vpack.c.bf16 %v3538_v25, %v3538_v25  ;;  %v8060_v32 = vld [vmem:[#allocation7_spill] sm:$0xff] }
 0x481   :  { %3744 = vmatprep.subr.bf16.mxu0 %v6929_v44  ;;  %3785 = vmatprep.subr.bf16.mxu1 %v6934_v41  ;;  %v8061_v44 = vld [vmem:[#allocation8_spill] sm:$0xff]  ;;  %v8062_v41 = vld [vmem:[#allocation9_spill] sm:$0xff] }
 0x482   :  { %3774 = vmatprep.mubr.bf16.mxu0 %v7894_v21  ;;  %3815 = vmatprep.mubr.bf16.mxu1 %v7894_v21 }
 0x484   :  { %3745 = vmatpush1.bf16.msra.mxu0 %v6941_v53  ;;  %3786 = vmatpush1.bf16.msra.mxu1 %v6946_v54  ;;  %v8063_v53 = vld [vmem:[#allocation10_spill] sm:$0xff]  ;;  %v8064_v54 = vld [vmem:[#allocation11_spill] sm:$0xff] }
 0x485   :  { %3746 = vmatprep.subr.bf16.mxu0 %v6953_v36  ;;  %3787 = vmatprep.subr.bf16.mxu1 %v6958_v37  ;;  %v8065_v36 = vld [vmem:[#allocation12_spill] sm:$0xff]  ;;  %v8066_v37 = vld [vmem:[#allocation13_spill] sm:$0xff] }
 0x488   :  { %3747 = vmatpush1.bf16.msra.mxu0 %v6967_v34  ;;  %3788 = vmatpush1.bf16.msra.mxu1 %v6972_v38  ;;  %v8067_v34 = vld [vmem:[#allocation14_spill] sm:$0xff]  ;;  %v8068_v38 = vld [vmem:[#allocation15_spill] sm:$0xff] }
 0x489   :  { %3748 = vmatprep.subr.bf16.mxu0 %v6979_v35  ;;  %3789 = vmatprep.subr.bf16.mxu1 %v6984_v39  ;;  %v8069_v35 = vld [vmem:[#allocation16_spill] sm:$0xff]  ;;  %v8070_v39 = vld [vmem:[#allocation17_spill] sm:$0xff] }
 0x48c   :  { %3749 = vmatpush1.bf16.msra.mxu0 %v6991_v31  ;;  %3790 = vmatpush1.bf16.msra.mxu1 %v6996_v16  ;;  %v8071_v31 = vld [vmem:[#allocation18_spill] sm:$0xff]  ;;  %v8072_v16 = vld [vmem:[#allocation19_spill] sm:$0xff] }
 0x48d   :  { %3750 = vmatprep.subr.bf16.mxu0 %v7003_v51  ;;  %3791 = vmatprep.subr.bf16.mxu1 %v7008_v45  ;;  %v8073_v51 = vld [vmem:[#allocation20_spill] sm:$0xff]  ;;  %v8074_v45 = vld [vmem:[#allocation21_spill] sm:$0xff] }
 0x490   :  { %3751 = vmatpush1.bf16.msra.mxu0 %v7015_v15  ;;  %3792 = vmatpush1.bf16.msra.mxu1 %v7020_v40  ;;  %v8075_v15 = vld [vmem:[#allocation22_spill] sm:$0xff]  ;;  %v8076_v40 = vld [vmem:[#allocation23_spill] sm:$0xff] }
 0x491   :  { %3752 = vmatprep.subr.bf16.mxu0 %v7027_v62  ;;  %3793 = vmatprep.subr.bf16.mxu1 %v7032_v13  ;;  %v8077_v62 = vld [vmem:[#allocation24_spill] sm:$0xff]  ;;  %v8078_v13 = vld [vmem:[#allocation25_spill] sm:$0xff] }
 0x494   :  { %3753 = vmatpush1.bf16.msra.mxu0 %v7039_v61  ;;  %3794 = vmatpush1.bf16.msra.mxu1 %v7044_v1  ;;  %v8079_v61 = vld [vmem:[#allocation26_spill] sm:$0xff]  ;;  %v8080_v1 = vld [vmem:[#allocation27_spill] sm:$0xff] }
 0x495   :  { %3754 = vmatprep.subr.bf16.mxu0 %v7051_v58  ;;  %3795 = vmatprep.subr.bf16.mxu1 %v7056_v46  ;;  %v8081_v58 = vld [vmem:[#allocation28_spill] sm:$0xff]  ;;  %v8082_v46 = vld [vmem:[#allocation29_spill] sm:$0xff] }
 0x498   :  { %3755 = vmatpush1.bf16.msra.mxu0 %v7063_v43  ;;  %3796 = vmatpush1.bf16.msra.mxu1 %v7068_v48  ;;  %v8083_v43 = vld [vmem:[#allocation30_spill] sm:$0xff]  ;;  %v8084_v48 = vld [vmem:[#allocation31_spill] sm:$0xff] }
 0x499   :  { %3756 = vmatprep.subr.bf16.mxu0 %v7075_v49  ;;  %3797 = vmatprep.subr.bf16.mxu1 %v7080_v56  ;;  %v8085_v49 = vld [vmem:[#allocation32_spill] sm:$0xff]  ;;  %v8086_v56 = vld [vmem:[#allocation33_spill] sm:$0xff] }
 0x49c   :  { %3757 = vmatpush1.bf16.msra.mxu0 %v7089_v59  ;;  %3798 = vmatpush1.bf16.msra.mxu1 %v7094_v63  ;;  %v8087_v59 = vld [vmem:[#allocation36_spill] sm:$0xff]  ;;  %v8088_v63 = vld [vmem:[#allocation65_spill] sm:$0xff] }
 0x49d   :  { %4078 = vmatprep.subr.bf16.mxu0 %v7107_v2  ;;  %4119 = vmatprep.subr.bf16.mxu1 %v8060_v32  ;;  %v8089_v2 = vld [vmem:[#allocation4_spill] sm:$0xff] }
 0x49f   :  { %3775 = vmatmul.mubr.bf16.vlgmr.msra.gmra.mrb[52].mxu0 %v3549_v30  ;;  %3816 = vmatmul.mubr.bf16.vlgmr.msra.gmra.mrb[52].mxu1 %v3549_v30 }
 0x4a0   :  { %4079 = vmatpush1.bf16.msra.mxu0 %v8061_v44  ;;  %4120 = vmatpush1.bf16.msra.mxu1 %v8062_v41 }
 0x4a1   :  { %4080 = vmatprep.subr.bf16.mxu0 %v8063_v53  ;;  %4121 = vmatprep.subr.bf16.mxu1 %v8064_v54 }
 0x4a2   :  { %4110 = vmatprep.mubr.bf16.mxu0 %v7894_v21  ;;  %4151 = vmatprep.mubr.bf16.mxu1 %v7894_v21 }
 0x4a4   :  { %4081 = vmatpush1.bf16.msra.mxu0 %v8065_v36  ;;  %4122 = vmatpush1.bf16.msra.mxu1 %v8066_v37 }
 0x4a5   :  { %4082 = vmatprep.subr.bf16.mxu0 %v8067_v34  ;;  %4123 = vmatprep.subr.bf16.mxu1 %v8068_v38 }
 0x4a8   :  { %4083 = vmatpush1.bf16.msra.mxu0 %v8069_v35  ;;  %4124 = vmatpush1.bf16.msra.mxu1 %v8070_v39 }
 0x4a9   :  { %4084 = vmatprep.subr.bf16.mxu0 %v8071_v31  ;;  %4125 = vmatprep.subr.bf16.mxu1 %v8072_v16 }
 0x4ac   :  { %4085 = vmatpush1.bf16.msra.mxu0 %v8073_v51  ;;  %4126 = vmatpush1.bf16.msra.mxu1 %v8074_v45 }
 0x4ad   :  { %4086 = vmatprep.subr.bf16.mxu0 %v8075_v15  ;;  %4127 = vmatprep.subr.bf16.mxu1 %v8076_v40 }
 0x4b0   :  { %4087 = vmatpush1.bf16.msra.mxu0 %v8077_v62  ;;  %4128 = vmatpush1.bf16.msra.mxu1 %v8078_v13 }
 0x4b1   :  { %4088 = vmatprep.subr.bf16.mxu0 %v8079_v61  ;;  %4129 = vmatprep.subr.bf16.mxu1 %v8080_v1 }
 0x4b4   :  { %4089 = vmatpush1.bf16.msra.mxu0 %v8081_v58  ;;  %4130 = vmatpush1.bf16.msra.mxu1 %v8082_v46  ;;  %v8093_v46 = vld [vmem:[#allocation5_spill] sm:$0xff] }
 0x4b5   :  { %4090 = vmatprep.subr.bf16.mxu0 %v8083_v43  ;;  %4131 = vmatprep.subr.bf16.mxu1 %v8084_v48 }
 0x4b8   :  { %4091 = vmatpush1.bf16.msra.mxu0 %v8085_v49  ;;  %4132 = vmatpush1.bf16.msra.mxu1 %v8086_v56 }
 0x4b9   :  { %4092 = vmatprep.subr.bf16.mxu0 %v8087_v59  ;;  %4133 = vmatprep.subr.bf16.mxu1 %v8088_v63 }
 0x4bc   :  { %4093 = vmatpush1.bf16.msra.mxu0 %v8089_v2  ;;  %4134 = vmatpush1.bf16.msra.mxu1 %v8090_v23 }
 0x4bd   :  { %4320 = vmatprep.subr.bf16.mxu0 %v8091_v27  ;;  %4361 = vmatprep.subr.bf16.mxu1 %v8092_v9  ;;  %v2640_v9 = vmul.f32 %v7082_v57, %v7318_v50 }
 0x532   :  { %v3211_v17 = vpop.f32.mrb[44].mxu0  ;;  %v3252_v25 = vpop.f32.mrb[44].mxu1 }
 0x533   :  { %v3213_v30 = vpop.f32.mrb[45].mxu0  ;;  %v3254_v32 = vpop.f32.mrb[45].mxu1 }
 0x534   :  { %v3215_v44 = vpop.f32.mrb[46].mxu0  ;;  %v3256_v41 = vpop.f32.mrb[46].mxu1 }
 0x535   :  { %v3216_v53 = vpop.f32.mrb[47].mxu0  ;;  %v3257_v54 = vpop.f32.mrb[47].mxu1 }
 0x536   :  { %v8094_v53 = vld [vmem:[#allocation74_spill] sm:$0xff] }
 0x552   :  { %v3453_v36 = vpop.f32.mrb[48].mxu0  ;;  %v3494_v37 = vpop.f32.mrb[48].mxu1 }
 0x553   :  { %v3454_v34 = vadd.f32 %v3453_v36, %v3211_v17  ;;  %v3495_v38 = vadd.f32 %v3494_v37, %v3252_v25  ;;  %v3455_v35 = vpop.f32.mrb[49].mxu0  ;;  %v3496_v39 = vpop.f32.mrb[49].mxu1  ;;  %v8095_v36 = vld [vmem:[#allocation75_spill] sm:$0xff] }
 0x554   :  { %v3456_v31 = vadd.f32 %v3455_v35, %v3213_v30  ;;  %v3497_v16 = vadd.f32 %v3496_v39, %v3254_v32  ;;  %v3457_v51 = vpop.f32.mrb[50].mxu0  ;;  %v3498_v45 = vpop.f32.mrb[50].mxu1  ;;  %v8096_v35 = vld [vmem:[#allocation76_spill] sm:$0xff] }
 0x555   :  { %v3501_v15 = vadd.f32 %v3454_v34, %v6829_v4  ;;  %v3458_v40 = vpop.f32.mrb[51].mxu0  ;;  %v3499_v62 = vpop.f32.mrb[51].mxu1  ;;  %v3503_v58 = vadd.f32 %v3495_v38, %v6843_v47 }
 0x556   :  { %v3502_v13 = vadd.f32 %v3456_v31, %v6833_v55  ;;  %v3504_v43 = vadd.f32 %v3497_v16, %v8093_v46  ;;  %v8097_v31 = vld [vmem:[#allocation77_spill] sm:$0xff] }
 0x557   :  { %v5051_v61 = vmul.f32 -1.442695, %v3501_v15  ;;  %v5053_v48 = vmul.f32 -1.442695, %v3503_v58 }
 0x558   :  { %v5052_v1 = vmul.f32 -1.442695, %v3502_v13 }
 0x559   :  { %5725 = vpow2.f32 %v5051_v61 }
 0x55a   :  { %5727 = vpow2.f32 %v5052_v1 }
 0x55b   :  { %5729 = vtanh.f32 %v3504_v43 }
 0x55c   :  { %5731 = vpow2.f32 %v5053_v48 }
 0x563   :  { %v5726_v49 = vpop.eup %5725 }
 0x564   :  { %v3514_v56 = vadd.f32 1.0, %v5726_v49  ;;  %v5728_v59 = vpop.eup %5727 }
 0x565   :  { %v3515_v63 = vadd.f32 1.0, %v5728_v59  ;;  %v5730_v2 = vpop.eup %5729 }
 0x566   :  { %5733 = vrcp.f32 %v3514_v56  ;;  %v5732_v23 = vpop.eup %5731 }
 0x567   :  { %5735 = vrcp.f32 %v3515_v63  ;;  %v3516_v30 = vadd.f32 1.0, %v5732_v23 }
 0x569   :  { %5737 = vrcp.f32 %v3516_v30  ;;  %v8108_v30 = vld [vmem:[#allocation6_spill] sm:$0xff] }
 0x570   :  { %v5734_v27 = vpop.eup %5733 }
 0x571   :  { %v3525_v17 = vmul.f32 %v5734_v27, %v5730_v2  ;;  %v5736_v25 = vpop.eup %5735 }
 0x572   :  { %v3776_v32 = vpop.f32.mrb[52].mxu0  ;;  %v3817_v44 = vpop.f32.mrb[52].mxu1  ;;  %v3524_v41 = vmul.f32 %v5736_v25, %v2640_v9  ;;  %v8107_v9 = vld [vmem:[#allocation44_spill] sm:$0xff] }
 0x573   :  { %v3824_v54 = vadd.f32 %v3776_v32, %v8094_v53  ;;  %v3826_v37 = vadd.f32 %v3817_v44, %v8095_v36  ;;  %v3778_v34 = vpop.f32.mrb[53].mxu0  ;;  %v3819_v38 = vpop.f32.mrb[53].mxu1  ;;  %v8109_v32 = vld [vmem:[#allocation69_spill] sm:$0xff]  ;;  %v5643_v53 = vld [vmem:[%s7743_s12 + $0x30] sm:$0xff]  }
 0x574   :  { %v3825_v39 = vadd.f32 %v3778_v34, %v8096_v35  ;;  %v3827_v16 = vadd.f32 %v3819_v38, %v8097_v31  ;;  %v3780_v51 = vpop.f32.mrb[54].mxu0  ;;  %v3821_v45 = vpop.f32.mrb[54].mxu1  ;;  %v7595_v15 = vadd.f32 %v3525_v17, %v3524_v41  ;;  %v4442_v44 = vpack.c.bf16 %v8109_v32, %v8108_v30  ;;  %v5642_v41 = vld [vmem:[%s7743_s12 + $0x28] sm:$0xff]  }
 0x575   :  { %v5087_v50 = vmul.f32 -1.442695, %v3824_v54  ;;  %v3781_v57 = vpop.f32.mrb[55].mxu0  ;;  %v3822_v40 = vpop.f32.mrb[55].mxu1  ;;  %v5089_v61 = vmul.f32 -1.442695, %v3826_v37 }
 0x576   :  { %v5088_v62 = vmul.f32 -1.442695, %v3825_v39  ;;  %5739 = vtanh.f32 %v7595_v15  ;;  %v5738_v13 = vpop.eup %5737  ;;  %v5644_v54 = vld [vmem:[%s7743_s12 + $0x38] sm:$0xff]  }
 0x577   :  { %5741 = vpow2.f32 %v5087_v50 }
 0x578   :  { %5743 = vpow2.f32 %v5088_v62 }
 0x579   :  { %5745 = vtanh.f32 %v3827_v16 }
 0x57a   :  { %5747 = vpow2.f32 %v5089_v61 }
 0x580   :  { %v5740_v1 = vpop.eup %5739 }
 0x581   :  { %v5742_v58 = vpop.eup %5741  ;;  %v7598_v43 = vmul.f32 %v5740_v1, %v5738_v13 }
 0x582   :  { %v3837_v48 = vadd.f32 1.0, %v5742_v58  ;;  %v5744_v49 = vpop.eup %5743 }
 0x583   :  { %v3540_v56 = vmul.f32 %v7540_v24, %v7598_v43  ;;  %v3838_v59 = vadd.f32 1.0, %v5744_v49  ;;  %v5746_v2 = vpop.eup %5745 }
 0x584   :  { %5749 = vrcp.f32 %v3837_v48  ;;  %v5748_v23 = vpop.eup %5747 }
 0x585   :  { %v3885_v63 = vpack.c.bf16 %v3540_v56, %v3540_v56  ;;  %5751 = vrcp.f32 %v3838_v59  ;;  %v3839_v27 = vadd.f32 1.0, %v5748_v23 }
 0x587   :  { %4111 = vmatmul.mubr.bf16.vlgmr.msra.gmra.mrb[56].mxu0 %v3885_v63  ;;  %4152 = vmatmul.mubr.bf16.vlgmr.msra.gmra.mrb[56].mxu1 %v3885_v63  ;;  %5753 = vrcp.f32 %v3839_v27 }
 0x588   :  { %4321 = vmatpush1.bf16.msra.mxu0 %v7328_v28  ;;  %4362 = vmatpush1.bf16.msra.mxu1 %v7333_v33  ;;  %v3539_v33 = vmul.f32 %v7540_v24, %v7421_v7 }
 0x589   :  { %4322 = vmatprep.subr.bf16.mxu0 %v7338_v12  ;;  %4363 = vmatprep.subr.bf16.mxu1 %v7343_v20 }
 0x58a   :  { %4352 = vmatprep.mubr.bf16.mxu0 %v7894_v21  ;;  %4393 = vmatprep.mubr.bf16.mxu1 %v7894_v21 }
 0x58c   :  { %4323 = vmatpush1.bf16.msra.mxu0 %v7350_v52  ;;  %4364 = vmatpush1.bf16.msra.mxu1 %v7355_v18  ;;  %v8098_v18 = vld [vmem:[#allocation34_spill] sm:$0xff] }
 0x58d   :  { %4324 = vmatprep.subr.bf16.mxu0 %v7362_v19  ;;  %4365 = vmatprep.subr.bf16.mxu1 %v7367_v11  ;;  %v8099_v19 = vld [vmem:[#allocation35_spill] sm:$0xff]  ;;  %v8100_v11 = vld [vmem:[#allocation37_spill] sm:$0xff] }
 0x58e   :  { %v5750_v28 = vpop.eup %5749 }
 0x58f   :  { %v3848_v12 = vmul.f32 %v5750_v28, %v5746_v2  ;;  %v5752_v20 = vpop.eup %5751 }
 0x590   :  { %4325 = vmatpush1.bf16.msra.mxu0 %v7376_v26  ;;  %4366 = vmatpush1.bf16.msra.mxu1 %v7381_v42  ;;  %v3847_v21 = vmul.f32 %v5752_v20, %v3539_v33  ;;  %v8101_v26 = vld [vmem:[#allocation38_spill] sm:$0xff]  ;;  %v8102_v42 = vld [vmem:[#allocation39_spill] sm:$0xff] }
 0x591   :  { %4326 = vmatprep.subr.bf16.mxu0 %v7388_v5  ;;  %4367 = vmatprep.subr.bf16.mxu1 %v7393_v6  ;;  %v8103_v5 = vld [vmem:[#allocation40_spill] sm:$0xff]  ;;  %v8104_v6 = vld [vmem:[#allocation41_spill] sm:$0xff]  ;;  %v5754_v7 = vpop.eup %5753 }
 0x592   :  { %v3849_v52 = vadd.f32 %v3848_v12, %v3847_v21 }
 0x594   :  { %4327 = vmatpush1.bf16.msra.mxu0 %v7402_v0  ;;  %4368 = vmatpush1.bf16.msra.mxu1 %v7407_v10  ;;  %5755 = vtanh.f32 %v3849_v52  ;;  %4435 = vst [vmem:[%s7741_s16] sm:$0xff] %v3849_v52  ;;  %v8105_v0 = vld [vmem:[#allocation42_spill] sm:$0xff]  ;;  %v8106_v10 = vld [vmem:[#allocation43_spill] sm:$0xff] }
 0x595   :  { %4328 = vmatprep.subr.bf16.mxu0 %v7414_v60  ;;  %4369 = vmatprep.subr.bf16.mxu1 %v8098_v18  ;;  %v3541_v18 = vmul.f32 %v7540_v24, %v7595_v15  ;;  %v8110_v15 = vlaneseq }
 0x598   :  { %4329 = vmatpush1.bf16.msra.mxu0 %v8099_v19  ;;  %4370 = vmatpush1.bf16.msra.mxu1 %v8100_v11 }
 0x599   :  { %4330 = vmatprep.subr.bf16.mxu0 %v8101_v26  ;;  %4371 = vmatprep.subr.bf16.mxu1 %v8102_v42 }
 0x59c   :  { %4331 = vmatpush1.bf16.msra.mxu0 %v8103_v5  ;;  %4372 = vmatpush1.bf16.msra.mxu1 %v8104_v6 }
 0x59d   :  { %4332 = vmatprep.subr.bf16.mxu0 %v8105_v0  ;;  %4373 = vmatprep.subr.bf16.mxu1 %v8106_v10  ;;  %v7682_v0 = vand.u32 127, %v8110_v15  ;;  %v5159_v10 = vld [vmem:[%s7744_s13] ss:$0 sm:$0xff] }
 0x59e   :  { %v5756_v60 = vpop.eup %5755 }
 0x59f   :  { %v3851_v17 = vmul.f32 %v5756_v60, %v5754_v7  ;;  %vm4566_vm0 = vcmp.lt.s32.totalorder %v7682_v0, 8  ;;  %vm4643_vm9 = vcmp.eq.s32.totalorder %v7682_v0, 9 }
 0x5a0   :  { %4333 = vmatpush1.bf16.msra.mxu0 %v7477_v3  ;;  %4374 = vmatpush1.bf16.msra.mxu1 %v8107_v9  ;;  %v5637_v3 = vld [vmem:[%s7743_s12] sm:$0xff]  }
 0x5a1   :  { %4334 = vmatprep.subr.bf16.mxu0 %v7489_v22  ;;  %4375 = vmatprep.subr.bf16.mxu1 %v7494_v29  ;;  %4432 = vst [vmem:[%s7742_s15] sm:$0xff] %v3851_v17  ;;  %v3852_v25 = vpack.c.bf16 %v3851_v17, %v3851_v17  ;;  %v5638_v22 = vld [vmem:[%s7743_s12 + $0x8] sm:$0xff]   ;;  %v5640_v29 = vld [vmem:[%s7743_s12 + $0x18] sm:$0xff]  }
 0x5a4   :  { %4335 = vmatpush1.bf16.msra.mxu0 %v7501_v8  ;;  %4376 = vmatpush1.bf16.msra.mxu1 %v7506_v14  ;;  %v5639_v8 = vld [vmem:[%s7743_s12 + $0x10] sm:$0xff]   ;;  %v5641_v14 = vld [vmem:[%s7743_s12 + $0x20] sm:$0xff]  }
 0x5a5   :  { %5234 = vmatprep.subr.bf16.mxu0 %v5637_v3 }
 0x5a7   :  { %4353 = vmatmul.mubr.bf16.vlgmr.msra.gmra.mrb[60].mxu0 %v3852_v25  ;;  %4394 = vmatmul.mubr.bf16.vlgmr.msra.gmra.mrb[60].mxu1 %v3852_v25 }
 0x5a8   :  { %5250 = vmatprep.mubr.bf16.mxu0 %v4442_v44  ;;  %5235 = vmatpush3.bf16.msra.mxu0 %v5637_v3 }
 0x5a9   :  { %5236 = vmatprep.subr.bf16.mxu0 %v5638_v22 }
 0x5ac   :  { %5237 = vmatpush3.bf16.msra.mxu0 %v5638_v22 }
 0x5ad   :  { %5238 = vmatprep.subr.bf16.mxu0 %v5639_v8 }
 0x5b0   :  { %5239 = vmatpush3.bf16.msra.mxu0 %v5639_v8 }
 0x5b1   :  { %5240 = vmatprep.subr.bf16.mxu0 %v5640_v29 }
 0x5b4   :  { %5241 = vmatpush3.bf16.msra.mxu0 %v5640_v29 }
 0x5b5   :  { %5242 = vmatprep.subr.bf16.mxu0 %v5641_v14 }
 0x5b8   :  { %5243 = vmatpush3.bf16.msra.mxu0 %v5641_v14 }
 0x5b9   :  { %5244 = vmatprep.subr.bf16.mxu0 %v5642_v41 }
 0x5bc   :  { %5245 = vmatpush3.bf16.msra.mxu0 %v5642_v41 }
 0x5bd   :  { %5246 = vmatprep.subr.bf16.mxu0 %v5643_v53 }
 0x5c0   :  { %5247 = vmatpush3.bf16.msra.mxu0 %v5643_v53 }
 0x5c1   :  { %5248 = vmatprep.subr.bf16.mxu0 %v5644_v54 }
 0x5c4   :  { %5249 = vmatpush3.bf16.msra.mxu0 %v5644_v54 }
 0x65a   :  { %v4112_v36 = vpop.f32.mrb[56].mxu0  ;;  %v4153_v37 = vpop.f32.mrb[56].mxu1 }
 0x65b   :  { %v4114_v34 = vpop.f32.mrb[57].mxu0  ;;  %v4155_v38 = vpop.f32.mrb[57].mxu1 }
 0x65c   :  { %v4116_v35 = vpop.f32.mrb[58].mxu0  ;;  %v4157_v39 = vpop.f32.mrb[58].mxu1 }
 0x65d   :  { %v4117_v31 = vpop.f32.mrb[59].mxu0  ;;  %v4158_v16 = vpop.f32.mrb[59].mxu1 }
 0x67a   :  { %v4354_v51 = vpop.f32.mrb[60].mxu0  ;;  %v4395_v45 = vpop.f32.mrb[60].mxu1 }
 0x67b   :  { %v4355_v50 = vadd.f32 %v4354_v51, %v4112_v36  ;;  %v4396_v57 = vadd.f32 %v4395_v45, %v4153_v37  ;;  %v4356_v40 = vpop.f32.mrb[61].mxu0  ;;  %v4397_v62 = vpop.f32.mrb[61].mxu1 }
 0x67c   :  { %v4357_v13 = vadd.f32 %v4356_v40, %v4114_v34  ;;  %v4398_v61 = vadd.f32 %v4397_v62, %v4155_v38  ;;  %v4358_v1 = vpop.f32.mrb[62].mxu0  ;;  %v4399_v58 = vpop.f32.mrb[62].mxu1 }
 0x67d   :  { %v4402_v48 = vadd.f32 %v4355_v50, %v6829_v4  ;;  %v4359_v49 = vpop.f32.mrb[63].mxu0  ;;  %v4400_v56 = vpop.f32.mrb[63].mxu1  ;;  %v4404_v23 = vadd.f32 %v4396_v57, %v6843_v47 }
 0x67e   :  { %v4403_v59 = vadd.f32 %v4357_v13, %v6833_v55  ;;  %v4405_v28 = vadd.f32 %v4398_v61, %v8093_v46 }
 0x67f   :  { %v5154_v63 = vmul.f32 -1.442695, %v4402_v48  ;;  %v5156_v33 = vmul.f32 -1.442695, %v4404_v23 }
 0x680   :  { %v5155_v2 = vmul.f32 -1.442695, %v4403_v59 }
 0x681   :  { %5757 = vpow2.f32 %v5154_v63 }
 0x682   :  { %5759 = vpow2.f32 %v5155_v2 }
 0x683   :  { %5761 = vtanh.f32 %v4405_v28 }
 0x684   :  { %5763 = vpow2.f32 %v5156_v33 }
 0x68b   :  { %v5758_v12 = vpop.eup %5757 }
 0x68c   :  { %v4415_v20 = vadd.f32 1.0, %v5758_v12  ;;  %v5760_v27 = vpop.eup %5759 }
 0x68d   :  { %v4416_v4 = vadd.f32 1.0, %v5760_v27  ;;  %v5762_v21 = vpop.eup %5761 }
 0x68e   :  { %5765 = vrcp.f32 %v4415_v20  ;;  %v5764_v52 = vpop.eup %5763 }
 0x68f   :  { %5767 = vrcp.f32 %v4416_v4  ;;  %v4417_v47 = vadd.f32 1.0, %v5764_v52 }
 0x691   :  { %5769 = vrcp.f32 %v4417_v47 }
 0x698   :  { %v5766_v55 = vpop.eup %5765 }
 0x699   :  { %v4426_v19 = vmul.f32 %v5766_v55, %v5762_v21  ;;  %v5768_v11 = vpop.eup %5767 }
 0x69a   :  { %v4425_v26 = vmul.f32 %v5768_v11, %v3541_v18 }
 0x69b   :  { %v5770_v42 = vpop.eup %5769 }
 0x69c   :  { %v4427_v46 = vadd.f32 %v4426_v19, %v4425_v26 }
 0x69e   :  { %5771 = vtanh.f32 %v4427_v46  ;;  %5158 = vst [vmem:[%s7741_s16 + $0x8] sm:$0xff] %v4427_v46 }
 0x6a8   :  { %v5772_v5 = vpop.eup %5771 }
 0x6a9   :  { %v4429_v6 = vmul.f32 %v5772_v5, %v5770_v42 }
 0x6ab   :  { %5157 = vst [vmem:[%s7742_s15 + $0x8] sm:$0xff] %v4429_v6  ;;  %v4443_v24 = vpack.c.bf16 %v4429_v6, %v7598_v43 }
 0x6ad   :  { %5251 = vmatmul.mubr.bf16.vlgmr.msra.gmra.mrb[64].mxu0 %v4443_v24 }
 0x780   :  { %v5252_v7 = vpop.f32.mrb[64].mxu0 }
 0x781   :  { %v4549_v60 = vpop.f32.mrb[65].mxu0  ;;  %v7690_v30 = vadd.f32 %v5252_v7, %v5159_v10 }
 0x782   :  { %v7688_v9 = vadd.f32 %v5159_v10, %v4549_v60  ;;  %v5253_v17 = vpop.f32.mrb[66].mxu0 }
 0x783   :  { %v4552_v25 = vpop.f32.mrb[67].mxu0  ;;  %v7696_v3 = vadd.f32 %v5253_v17, %v5159_v10  ;;  %v4569_v22 = vsel %vm4566_vm0, %v7690_v30, -inf }
 0x784   :  { %v7692_v32 = vadd.f32 %v5159_v10, %v4552_v25  ;;  %v4567_v43 = vsel %vm4566_vm0, %v7688_v9, -inf }
 0x785   :  { %4571 = vmax.xlane.f32.xlu0 %v4567_v43  ;;  %v4570_v8 = vsel %vm4566_vm0, %v7696_v3, -inf }
 0x786   :  { %v4568_v44 = vsel %vm4566_vm0, %v7692_v32, -inf }
 0x787   :  { %4573 = vmax.xlane.f32.xlu1 %v4568_v44 }
 0x789   :  { %4575 = vmax.xlane.f32.xlu0 %v4569_v22 }
 0x78d   :  { %4577 = vmax.xlane.f32.xlu0 %v4570_v8 }
 0x812   :  { %v4572_v29 = vpop.xlane.xlu0 %4571 }
 0x813   :  { %vm4579_vm1 = vcmp.ge.f32.partialorder %v4567_v43, %v4572_v29 }
 0x814   :  { %v4583_v14 = vsel %vm4579_vm1, %v7682_v0, 128  ;;  %v4574_v41 = vpop.xlane.xlu1 %4573 }
 0x815   :  { %vm4580_vm2 = vcmp.ge.f32.partialorder %v4568_v44, %v4574_v41  ;;  %v4588_v53 = vshra.s32 %v4583_v14, 16  ;;  %v4587_v57 = vand.u32 65535, %v4583_v14 }
 0x816   :  { %v4584_v54 = vsel %vm4580_vm2, %v7682_v0, 128  ;;  %v4576_v36 = vpop.xlane.xlu0 %4575 }
 0x817   :  { %vm4581_vm3 = vcmp.ge.f32.partialorder %v4569_v22, %v4576_v36  ;;  %v4590_v37 = vcvt.s32.f32 %v4588_v53  ;;  %v4602_v34 = vshra.s32 %v4584_v54, 16  ;;  %v4601_v40 = vand.u32 65535, %v4584_v54 }
 0x818   :  { %v4585_v38 = vsel %vm4581_vm3, %v7682_v0, 128  ;;  %v4589_v61 = vcvt.s32.f32 %v4587_v57 }
 0x819   :  { %4591 = vmin.xlane.f32.xlu1 %v4590_v37  ;;  %v4604_v35 = vcvt.s32.f32 %v4602_v34  ;;  %v4616_v39 = vshra.s32 %v4585_v38, 16  ;;  %v4615_v62 = vand.u32 65535, %v4585_v38  ;;  %v4603_v48 = vcvt.s32.f32 %v4601_v40 }
 0x81a   :  { %v4578_v31 = vpop.xlane.xlu0 %4577 }
 0x81b   :  { %vm4582_vm4 = vcmp.ge.f32.partialorder %v4570_v8, %v4578_v31  ;;  %4605 = vmin.xlane.f32.xlu0 %v4604_v35  ;;  %v4618_v16 = vcvt.s32.f32 %v4616_v39  ;;  %v4617_v63 = vcvt.s32.f32 %v4615_v62 }
 0x81c   :  { %v4586_v51 = vsel %vm4582_vm4, %v7682_v0, 128 }
 0x81d   :  { %4619 = vmin.xlane.f32.xlu1 %v4618_v16  ;;  %v4630_v45 = vshra.s32 %v4586_v51, 16  ;;  %v4629_v49 = vand.u32 65535, %v4586_v51 }
 0x81f   :  { %v4632_v50 = vcvt.s32.f32 %v4630_v45  ;;  %v4631_v28 = vcvt.s32.f32 %v4629_v49 }
 0x821   :  { %4633 = vmin.xlane.f32.xlu0 %v4632_v50 }
 0x8a6   :  { %v4592_v13 = vpop.xlane.xlu1 %4591 }
 0x8a7   :  { %vm4593_vm5 = vcmp.eq.f32.partialorder %v4590_v37, %v4592_v13  ;;  %v4598_v12 = vcvt.f32.s32 %v4592_v13 }
 0x8a8   :  { %v4606_v1 = vpop.xlane.xlu0 %4605  ;;  %v4594_v58 = vsel %vm4593_vm5, %v4589_v61, inf }
 0x8a9   :  { %4595 = vmin.xlane.f32.xlu1 %v4594_v58  ;;  %vm4607_vm6 = vcmp.eq.f32.partialorder %v4604_v35, %v4606_v1  ;;  %v4612_v20 = vcvt.f32.s32 %v4606_v1  ;;  %v4599_v21 = vshll.u32 %v4598_v12, 16 }
 0x8aa   :  { %v4620_v56 = vpop.xlane.xlu1 %4619  ;;  %v4608_v59 = vsel %vm4607_vm6, %v4603_v48, inf }
 0x8ab   :  { %4609 = vmin.xlane.f32.xlu0 %v4608_v59  ;;  %vm4621_vm7 = vcmp.eq.f32.partialorder %v4618_v16, %v4620_v56  ;;  %v4626_v27 = vcvt.f32.s32 %v4620_v56  ;;  %v4613_v18 = vshll.u32 %v4612_v20, 16 }
 0x8ac   :  { %v4622_v2 = vsel %vm4621_vm7, %v4617_v63, inf }
 0x8ad   :  { %4623 = vmin.xlane.f32.xlu1 %v4622_v2  ;;  %v4627_v47 = vshll.u32 %v4626_v27, 16 }
 0x8ae   :  { %v4634_v23 = vpop.xlane.xlu0 %4633 }
 0x8af   :  { %vm4635_vm8 = vcmp.eq.f32.partialorder %v4632_v50, %v4634_v23  ;;  %v4640_v46 = vcvt.f32.s32 %v4634_v23 }
 0x8b0   :  { %v4636_v33 = vsel %vm4635_vm8, %v4631_v28, inf }
 0x8b1   :  { %4637 = vmin.xlane.f32.xlu0 %v4636_v33  ;;  %v4641_v60 = vshll.u32 %v4640_v46, 16 }
 0x936   :  { %v4596_v4 = vpop.xlane.xlu1 %4595 }
 0x937   :  { %v4597_v52 = vcvt.f32.s32 %v4596_v4 }
 0x938   :  { %v4610_v55 = vpop.xlane.xlu0 %4609 }
 0x939   :  { %v4600_v19 = vadd.s32 %v4599_v21, %v4597_v52  ;;  %v4611_v11 = vcvt.f32.s32 %v4610_v55 }
 0x93a   :  { %v4624_v26 = vpop.xlane.xlu1 %4623 }
 0x93b   :  { %v4644_v42 = vcvt.s32.f32 %v4600_v19  ;;  %v4614_v5 = vadd.s32 %v4613_v18, %v4611_v11  ;;  %v4625_v6 = vcvt.f32.s32 %v4624_v26 }
 0x93d   :  { %v4648_v24 = vsel %vm4643_vm9, %v4644_v42, %v7688_v9  ;;  %v4645_v15 = vcvt.s32.f32 %v4614_v5  ;;  %v4628_v10 = vadd.s32 %v4627_v47, %v4625_v6 }
 0x93e   :  { %4652 = vst [vmem:[%s7745_s14] sm:$0xff] %v4648_v24  ;;  %v4638_v7 = vpop.xlane.xlu0 %4637 }
 0x93f   :  { %v4649_v17 = vsel %vm4643_vm9, %v4645_v15, %v7692_v32  ;;  %v4646_v25 = vcvt.s32.f32 %v4628_v10  ;;  %v4639_v43 = vcvt.f32.s32 %v4638_v7 }
 0x940   :  { %4653 = vst [vmem:[%s7745_s14 + $0x8] sm:$0xff] %v4649_v17 }
 0x941   :  { %v4650_v9 = vsel %vm4643_vm9, %v4646_v25, %v7690_v30  ;;  %v4642_v44 = vadd.s32 %v4641_v60, %v4639_v43 }
 0x942   :  { %4654 = vst [vmem:[%s7745_s14 + $0x10] sm:$0xff] %v4650_v9 }
 0x943   :  { %v4647_v22 = vcvt.s32.f32 %v4642_v44 }
 0x945   :  { %v4651_v32 = vsel %vm4643_vm9, %v4647_v22, %v7696_v3 }
 0x946   :  { %4655 = vst [vmem:[%s7745_s14 + $0x18] sm:$0xff] %v4651_v32 }

</bundles_post_ra>
